<compile_context>
chip_gen: v5e
topology: v5e:2x2
jax: 0.10.0
libtpu: 0.0.40
codegen_flags: <defaults>
</compile_context>

<pallas_src>
import functools

import jax
import jax.numpy as jnp
from jax.experimental import pallas as pl
from jax.experimental.pallas import tpu as pltpu


def _round_up(x, m):
    return (x + m - 1) // m * m


def _encoder_kernel(xl_ref, xr_ref, hl_ref, cl_ref, hr_ref, cr_ref,
                    w_ref, b_ref, out_ref, xh_ref, *, hidden, in_dim, block_n):
    H = hidden
    bn = block_n

    # Pack [x | h] for both children into one (2*bn, in_dim+H) operand so the
    # four ih/hh matmuls of the two LSTMCell calls collapse into one MXU pass.
    xh_ref[:bn, :in_dim] = xl_ref[...]
    xh_ref[bn:, :in_dim] = xr_ref[...]
    xh_ref[:bn, in_dim:] = hl_ref[...]
    xh_ref[bn:, in_dim:] = hr_ref[...]

    gates = (jnp.dot(xh_ref[...], w_ref[...],
                     preferred_element_type=jnp.float32)
             + b_ref[...].astype(jnp.float32))          # (2*bn, 4H), f32

    # PyTorch LSTMCell gate order: i, f, g, o
    i = jax.nn.sigmoid(gates[:, 0 * H:1 * H])
    f = jax.nn.sigmoid(gates[:, 1 * H:2 * H])
    g = jnp.tanh(gates[:, 2 * H:3 * H])
    o = jax.nn.sigmoid(gates[:, 3 * H:4 * H])

    # Cell-state update for both children at once (rows 0:bn = left, bn: = right).
    c_prev = jnp.concatenate(
        [cl_ref[...], cr_ref[...]], axis=0).astype(jnp.float32)   # (2*bn, H)
    c_new = f * c_prev + i * g
    h_new = o * jnp.tanh(c_new)

    h_sum = h_new[:bn] + h_new[bn:]
    c_sum = c_new[:bn] + c_new[bn:]

    # out = concat(h_sum, c_sum, axis=1); two sublane-full stores into one tile.
    out_ref[:, :H] = h_sum.astype(out_ref.dtype)
    out_ref[:, H:] = c_sum.astype(out_ref.dtype)


def pack_lstm_params(w_ih, w_hh, b_ih, b_hh):
    """One-time parameter prep (call OUTSIDE the per-node hot path).

    w_ih: (4H, in_dim), w_hh: (4H, H), b_ih/b_hh: (4H,)  -- PyTorch LSTMCell layout.
    Returns w_packed: (in_dim + H, 4H) = [Wih^T; Whh^T], bias: (1, 4H) = b_ih + b_hh.
    """
    w_packed = jnp.concatenate(
        [jnp.transpose(w_ih), jnp.transpose(w_hh)], axis=0).astype(jnp.float32)
    bias = (b_ih + b_hh).reshape(1, -1).astype(jnp.float32)
    return w_packed, bias


@functools.partial(jax.jit, static_argnames=("block_n",))
def encoder_forward(X_left, X_right, Feature_left, Feature_right,
                    w_packed, bias, *, block_n=256):
    n, in_dim = X_left.shape
    H = Feature_left.shape[1] // 2
    assert w_packed.shape == (in_dim + H, 4 * H)
    assert bias.shape == (1, 4 * H)

    # Layout plumbing: split features into lane-contiguous h / c halves so the
    # kernel never slices its inputs at sub-vreg lane offsets.
    h_l, c_l = Feature_left[:, :H], Feature_left[:, H:]
    h_r, c_r = Feature_right[:, :H], Feature_right[:, H:]

    # Tile the node axis; pad rows up to a multiple of block_n (multiple of 8).
    block_n = min(block_n, _round_up(n, 8))
    n_pad = _round_up(n, block_n)

    def pad_rows(a):
        return a if n_pad == n else jnp.pad(a, ((0, n_pad - n), (0, 0)))

    xl, xr, h_l, c_l, h_r, c_r = map(
        pad_rows, (X_left, X_right, h_l, c_l, h_r, c_r))

    def row_spec(d):
        return pl.BlockSpec((block_n, d), lambda i: (i, 0))

    def pinned_spec(shape):
        return pl.BlockSpec(shape, lambda i: (0, 0))   # VMEM-resident across grid

    out = pl.pallas_call(
        functools.partial(_encoder_kernel, hidden=H, in_dim=in_dim,
                          block_n=block_n),
        out_shape=jax.ShapeDtypeStruct((n_pad, 2 * H), X_left.dtype),
        grid=(n_pad // block_n,),
        in_specs=[row_spec(in_dim), row_spec(in_dim),
                  row_spec(H), row_spec(H), row_spec(H), row_spec(H),
                  pinned_spec((in_dim + H, 4 * H)),
                  pinned_spec((1, 4 * H))],
        out_specs=row_spec(2 * H),
        scratch_shapes=[pltpu.VMEM((2 * block_n, in_dim + H), X_left.dtype)],
        compiler_params=pltpu.CompilerParams(
            dimension_semantics=("parallel",),
            vmem_limit_bytes=32 * 1024 * 1024),
    )(xl, xr, h_l, c_l, h_r, c_r, w_packed, bias)

    return out[:n]


def _reference(X_left, X_right, Feature_left, Feature_right,
               w_ih, w_hh, b_ih, b_hh):
    H = Feature_left.shape[1] // 2

    def cell(x, h, c):
        gates = x @ w_ih.T + b_ih + h @ w_hh.T + b_hh
        i = jax.nn.sigmoid(gates[:, 0 * H:1 * H])
        f = jax.nn.sigmoid(gates[:, 1 * H:2 * H])
        g = jnp.tanh(gates[:, 2 * H:3 * H])
        o = jax.nn.sigmoid(gates[:, 3 * H:4 * H])
        c_new = f * c + i * g
        return o * jnp.tanh(c_new), c_new

    h_l, c_l = Feature_left[:, :H], Feature_left[:, H:]
    h_r, c_r = Feature_right[:, :H], Feature_right[:, H:]
    h_lo, c_lo = cell(X_left, h_l, c_l)
    h_ro, c_ro = cell(X_right, h_r, c_r)
    return jnp.concatenate([h_lo + h_ro, c_lo + c_ro], axis=1)


if __name__ == "__main__":
    # Module defaults: in_channel=8, n_feature=128 (H=64). Batch a full tree
    # level of n=256 nodes through one pallas_call with a grid over the rows.
    n = 256
    in_channel = 8
    n_feature = 128
    H = n_feature // 2

    key = jax.random.PRNGKey(0)
    k = jax.random.split(key, 8)

    X_left = jax.random.normal(k[0], (n, in_channel), jnp.float32)
    X_right = jax.random.normal(k[1], (n, in_channel), jnp.float32)
    Feature_left = jax.random.normal(k[2], (n, n_feature), jnp.float32)
    Feature_right = jax.random.normal(k[3], (n, n_feature), jnp.float32)

    # PyTorch-style uniform(-1/sqrt(H), 1/sqrt(H)) LSTMCell init.
    bound = 1.0 / jnp.sqrt(jnp.float32(H))
    w_ih = jax.random.uniform(k[4], (4 * H, in_channel), jnp.float32, -bound, bound)
    w_hh = jax.random.uniform(k[5], (4 * H, H), jnp.float32, -bound, bound)
    b_ih = jax.random.uniform(k[6], (4 * H,), jnp.float32, -bound, bound)
    b_hh = jax.random.uniform(k[7], (4 * H,), jnp.float32, -bound, bound)

    # One-time prep, hoisted out of the per-call hot path.
    w_packed, bias = pack_lstm_params(w_ih, w_hh, b_ih, b_hh)

    out = encoder_forward(X_left, X_right, Feature_left, Feature_right,
                          w_packed, bias, block_n=128)
    out = jax.block_until_ready(out)

    ref = _reference(X_left, X_right, Feature_left, Feature_right,
                     w_ih, w_hh, b_ih, b_hh)
    assert out.shape == (n, n_feature)
    assert jnp.allclose(out, ref, atol=1e-5, rtol=1e-5)

    print("KERNEL_OK")
</pallas_src>

<mosaic_0001>
module attributes {stable_mosaic.version = 11 : i64} {
  func.func @_encoder_kernel(%arg0: i32, %arg1: memref<128x8xf32, #tpu.memory_space<vmem>>, %arg2: memref<128x8xf32, #tpu.memory_space<vmem>>, %arg3: memref<128x64xf32, #tpu.memory_space<vmem>>, %arg4: memref<128x64xf32, #tpu.memory_space<vmem>>, %arg5: memref<128x64xf32, #tpu.memory_space<vmem>>, %arg6: memref<128x64xf32, #tpu.memory_space<vmem>>, %arg7: memref<72x256xf32, #tpu.memory_space<vmem>>, %arg8: memref<1x256xf32, #tpu.memory_space<vmem>>, %arg9: memref<128x128xf32, #tpu.memory_space<vmem>>, %arg10: memref<256x72xf32, #tpu.memory_space<vmem>>) attributes {dimension_semantics = [#tpu.dimension_semantics<parallel>], iteration_bounds = array<i64: 2>, scalar_prefetch = 0 : i64, scratch_operands = 1 : i64, tpu.core_type = #tpu.core_type<tc>, window_params = [{transform_indices = @transform_0, window_bounds = array<i64: 128, 8>}, {transform_indices = @transform_1, window_bounds = array<i64: 128, 8>}, {transform_indices = @transform_2, window_bounds = array<i64: 128, 64>}, {transform_indices = @transform_3, window_bounds = array<i64: 128, 64>}, {transform_indices = @transform_4, window_bounds = array<i64: 128, 64>}, {transform_indices = @transform_5, window_bounds = array<i64: 128, 64>}, {pipeline_mode = #tpu.pipeline_mode<synchronous>, transform_indices = @transform_6, window_bounds = array<i64: 72, 256>}, {pipeline_mode = #tpu.pipeline_mode<synchronous>, transform_indices = @transform_7, window_bounds = array<i64: 1, 256>}, {transform_indices = @transform_8, window_bounds = array<i64: 128, 128>}]} {
    %c0 = arith.constant 0 : index
    %c0_0 = arith.constant 0 : index
    %0 = vector.load %arg1[%c0, %c0_0] : memref<128x8xf32, #tpu.memory_space<vmem>>, vector<128x8xf32>
    %c0_1 = arith.constant 0 : index
    %c0_2 = arith.constant 0 : index
    %1 = vector.load %arg10[%c0_1, %c0_2] : memref<256x72xf32, #tpu.memory_space<vmem>>, vector<128x8xf32>
    tpu.vector_store %arg10[%c0_1, %c0_2], %0 {strides = array<i32>} : memref<256x72xf32, #tpu.memory_space<vmem>>, vector<128x8xf32>,
    %c0_3 = arith.constant 0 : index
    %c0_4 = arith.constant 0 : index
    %2 = vector.load %arg2[%c0_3, %c0_4] : memref<128x8xf32, #tpu.memory_space<vmem>>, vector<128x8xf32>
    %c128 = arith.constant 128 : index
    %c0_5 = arith.constant 0 : index
    %3 = vector.load %arg10[%c128, %c0_5] : memref<256x72xf32, #tpu.memory_space<vmem>>, vector<128x8xf32>
    tpu.vector_store %arg10[%c128, %c0_5], %2 {strides = array<i32>} : memref<256x72xf32, #tpu.memory_space<vmem>>, vector<128x8xf32>,
    %c0_6 = arith.constant 0 : index
    %c0_7 = arith.constant 0 : index
    %4 = vector.load %arg3[%c0_6, %c0_7] : memref<128x64xf32, #tpu.memory_space<vmem>>, vector<128x64xf32>
    %c0_8 = arith.constant 0 : index
    %c8 = arith.constant 8 : index
    %5 = vector.load %arg10[%c0_8, %c8] : memref<256x72xf32, #tpu.memory_space<vmem>>, vector<128x64xf32>
    tpu.vector_store %arg10[%c0_8, %c8], %4 {strides = array<i32>} : memref<256x72xf32, #tpu.memory_space<vmem>>, vector<128x64xf32>,
    %c0_9 = arith.constant 0 : index
    %c0_10 = arith.constant 0 : index
    %6 = vector.load %arg5[%c0_9, %c0_10] : memref<128x64xf32, #tpu.memory_space<vmem>>, vector<128x64xf32>
    %c128_11 = arith.constant 128 : index
    %c8_12 = arith.constant 8 : index
    %7 = vector.load %arg10[%c128_11, %c8_12] : memref<256x72xf32, #tpu.memory_space<vmem>>, vector<128x64xf32>
    tpu.vector_store %arg10[%c128_11, %c8_12], %6 {strides = array<i32>} : memref<256x72xf32, #tpu.memory_space<vmem>>, vector<128x64xf32>,
    %c0_13 = arith.constant 0 : index
    %c0_14 = arith.constant 0 : index
    %8 = vector.load %arg10[%c0_13, %c0_14] : memref<256x72xf32, #tpu.memory_space<vmem>>, vector<256x72xf32>
    %c0_15 = arith.constant 0 : index
    %c0_16 = arith.constant 0 : index
    %9 = vector.load %arg7[%c0_15, %c0_16] : memref<72x256xf32, #tpu.memory_space<vmem>>, vector<72x256xf32>
    %cst = arith.constant dense<0.000000e+00> : vector<256x256xf32>
    %10 = tpu.matmul %8, %9, %cst {dimension_numbers = #tpu.dot_dimension_numbers<[1], [0], [0], [1], [0, 0, 1, 1], [], []>} : vector<256x72xf32>, vector<72x256xf32>, vector<256x256xf32> -> vector<256x256xf32>
    %c0_17 = arith.constant 0 : index
    %c0_18 = arith.constant 0 : index
    %11 = vector.load %arg8[%c0_17, %c0_18] : memref<1x256xf32, #tpu.memory_space<vmem>>, vector<1x256xf32>
    %12 = vector.broadcast %11 : vector<1x256xf32> to vector<256x256xf32>
    %13 = arith.addf %10, %12 : vector<256x256xf32>
    %14 = vector.extract_strided_slice %13 {offsets = [0, 0], sizes = [256, 64], strides = [1, 1]} : vector<256x256xf32> to vector<256x64xf32>
    %15 = arith.negf %14 : vector<256x64xf32>
    %16 = math.exp %15 : vector<256x64xf32>
    %cst_19 = arith.constant 1.000000e+00 : f32
    %17 = vector.broadcast %cst_19 : f32 to vector<256x64xf32>
    %18 = arith.addf %17, %16 : vector<256x64xf32>
    %19 = arith.divf %17, %18 : vector<256x64xf32>
    %20 = vector.extract_strided_slice %13 {offsets = [0, 64], sizes = [256, 64], strides = [1, 1]} : vector<256x256xf32> to vector<256x64xf32>
    %21 = arith.negf %20 : vector<256x64xf32>
    %22 = math.exp %21 : vector<256x64xf32>
    %cst_20 = arith.constant 1.000000e+00 : f32
    %23 = vector.broadcast %cst_20 : f32 to vector<256x64xf32>
    %24 = arith.addf %23, %22 : vector<256x64xf32>
    %25 = arith.divf %23, %24 : vector<256x64xf32>
    %26 = vector.extract_strided_slice %13 {offsets = [0, 128], sizes = [256, 64], strides = [1, 1]} : vector<256x256xf32> to vector<256x64xf32>
    %27 = math.tanh %26 : vector<256x64xf32>
    %28 = vector.extract_strided_slice %13 {offsets = [0, 192], sizes = [256, 64], strides = [1, 1]} : vector<256x256xf32> to vector<256x64xf32>
    %29 = arith.negf %28 : vector<256x64xf32>
    %30 = math.exp %29 : vector<256x64xf32>
    %cst_21 = arith.constant 1.000000e+00 : f32
    %31 = vector.broadcast %cst_21 : f32 to vector<256x64xf32>
    %32 = arith.addf %31, %30 : vector<256x64xf32>
    %33 = arith.divf %31, %32 : vector<256x64xf32>
    %c0_22 = arith.constant 0 : index
    %c0_23 = arith.constant 0 : index
    %34 = vector.load %arg4[%c0_22, %c0_23] : memref<128x64xf32, #tpu.memory_space<vmem>>, vector<128x64xf32>
    %c0_24 = arith.constant 0 : index
    %c0_25 = arith.constant 0 : index
    %35 = vector.load %arg6[%c0_24, %c0_25] : memref<128x64xf32, #tpu.memory_space<vmem>>, vector<128x64xf32>
    %36 = tpu.concatenate %34, %35 in 0 : vector<128x64xf32>, vector<128x64xf32> -> vector<256x64xf32>
    %37 = arith.mulf %25, %36 : vector<256x64xf32>
    %38 = arith.mulf %19, %27 : vector<256x64xf32>
    %39 = arith.addf %37, %38 : vector<256x64xf32>
    %40 = math.tanh %39 : vector<256x64xf32>
    %41 = arith.mulf %33, %40 : vector<256x64xf32>
    %42 = vector.extract_strided_slice %41 {offsets = [0, 0], sizes = [128, 64], strides = [1, 1]} : vector<256x64xf32> to vector<128x64xf32>
    %43 = vector.extract_strided_slice %41 {offsets = [128, 0], sizes = [128, 64], strides = [1, 1]} : vector<256x64xf32> to vector<128x64xf32>
    %44 = arith.addf %42, %43 : vector<128x64xf32>
    %45 = vector.extract_strided_slice %39 {offsets = [0, 0], sizes = [128, 64], strides = [1, 1]} : vector<256x64xf32> to vector<128x64xf32>
    %46 = vector.extract_strided_slice %39 {offsets = [128, 0], sizes = [128, 64], strides = [1, 1]} : vector<256x64xf32> to vector<128x64xf32>
    %47 = arith.addf %45, %46 : vector<128x64xf32>
    %c0_26 = arith.constant 0 : index
    %c0_27 = arith.constant 0 : index
    %48 = vector.load %arg9[%c0_26, %c0_27] : memref<128x128xf32, #tpu.memory_space<vmem>>, vector<128x64xf32>
    tpu.vector_store %arg9[%c0_26, %c0_27], %44 {strides = array<i32>} : memref<128x128xf32, #tpu.memory_space<vmem>>, vector<128x64xf32>,
    %c0_28 = arith.constant 0 : index
    %c64 = arith.constant 64 : index
    %49 = vector.load %arg9[%c0_28, %c64] : memref<128x128xf32, #tpu.memory_space<vmem>>, vector<128x64xf32>
    tpu.vector_store %arg9[%c0_28, %c64], %47 {strides = array<i32>} : memref<128x128xf32, #tpu.memory_space<vmem>>, vector<128x64xf32>,
    return
  }
  func.func @transform_0(%arg0: i32) -> (i32, i32) {
    %c0_i32 = arith.constant 0 : i32
    %c0_i32_0 = arith.constant 0 : i32
    return %arg0, %c0_i32 : i32, i32
  }
  func.func @transform_1(%arg0: i32) -> (i32, i32) {
    %c0_i32 = arith.constant 0 : i32
    %c0_i32_0 = arith.constant 0 : i32
    return %arg0, %c0_i32 : i32, i32
  }
  func.func @transform_2(%arg0: i32) -> (i32, i32) {
    %c0_i32 = arith.constant 0 : i32
    %c0_i32_0 = arith.constant 0 : i32
    return %arg0, %c0_i32 : i32, i32
  }
  func.func @transform_3(%arg0: i32) -> (i32, i32) {
    %c0_i32 = arith.constant 0 : i32
    %c0_i32_0 = arith.constant 0 : i32
    return %arg0, %c0_i32 : i32, i32
  }
  func.func @transform_4(%arg0: i32) -> (i32, i32) {
    %c0_i32 = arith.constant 0 : i32
    %c0_i32_0 = arith.constant 0 : i32
    return %arg0, %c0_i32 : i32, i32
  }
  func.func @transform_5(%arg0: i32) -> (i32, i32) {
    %c0_i32 = arith.constant 0 : i32
    %c0_i32_0 = arith.constant 0 : i32
    return %arg0, %c0_i32 : i32, i32
  }
  func.func @transform_6(%arg0: i32) -> (i32, i32) {
    %c0_i32 = arith.constant 0 : i32
    %c0_i32_0 = arith.constant 0 : i32
    %c0_i32_1 = arith.constant 0 : i32
    return %c0_i32, %c0_i32_0 : i32, i32
  }
  func.func @transform_7(%arg0: i32) -> (i32, i32) {
    %c0_i32 = arith.constant 0 : i32
    %c0_i32_0 = arith.constant 0 : i32
    %c0_i32_1 = arith.constant 0 : i32
    return %c0_i32, %c0_i32_0 : i32, i32
  }
  func.func @transform_8(%arg0: i32) -> (i32, i32) {
    %c0_i32 = arith.constant 0 : i32
    %c0_i32_0 = arith.constant 0 : i32
    return %arg0, %c0_i32 : i32, i32
  }
}

</mosaic_0001>

<bundles_post_ra>
// kernel: encoder_forward.1
= control target key start
LH: loop header
LB: loop body
LE: loop exit
PB: predicated region body
PF: predicated region fallthrough
CT: control target
= control target key end

     0   :  { %s6108_s0 = inlined_call_operand.vmem [shape: f32[256,8], index: 0, kind: input, shape index: {}]   ;;  %s6109_s1 = inlined_call_operand.vmem [shape: f32[256,8], index: 1, kind: input, shape index: {}]   ;;  %s6110_s2 = inlined_call_operand.vmem [shape: f32[256,64], index: 2, kind: input, shape index: {}]   ;;  %s6111_s3 = inlined_call_operand.vmem [shape: f32[256,64], index: 3, kind: input, shape index: {}]   ;;  %s6112_s4 = inlined_call_operand.vmem [shape: f32[256,64], index: 4, kind: input, shape index: {}]   ;;  %s6113_s5 = inlined_call_operand.vmem [shape: f32[256,64], index: 5, kind: input, shape index: {}]   ;;  %s6114_s6 = inlined_call_operand.vmem [shape: f32[72,256], index: 6, kind: input, shape index: {}]   ;;  %s6115_s7 = inlined_call_operand.vmem [shape: f32[1,256], index: 7, kind: input, shape index: {}]   ;;  %s6116_s8 = inlined_call_operand.hbm [shape: f32[256,128], index: 8, kind: output, shape index: {}]  }
   0x1   :  { %6213 = sst [smem:[#allocation107_spill]] %s6109_s1 }
   0x2   :  { %13 = vsyncpa [#allocation4], 0 }
   0x3   :  { %15 = vsyncpa [#allocation4 + $0x1], 0  ;;  %s3725_s27 = smov 0   ;;  %s3727_s28 = smov 0  }
   0x4   :  { %s3729_s29 = smov 0   ;;  %s3731_s30 = smov 0  }
   0x5 LB: > { %s3746_s9 = sadd.s32 4294967295, %s3675_s30   ;;  %s3018_s10 = sadd.s32 4294967294, %s3675_s30   ;;  %s3675_s30 = sphi %s3731_s30, %s6503_s30   ;;  %s3671_s29 = sphi %s3729_s29, %s6502_s29   ;;  %s3667_s28 = sphi %s3727_s28, %s6501_s28   ;;  %s3663_s27 = sphi %s3725_s27, %s6500_s27  }
   0x6   : > { %s3750_s11 = sadd.s32 1, %s3675_s30   ;;  %s226_s12 = sadd.s32 1, %s3671_s29 }
   0x7   : > { %s223_s13 = ssub.s32 %s3675_s30, %s3750_s11  ;;  %p236_p0 = scmp.ne.s32.totalorder %s3671_s29, %s3667_s28 }
   0x8   : > { %p224_p1 = scmp.eq.s32.totalorder %s223_s13, 0  ;;  %p237_p2 = scmp.eq.s32.totalorder %s3746_s9, 1 }
   0x9   : > { %p242_p3 = scmp.ne.s32.totalorder %s3667_s28, %s3663_s27  ;;  %p243_p4 = scmp.eq.s32.totalorder %s3018_s10, 1 }
   0xa   : > { %s3761_s14 = scalar_select %p224_p1, %s3671_s29, %s226_s12  }
   0xb   : > { %p3763_p5 = por %p237_p2, %p236_p0  ;;  %p3767_p6 = por %p243_p4, %p242_p3 }
   0xc   : > { %p3021_p7 = scmp.ge.s32.totalorder %s3675_s30, 1  ;;  %p321_p8 = scmp.lt.s32.totalorder %s3675_s30, 3 }
   0xe   : > { %p322_p9 = pnand %p3021_p7, %p321_p8 }
  0x10   : > { %325 = sbr.rel (%p322_p9) target bundleno = 746 (0x2ea), region = 52 }
  0x15   : > { %s3023_s17 = sshll.u32 %s3746_s9, 4  ;;  %s6117_s22 = smov 8   ;;  %v723_v15 = vld [vmem:[%s6114_s6 + $0x80] sm:$0xff]  ;;  %v724_v16 = vld [vmem:[%s6114_s6 + $0x88] sm:$0xff]  ;;  %v721_v17 = vld [vmem:[%s6114_s6 + $0x70] sm:$0xff]  ;;  %vm433_vm0 = vcmask 64512  }
  0x16   : > { %p381_p10 = scmp.lt.s32.totalorder %s3023_s17, 31  ;;  %3169 = vmatpush.msra.mxu2 %v723_v15  ;;  %v722_v18 = vld [vmem:[%s6114_s6 + $0x78] sm:$0xff]  ;;  %3178 = vmatpush.msra.mxu3 %v724_v16  ;;  %v719_v19 = vld [vmem:[%s6114_s6 + $0x60] sm:$0xff]  ;;  %v720_v20 = vld [vmem:[%s6114_s6 + $0x68] sm:$0xff]  ;;  %s6216_s1 = sld [smem:[#allocation107_spill]]  ;;  %vm562_vm1 = vcmask 588864  }
  0x17   : > { %835 = vmatpush.msra.mxu0 %v723_v15  ;;  %948 = vmatpush.msra.mxu1 %v724_v16  ;;  %v717_v23 = vld [vmem:[%s6114_s6 + $0x50] sm:$0xff]  ;;  %v718_v24 = vld [vmem:[%s6114_s6 + $0x58] sm:$0xff]  ;;  %v715_v26 = vld [vmem:[%s6114_s6 + $0x40] sm:$0xff]  ;;  %s6217_s10 = smov 8   ;;  %vm731_vm2 = vcmask 588800   ;;  %s3168_s13 = sshll.u32 %s3746_s9, 7 }
  0x18   : > { %s6505_s17 = smov (!%p381_p10, %s3023_s17), 31  ;;  %3170 = vmatpush.msra.mxu2 %v721_v17  ;;  %3179 = vmatpush.msra.mxu3 %v722_v18  ;;  %v716_v27 = vld [vmem:[%s6114_s6 + $0x48] sm:$0xff]  ;;  %v713_v38 = vld [vmem:[%s6114_s6 + $0x30] sm:$0xff]  ;;  %v714_v39 = vld [vmem:[%s6114_s6 + $0x38] sm:$0xff] }
  0x19   : > { %s3774_s18 = sshll.u32 %s6505_s17, 3  ;;  %836 = vmatpush.msra.mxu0 %v721_v17  ;;  %949 = vmatpush.msra.mxu1 %v722_v18  ;;  %v711_v40 = vld [vmem:[%s6114_s6 + $0x20] sm:$0xff]  ;;  %v712_v41 = vld [vmem:[%s6114_s6 + $0x28] sm:$0xff]  ;;  %v709_v42 = vld [vmem:[%s6114_s6 + $0x10] sm:$0xff] }
  0x1a   : > { %s3780_s21 = scalar_lea.vmem %s6112_s4, %s3774_s18  ;;  %s3791_s25 = scalar_lea.vmem %s6110_s2, %s3774_s18  ;;  %3171 = vmatpush.msra.mxu2 %v719_v19  ;;  %3180 = vmatpush.msra.mxu3 %v720_v20  ;;  %v710_v43 = vld [vmem:[%s6114_s6 + $0x18] sm:$0xff]  ;;  %v707_v47 = vld [vmem:[%s6114_s6] sm:$0xff]  ;;  %v708_v48 = vld [vmem:[%s6114_s6 + $0x8] sm:$0xff] }
  0x1b   : > { %v579_v0 = vld [vmem:[%s3780_s21] sm:$0xff]  ;;  %v580_v1 = vld [vmem:[%s3780_s21 + $0x8] sm:$0xff]  ;;  %v581_v2 = vld [vmem:[%s3780_s21 + $0x10] sm:$0xff]  ;;  %837 = vmatpush.msra.mxu0 %v719_v19  ;;  %950 = vmatpush.msra.mxu1 %v720_v20  ;;  %s3905_s26 = scalar_lea.vmem %s6108_s0, %s3774_s18  ;;  %s3921_s23 = scalar_lea.vmem %s6111_s3, %s3774_s18 }
  0x1c   : > { %611 = vrot.lane.b32.xlu0 %v579_v0, %s6117_s22  ;;  %613 = vrot.lane.b32.xlu1 %v580_v1, %s6117_s22  ;;  %v482_v3 = vld [vmem:[%s3791_s25] sm:$0xff]  ;;  %v483_v4 = vld [vmem:[%s3791_s25 + $0x8] sm:$0xff]  ;;  %s3876_s17 = scalar_lea.vmem %s6216_s1, %s3774_s18  ;;  %s3984_s1 = scalar_lea.vmem %s6113_s5, %s3774_s18 }
  0x1d   : > { %615 = vrot.lane.b32.xlu2 %v581_v2, %s6117_s22  ;;  %v484_v5 = vld [vmem:[%s3791_s25 + $0x10] sm:$0xff]  ;;  %v582_v6 = vld [vmem:[%s3780_s21 + $0x18] sm:$0xff]  ;;  %v583_v8 = vld [vmem:[%s3780_s21 + $0x20] sm:$0xff]  ;;  %3172 = vmatpush.msra.mxu2 %v717_v23 }
  0x1e   : > { %v485_v7 = vld [vmem:[%s3791_s25 + $0x18] sm:$0xff]  ;;  %v584_v9 = vld [vmem:[%s3780_s21 + $0x28] sm:$0xff]  ;;  %v486_v10 = vld [vmem:[%s3791_s25 + $0x20] sm:$0xff]  ;;  %3181 = vmatpush.msra.mxu3 %v718_v24  ;;  %838 = vmatpush.msra.mxu0 %v717_v23 }
  0x1f   : > { %v487_v11 = vld [vmem:[%s3791_s25 + $0x28] sm:$0xff]  ;;  %v585_v12 = vld [vmem:[%s3780_s21 + $0x30] sm:$0xff]  ;;  %v586_v14 = vld [vmem:[%s3780_s21 + $0x38] sm:$0xff]  ;;  %3173 = vmatpush.msra.mxu2 %v715_v26  ;;  %951 = vmatpush.msra.mxu1 %v718_v24 }
  0x20   : > { %v488_v13 = vld [vmem:[%s3791_s25 + $0x30] sm:$0xff]  ;;  %v587_v21 = vld [vmem:[%s3780_s21 + $0x40] sm:$0xff]  ;;  %v489_v22 = vld [vmem:[%s3791_s25 + $0x38] sm:$0xff]  ;;  %3182 = vmatpush.msra.mxu3 %v716_v27  ;;  %839 = vmatpush.msra.mxu0 %v715_v26 }
  0x21   : > { %v490_v25 = vld [vmem:[%s3791_s25 + $0x40] sm:$0xff]  ;;  %v588_v28 = vld [vmem:[%s3780_s21 + $0x48] sm:$0xff]  ;;  %952 = vmatpush.msra.mxu1 %v716_v27  ;;  %v589_v30 = vld [vmem:[%s3780_s21 + $0x50] sm:$0xff]  ;;  %3174 = vmatpush.msra.mxu2 %v713_v38 }
  0x22   : > { %v491_v29 = vld [vmem:[%s3791_s25 + $0x48] sm:$0xff]  ;;  %v590_v31 = vld [vmem:[%s3780_s21 + $0x58] sm:$0xff]  ;;  %v492_v32 = vld [vmem:[%s3791_s25 + $0x50] sm:$0xff]  ;;  %3183 = vmatpush.msra.mxu3 %v714_v39  ;;  %840 = vmatpush.msra.mxu0 %v713_v38 }
  0x23   : > { %v591_v33 = vld [vmem:[%s3780_s21 + $0x60] sm:$0xff]  ;;  %v593_v35 = vld [vmem:[%s3780_s21 + $0x70] sm:$0xff]  ;;  %v495_v36 = vld [vmem:[%s3791_s25 + $0x68] sm:$0xff]  ;;  %953 = vmatpush.msra.mxu1 %v714_v39  ;;  %3175 = vmatpush.msra.mxu2 %v711_v40 }
  0x24   : > { %514 = vrot.lane.b32.xlu0 %v482_v3, %s6117_s22  ;;  %516 = vrot.lane.b32.xlu1 %v483_v4, %s6117_s22  ;;  %v494_v34 = vld [vmem:[%s3791_s25 + $0x60] sm:$0xff]  ;;  %v493_v44 = vld [vmem:[%s3791_s25 + $0x58] sm:$0xff] }
  0x25   : > { %518 = vrot.lane.b32.xlu2 %v484_v5, %s6117_s22  ;;  %v450_v37 = vld [vmem:[%s3876_s17] sm:$0xff]  ;;  %v594_v45 = vld [vmem:[%s3780_s21 + $0x78] sm:$0xff]  ;;  %3184 = vmatpush.msra.mxu3 %v712_v41  ;;  %v451_v46 = vld [vmem:[%s3876_s17 + $0x8] sm:$0xff] }
  0x26   : > { %466 = vst.msk [vmem:[#allocation2 + $0x80] sm:$0xff] %vm433_vm0, %v450_v37  ;;  %3176 = vmatpush.msra.mxu2 %v709_v42  ;;  %v417_v49 = vld [vmem:[%s3905_s26] sm:$0xff]  ;;  %841 = vmatpush.msra.mxu0 %v711_v40  ;;  %v497_v50 = vld [vmem:[%s3791_s25 + $0x78] sm:$0xff]  ;;  %v452_v51 = vld [vmem:[%s3876_s17 + $0x10] sm:$0xff] }
  0x27   : > { %467 = vst.msk [vmem:[#allocation2 + $0x88] sm:$0xff] %vm433_vm0, %v451_v46  ;;  %3185 = vmatpush.msra.mxu3 %v710_v43  ;;  %954 = vmatpush.msra.mxu1 %v712_v41  ;;  %v592_v52 = vld [vmem:[%s3780_s21 + $0x68] sm:$0xff]  ;;  %s3678_s21 = smov 64   ;;  %v419_v57 = vld [vmem:[%s3905_s26 + $0x10] sm:$0xff]  ;;  %v2306_v59 = vld [vmem:[%s3921_s23 + $0x20] sm:$0xff] }
  0x28   : > { %3177 = vmatpush.msra.mxu2 %v707_v47  ;;  %434 = vst.msk [vmem:[#allocation2] sm:$0xff] %vm433_vm0, %v417_v49  ;;  %842 = vmatpush.msra.mxu0 %v709_v42  ;;  %v418_v54 = vld [vmem:[%s3905_s26 + $0x8] sm:$0xff]  ;;  %v2304_v58 = vld [vmem:[%s3921_s23 + $0x10] sm:$0xff]  ;;  %v453_v60 = vld [vmem:[%s3876_s17 + $0x18] sm:$0xff] }
  0x29   : > { %3186 = vmatpush.msra.mxu3 %v708_v48  ;;  %955 = vmatpush.msra.mxu1 %v710_v43  ;;  %468 = vst.msk [vmem:[#allocation2 + $0x90] sm:$0xff] %vm433_vm0, %v452_v51  ;;  %v2303_v55 = vld [vmem:[%s3921_s23 + $0x8] sm:$0xff]  ;;  %v496_v61 = vld [vmem:[%s3791_s25 + $0x70] sm:$0xff]  ;;  %v454_v63 = vld [vmem:[%s3876_s17 + $0x20] sm:$0xff] }
  0x2a   : > { %843 = vmatpush.msra.mxu0 %v707_v47  ;;  %435 = vst.msk [vmem:[#allocation2 + $0x8] sm:$0xff] %vm433_vm0, %v418_v54  ;;  %v2307_v0 = vld [vmem:[%s3921_s23 + $0x28] sm:$0xff]  ;;  %v420_v1 = vld [vmem:[%s3905_s26 + $0x18] sm:$0xff]  ;;  %v2310_v5 = vld [vmem:[%s3921_s23 + $0x40] sm:$0xff] }
  0x2b   : > { %956 = vmatpush.msra.mxu1 %v708_v48  ;;  %436 = vst.msk [vmem:[#allocation2 + $0x10] sm:$0xff] %vm433_vm0, %v419_v57  ;;  %v2309_v2 = vld [vmem:[%s3921_s23 + $0x38] sm:$0xff]  ;;  %v2315_v16 = vld [vmem:[%s3921_s23 + $0x68] sm:$0xff]  ;;  %v456_v17 = vld [vmem:[%s3876_s17 + $0x30] sm:$0xff] }
  0x2c   : > { %617 = vrot.lane.b32.xlu0 %v582_v6, %s6117_s22  ;;  %520 = vrot.lane.b32.xlu1 %v485_v7, %s6117_s22  ;;  %469 = vst.msk [vmem:[#allocation2 + $0x98] sm:$0xff] %vm433_vm0, %v453_v60  ;;  %v455_v6 = vld [vmem:[%s3876_s17 + $0x28] sm:$0xff]  ;;  %v2312_v7 = vld [vmem:[%s3921_s23 + $0x50] sm:$0xff] }
  0x2d   : > { %619 = vrot.lane.b32.xlu2 %v583_v8, %s6117_s22  ;;  %470 = vst.msk [vmem:[#allocation2 + $0xa0] sm:$0xff] %vm433_vm0, %v454_v63  ;;  %v421_v8 = vld [vmem:[%s3905_s26 + $0x20] sm:$0xff]  ;;  %v2313_v15 = vld [vmem:[%s3921_s23 + $0x58] sm:$0xff]  ;;  %v423_v26 = vld [vmem:[%s3905_s26 + $0x30] sm:$0xff] }
  0x2e   : > { %437 = vst.msk [vmem:[#allocation2 + $0x18] sm:$0xff] %vm433_vm0, %v420_v1  ;;  %v457_v24 = vld [vmem:[%s3876_s17 + $0x38] sm:$0xff]  ;;  %v2318_v27 = vld [vmem:[%s3984_s1] sm:$0xff]  ;;  %v2311_v40 = vld [vmem:[%s3921_s23 + $0x48] sm:$0xff] }
  0x2f   : > { %471 = vst.msk [vmem:[#allocation2 + $0xa8] sm:$0xff] %vm433_vm0, %v455_v6  ;;  %v425_v42 = vld [vmem:[%s3905_s26 + $0x40] sm:$0xff]  ;;  %v459_v43 = vld [vmem:[%s3876_s17 + $0x48] sm:$0xff]  ;;  %v2317_v57 = vld [vmem:[%s3921_s23 + $0x78] sm:$0xff] }
  0x30   : > { %438 = vst.msk [vmem:[#allocation2 + $0x20] sm:$0xff] %vm433_vm0, %v421_v8  ;;  %v2314_v48 = vld [vmem:[%s3921_s23 + $0x60] sm:$0xff]  ;;  %v426_v51 = vld [vmem:[%s3905_s26 + $0x48] sm:$0xff]  ;;  %v427_v60 = vld [vmem:[%s3905_s26 + $0x50] sm:$0xff] }
  0x31   : > { %472 = vst.msk [vmem:[#allocation2 + $0xb0] sm:$0xff] %vm433_vm0, %v456_v17  ;;  %v2320_v1 = vld [vmem:[%s3984_s1 + $0x10] sm:$0xff]  ;;  %v463_v8 = vld [vmem:[%s3876_s17 + $0x68] sm:$0xff] }
  0x32   : > { %473 = vst.msk [vmem:[#allocation2 + $0xb8] sm:$0xff] %vm433_vm0, %v457_v24  ;;  %v464_v17 = vld [vmem:[%s3876_s17 + $0x70] sm:$0xff]  ;;  %v465_v24 = vld [vmem:[%s3876_s17 + $0x78] sm:$0xff] }
  0x33   : > { %440 = vst.msk [vmem:[#allocation2 + $0x30] sm:$0xff] %vm433_vm0, %v423_v26 }
  0x34   : > { %621 = vrot.lane.b32.xlu1 %v584_v9, %s6117_s22  ;;  %522 = vrot.lane.b32.xlu0 %v486_v10, %s6117_s22  ;;  %442 = vst.msk [vmem:[#allocation2 + $0x40] sm:$0xff] %vm433_vm0, %v425_v42 }
  0x35   : > { %524 = vrot.lane.b32.xlu2 %v487_v11, %s6117_s22  ;;  %475 = vst.msk [vmem:[#allocation2 + $0xc8] sm:$0xff] %vm433_vm0, %v459_v43 }
  0x36   : > { %443 = vst.msk [vmem:[#allocation2 + $0x48] sm:$0xff] %vm433_vm0, %v426_v51 }
  0x37   : > { %444 = vst.msk [vmem:[#allocation2 + $0x50] sm:$0xff] %vm433_vm0, %v427_v60 }
  0x38   : > { %479 = vst.msk [vmem:[#allocation2 + $0xe8] sm:$0xff] %vm433_vm0, %v463_v8 }
  0x39   : > { %480 = vst.msk [vmem:[#allocation2 + $0xf0] sm:$0xff] %vm433_vm0, %v464_v17 }
  0x3a   : > { %481 = vst.msk [vmem:[#allocation2 + $0xf8] sm:$0xff] %vm433_vm0, %v465_v24 }
  0x3c   : > { %623 = vrot.lane.b32.xlu0 %v585_v12, %s6117_s22  ;;  %526 = vrot.lane.b32.xlu1 %v488_v13, %s6117_s22  ;;  %v2302_v12 = vld [vmem:[%s3921_s23] sm:$0xff] }
  0x3d   : > { %625 = vrot.lane.b32.xlu2 %v586_v14, %s6117_s22  ;;  %v422_v14 = vld [vmem:[%s3905_s26 + $0x28] sm:$0xff] }
  0x3e   : > { %439 = vst.msk [vmem:[#allocation2 + $0x28] sm:$0xff] %vm433_vm0, %v422_v14 }
  0x44   : > { %627 = vrot.lane.b32.xlu1 %v587_v21, %s6117_s22  ;;  %528 = vrot.lane.b32.xlu0 %v489_v22, %s6117_s22  ;;  %v2305_v22 = vld [vmem:[%s3921_s23 + $0x18] sm:$0xff] }
  0x45   : > { %530 = vrot.lane.b32.xlu2 %v490_v25, %s6117_s22  ;;  %v2316_v25 = vld [vmem:[%s3921_s23 + $0x70] sm:$0xff] }
  0x4c   : > { %629 = vrot.lane.b32.xlu0 %v588_v28, %s6117_s22  ;;  %532 = vrot.lane.b32.xlu1 %v491_v29, %s6117_s22 }
  0x4d   : > { %631 = vrot.lane.b32.xlu2 %v589_v30, %s6117_s22 }
  0x54   : > { %633 = vrot.lane.b32.xlu1 %v590_v31, %s6117_s22  ;;  %534 = vrot.lane.b32.xlu0 %v492_v32, %s6117_s22  ;;  %v2308_v32 = vld [vmem:[%s3921_s23 + $0x30] sm:$0xff]  ;;  %s2892_s23 = scalar_lea.hbm %s6116_s8, %s3168_s13 }
  0x55   : > { %536 = vrot.lane.b32.xlu2 %v493_v44, %s6217_s10  ;;  %s2895_s25 = sshll.u32 %s2892_s23, 4  ;;  %s2896_s25 = int_to_ptr.hbm [resolvable:$true] %s2895_s25 }
  0x56   : > { %s3627_s24 = sshra.s32 %s2896_s25, 4  ;;  %s3628_s24 = int_to_ptr.hbm [resolvable:$true] %s3627_s24 }
  0x57   : > { %p3634_p0 = scmp.lt.s32.totalorder %s3628_s24, %s6116_s8 }
  0x5c   : > { %635 = vrot.lane.b32.xlu0 %v591_v33, %s6117_s22  ;;  %538 = vrot.lane.b32.xlu1 %v494_v34, %s6117_s22  ;;  %v2319_v33 = vld [vmem:[%s3984_s1 + $0x8] sm:$0xff]  ;;  %v458_v34 = vld [vmem:[%s3876_s17 + $0x40] sm:$0xff] }
  0x5d   : > { %637 = vrot.lane.b32.xlu2 %v592_v52, %s6217_s10  ;;  %474 = vst.msk [vmem:[#allocation2 + $0xc0] sm:$0xff] %vm433_vm0, %v458_v34  ;;  %v2321_v52 = vld [vmem:[%s3984_s1 + $0x18] sm:$0xff]  ;;  %v2328_v34 = vld [vmem:[%s3984_s1 + $0x50] sm:$0xff] }
  0x64   : > { %639 = vrot.lane.b32.xlu1 %v593_v35, %s6117_s22  ;;  %540 = vrot.lane.b32.xlu0 %v495_v36, %s6117_s22  ;;  %v424_v35 = vld [vmem:[%s3905_s26 + $0x38] sm:$0xff] }
  0x65   : > { %542 = vrot.lane.b32.xlu2 %v496_v61, %s6217_s10  ;;  %441 = vst.msk [vmem:[#allocation2 + $0x38] sm:$0xff] %vm433_vm0, %v424_v35 }
  0x6c   : > { %641 = vrot.lane.b32.xlu0 %v594_v45, %s6217_s10  ;;  %544 = vrot.lane.b32.xlu1 %v497_v50, %s6217_s10  ;;  %v460_v50 = vld [vmem:[%s3876_s17 + $0x50] sm:$0xff] }
  0x6d   : > { %2366 = vrot.lane.b32.xlu2 %v2302_v12, %s3678_s21  ;;  %476 = vst.msk [vmem:[#allocation2 + $0xd0] sm:$0xff] %vm433_vm0, %v460_v50 }
  0x74   : > { %2368 = vrot.lane.b32.xlu0 %v2303_v55, %s3678_s21  ;;  %2370 = vrot.lane.b32.xlu1 %v2304_v58, %s3678_s21  ;;  %v2322_v58 = vld [vmem:[%s3984_s1 + $0x20] sm:$0xff] }
  0x75   : > { %2372 = vrot.lane.b32.xlu2 %v2305_v22, %s3678_s21  ;;  %v2323_v22 = vld [vmem:[%s3984_s1 + $0x28] sm:$0xff] }
  0x77   : > { %v616_v53 = vpop.permute.xlu2 %615 }
  0x78   : > { %661 = vst.msk [vmem:[#allocation2 + $0x90] sm:$0xff] %vm562_vm1, %v616_v53 }
  0x7c   : > { %2374 = vrot.lane.b32.xlu0 %v2306_v59, %s3678_s21  ;;  %2376 = vrot.lane.b32.xlu1 %v2307_v0, %s3678_s21  ;;  %v461_v59 = vld [vmem:[%s3876_s17 + $0x58] sm:$0xff] }
  0x7d   : > { %2378 = vrot.lane.b32.xlu2 %v2308_v32, %s3678_s21  ;;  %477 = vst.msk [vmem:[#allocation2 + $0xd8] sm:$0xff] %vm433_vm0, %v461_v59 }
  0x7f   : > { %v519_v56 = vpop.permute.xlu2 %518  ;;  %v693_v29 = vld [vmem:[#allocation2 + $0x90] sm:$0xff] }
  0x80   : > { %565 = vst.msk [vmem:[#allocation2 + $0x10] sm:$0xff] %vm562_vm1, %v519_v56 }
  0x84   : > { %2380 = vrot.lane.b32.xlu0 %v2309_v2, %s3678_s21  ;;  %2382 = vrot.lane.b32.xlu1 %v2310_v5, %s3678_s21  ;;  %v428_v2 = vld [vmem:[%s3905_s26 + $0x58] sm:$0xff] }
  0x85   : > { %2384 = vrot.lane.b32.xlu2 %v2311_v40, %s3678_s21  ;;  %445 = vst.msk [vmem:[#allocation2 + $0x58] sm:$0xff] %vm433_vm0, %v428_v2 }
  0x87   : > { %v620_v62 = vpop.permute.xlu2 %619  ;;  %v677_v36 = vld [vmem:[#allocation2 + $0x10] sm:$0xff] }
  0x88   : > { %663 = vst.msk [vmem:[#allocation2 + $0xa0] sm:$0xff] %vm562_vm1, %v620_v62 }
  0x8c   : > { %2386 = vrot.lane.b32.xlu0 %v2312_v7, %s3678_s21  ;;  %2388 = vrot.lane.b32.xlu1 %v2313_v15, %s3678_s21  ;;  %v2325_v15 = vld [vmem:[%s3984_s1 + $0x38] sm:$0xff] }
  0x8d   : > { %2390 = vrot.lane.b32.xlu2 %v2314_v48, %s3678_s21  ;;  %v2331_v48 = vld [vmem:[%s3984_s1 + $0x68] sm:$0xff] }
  0x8e   : > { %v612_v3 = vpop.permute.xlu0 %611  ;;  %v614_v4 = vpop.permute.xlu1 %613 }
  0x8f   : > { %659 = vst.msk [vmem:[#allocation2 + $0x80] sm:$0xff] %vm562_vm1, %v612_v3  ;;  %v525_v13 = vpop.permute.xlu2 %524  ;;  %v695_v45 = vld [vmem:[#allocation2 + $0xa0] sm:$0xff] }
  0x90   : > { %660 = vst.msk [vmem:[#allocation2 + $0x88] sm:$0xff] %vm562_vm1, %v614_v4  ;;  %v462_v3 = vld [vmem:[%s3876_s17 + $0x60] sm:$0xff] }
  0x91   : > { %568 = vst.msk [vmem:[#allocation2 + $0x28] sm:$0xff] %vm562_vm1, %v525_v13 }
  0x92   : > { %478 = vst.msk [vmem:[#allocation2 + $0xe0] sm:$0xff] %vm433_vm0, %v462_v3 }
  0x94   : > { %2392 = vrot.lane.b32.xlu0 %v2315_v16, %s3678_s21  ;;  %2394 = vrot.lane.b32.xlu1 %v2316_v25, %s3678_s21 }
  0x95   : > { %2396 = vrot.lane.b32.xlu2 %v2317_v57, %s3678_s21 }
  0x96   : > { %v515_v9 = vpop.permute.xlu0 %514  ;;  %v691_v10 = vld [vmem:[#allocation2 + $0x80] sm:$0xff]  ;;  %v517_v11 = vpop.permute.xlu1 %516 }
  0x97   : > { %563 = vst.msk [vmem:[#allocation2] sm:$0xff] %vm562_vm1, %v515_v9  ;;  %3051 = vmatmul.msk.f32.vlgmr.msra.gmra.mxu2 %vm731_vm2, %v691_v10  ;;  %3083 = vmatmul.msk.f32.vlgmr.msra.gmra.mxu3 %vm731_vm2, %v691_v10  ;;  %v692_v18 = vld [vmem:[#allocation2 + $0x88] sm:$0xff]  ;;  %v626_v23 = vpop.permute.xlu2 %625  ;;  %v429_v10 = vld [vmem:[%s3905_s26 + $0x60] sm:$0xff] }
  0x98   : > { %564 = vst.msk [vmem:[#allocation2 + $0x8] sm:$0xff] %vm562_vm1, %v517_v11  ;;  %v680_v61 = vld [vmem:[#allocation2 + $0x28] sm:$0xff]  ;;  %v2324_v11 = vld [vmem:[%s3984_s1 + $0x30] sm:$0xff] }
  0x99   : > { %666 = vst.msk [vmem:[#allocation2 + $0xb8] sm:$0xff] %vm562_vm1, %v626_v23  ;;  %v431_v23 = vld [vmem:[%s3905_s26 + $0x70] sm:$0xff] }
  0x9a   : > { %446 = vst.msk [vmem:[#allocation2 + $0x60] sm:$0xff] %vm433_vm0, %v429_v10 }
  0x9b   : > { %448 = vst.msk [vmem:[#allocation2 + $0x70] sm:$0xff] %vm433_vm0, %v431_v23 }
  0x9c   : > { %2398 = vrot.lane.b32.xlu0 %v2318_v27, %s3678_s21  ;;  %2400 = vrot.lane.b32.xlu1 %v2319_v33, %s3678_s21 }
  0x9d   : > { %2402 = vrot.lane.b32.xlu2 %v2320_v1, %s3678_s21 }
  0x9e   : > { %v675_v19 = vld [vmem:[#allocation2] sm:$0xff]  ;;  %v618_v20 = vpop.permute.xlu0 %617  ;;  %v521_v21 = vpop.permute.xlu1 %520 }
  0x9f   : > { %3035 = vmatmul.msk.f32.vlgmr.msra.gmra.mxu0 %vm731_vm2, %v675_v19  ;;  %3052 = vmatmul.msk.f32.gmra.mxu2 %vm731_vm2, %v692_v18  ;;  %662 = vst.msk [vmem:[#allocation2 + $0x98] sm:$0xff] %vm562_vm1, %v618_v20  ;;  %v676_v28 = vld [vmem:[#allocation2 + $0x8] sm:$0xff]  ;;  %v531_v41 = vpop.permute.xlu2 %530 }
  0xa0   : > { %3067 = vmatmul.msk.f32.vlgmr.msra.gmra.mxu1 %vm731_vm2, %v675_v19  ;;  %3084 = vmatmul.msk.f32.gmra.mxu3 %vm731_vm2, %v692_v18  ;;  %566 = vst.msk [vmem:[#allocation2 + $0x18] sm:$0xff] %vm562_vm1, %v521_v21  ;;  %v698_v5 = vld [vmem:[#allocation2 + $0xb8] sm:$0xff]  ;;  %v430_v18 = vld [vmem:[%s3905_s26 + $0x68] sm:$0xff] }
  0xa1   : > { %571 = vst.msk [vmem:[#allocation2 + $0x40] sm:$0xff] %vm562_vm1, %v531_v41 }
  0xa2   : > { %447 = vst.msk [vmem:[#allocation2 + $0x68] sm:$0xff] %vm433_vm0, %v430_v18 }
  0xa4   : > { %2404 = vrot.lane.b32.xlu0 %v2321_v52, %s3678_s21  ;;  %2406 = vrot.lane.b32.xlu1 %v2322_v58, %s3678_s21 }
  0xa5   : > { %2408 = vrot.lane.b32.xlu2 %v2323_v22, %s3678_s21 }
  0xa6   : > { %v622_v30 = vpop.permute.xlu1 %621  ;;  %v523_v31 = vpop.permute.xlu0 %522  ;;  %v694_v37 = vld [vmem:[#allocation2 + $0x98] sm:$0xff] }
  0xa7   : > { %3036 = vmatmul.msk.f32.gmra.mxu0 %vm731_vm2, %v676_v28  ;;  %3053 = vmatmul.msk.f32.gmra.mxu2 %vm731_vm2, %v693_v29  ;;  %664 = vst.msk [vmem:[#allocation2 + $0xa8] sm:$0xff] %vm562_vm1, %v622_v30  ;;  %v678_v44 = vld [vmem:[#allocation2 + $0x18] sm:$0xff]  ;;  %v632_v49 = vpop.permute.xlu2 %631  ;;  %v2327_v30 = vld [vmem:[%s3984_s1 + $0x48] sm:$0xff] }
  0xa8   : > { %3068 = vmatmul.msk.f32.gmra.mxu1 %vm731_vm2, %v676_v28  ;;  %3085 = vmatmul.msk.f32.gmra.mxu3 %vm731_vm2, %v693_v29  ;;  %567 = vst.msk [vmem:[#allocation2 + $0x20] sm:$0xff] %vm562_vm1, %v523_v31  ;;  %v683_v20 = vld [vmem:[#allocation2 + $0x40] sm:$0xff]  ;;  %v432_v29 = vld [vmem:[%s3905_s26 + $0x78] sm:$0xff]  ;;  %s377_s26 = sand.u32 1, %s3667_s28  }
  0xa9   : > { %669 = vst.msk [vmem:[#allocation2 + $0xd0] sm:$0xff] %vm562_vm1, %v632_v49  ;;  %s3022_s22 = sshll.u32 %s377_s26, 7  ;;  %s2881_s9 = scalar_lea.sflag [#allocation4], %s377_s26 }
  0xaa   : > { %449 = vst.msk [vmem:[#allocation2 + $0x78] sm:$0xff] %vm433_vm0, %v432_v29  ;;  %s5923_s12 = scalar_lea.vmem [#allocation3], %s3022_s22  ;;  %s3633_s22 = scalar_lea.hbm %s6116_s8, 256 }
  0xac   : > { %2410 = vrot.lane.b32.xlu0 %v2324_v11, %s3678_s21  ;;  %2412 = vrot.lane.b32.xlu1 %v2325_v15, %s3678_s21 }
  0xae   : > { %v624_v38 = vpop.permute.xlu0 %623  ;;  %v527_v39 = vpop.permute.xlu1 %526  ;;  %v696_v54 = vld [vmem:[#allocation2 + $0xa8] sm:$0xff] }
  0xaf   : > { %3037 = vmatmul.msk.f32.gmra.mxu0 %vm731_vm2, %v677_v36  ;;  %3054 = vmatmul.msk.f32.gmra.mxu2 %vm731_vm2, %v694_v37  ;;  %665 = vst.msk [vmem:[#allocation2 + $0xb0] sm:$0xff] %vm562_vm1, %v624_v38  ;;  %v679_v53 = vld [vmem:[#allocation2 + $0x20] sm:$0xff]  ;;  %v537_v6 = vpop.permute.xlu2 %536 }
  0xb0   : > { %3069 = vmatmul.msk.f32.gmra.mxu1 %vm731_vm2, %v677_v36  ;;  %3086 = vmatmul.msk.f32.gmra.mxu3 %vm731_vm2, %v694_v37  ;;  %569 = vst.msk [vmem:[#allocation2 + $0x30] sm:$0xff] %vm562_vm1, %v527_v39  ;;  %v701_v27 = vld [vmem:[#allocation2 + $0xd0] sm:$0xff]  ;;  %v2326_v39 = vld [vmem:[%s3984_s1 + $0x40] sm:$0xff] }
  0xb1   : > { %574 = vst.msk [vmem:[#allocation2 + $0x58] sm:$0xff] %vm562_vm1, %v537_v6  ;;  %2414 = vrot.lane.b32.xlu2 %v2326_v39, %s3678_s21 }
  0xb4   : > { %2416 = vrot.lane.b32.xlu0 %v2327_v30, %s3678_s21  ;;  %2418 = vrot.lane.b32.xlu1 %v2328_v34, %s3678_s21 }
  0xb6   : > { %v628_v46 = vpop.permute.xlu1 %627  ;;  %v529_v47 = vpop.permute.xlu0 %528  ;;  %v697_v62 = vld [vmem:[#allocation2 + $0xb0] sm:$0xff] }
  0xb7   : > { %3038 = vmatmul.msk.f32.gmra.mxu0 %vm731_vm2, %v678_v44  ;;  %3055 = vmatmul.msk.f32.gmra.mxu2 %vm731_vm2, %v695_v45  ;;  %667 = vst.msk [vmem:[#allocation2 + $0xc0] sm:$0xff] %vm562_vm1, %v628_v46  ;;  %v681_v4 = vld [vmem:[#allocation2 + $0x30] sm:$0xff]  ;;  %v638_v14 = vpop.permute.xlu2 %637 }
  0xb8   : > { %3070 = vmatmul.msk.f32.gmra.mxu1 %vm731_vm2, %v678_v44  ;;  %3087 = vmatmul.msk.f32.gmra.mxu3 %vm731_vm2, %v695_v45  ;;  %570 = vst.msk [vmem:[#allocation2 + $0x38] sm:$0xff] %vm562_vm1, %v529_v47  ;;  %v686_v35 = vld [vmem:[#allocation2 + $0x58] sm:$0xff]  ;;  %v2330_v44 = vld [vmem:[%s3984_s1 + $0x60] sm:$0xff] }
  0xb9   : > { %672 = vst.msk [vmem:[#allocation2 + $0xe8] sm:$0xff] %vm562_vm1, %v638_v14  ;;  %v2329_v45 = vld [vmem:[%s3984_s1 + $0x58] sm:$0xff]  ;;  %v725_v47 = vld [vmem:[%s6115_s7] sm:$0x3] }
  0xba   : > { %2420 = vrot.lane.b32.xlu2 %v2329_v45, %s3678_s21  ;;  %v4152_v49 = vperm.slane %v725_v47, 0  ;;  %v4154_v50 = vperm.slane %v725_v47, 1 }
  0xbc   : > { %2422 = vrot.lane.b32.xlu0 %v2330_v44, %s3678_s21  ;;  %2424 = vrot.lane.b32.xlu1 %v2331_v48, %s3678_s21 }
  0xbe   : > { %v630_v55 = vpop.permute.xlu0 %629  ;;  %v533_v56 = vpop.permute.xlu1 %532  ;;  %v699_v13 = vld [vmem:[#allocation2 + $0xc0] sm:$0xff] }
  0xbf   : > { %3039 = vmatmul.msk.f32.gmra.mxu0 %vm731_vm2, %v679_v53  ;;  %3056 = vmatmul.msk.f32.gmra.mxu2 %vm731_vm2, %v696_v54  ;;  %668 = vst.msk [vmem:[#allocation2 + $0xc8] sm:$0xff] %vm562_vm1, %v630_v55  ;;  %v682_v12 = vld [vmem:[#allocation2 + $0x38] sm:$0xff]  ;;  %v543_v25 = vpop.permute.xlu2 %542 }
  0xc0   : > { %3071 = vmatmul.msk.f32.gmra.mxu1 %vm731_vm2, %v679_v53  ;;  %3088 = vmatmul.msk.f32.gmra.mxu3 %vm731_vm2, %v696_v54  ;;  %572 = vst.msk [vmem:[#allocation2 + $0x48] sm:$0xff] %vm562_vm1, %v533_v56  ;;  %v704_v38 = vld [vmem:[#allocation2 + $0xe8] sm:$0xff]  ;;  %v2332_v53 = vld [vmem:[%s3984_s1 + $0x70] sm:$0xff] }
  0xc1   : > { %577 = vst.msk [vmem:[#allocation2 + $0x70] sm:$0xff] %vm562_vm1, %v543_v25 }
  0xc2   : > { %2426 = vrot.lane.b32.xlu2 %v2332_v53, %s3678_s21 }
  0xc6   : > { %v634_v63 = vpop.permute.xlu1 %633  ;;  %v535_v0 = vpop.permute.xlu0 %534  ;;  %v700_v21 = vld [vmem:[#allocation2 + $0xc8] sm:$0xff] }
  0xc7   : > { %3040 = vmatmul.msk.f32.gmra.mxu0 %vm731_vm2, %v680_v61  ;;  %3057 = vmatmul.msk.f32.gmra.mxu2 %vm731_vm2, %v697_v62  ;;  %670 = vst.msk [vmem:[#allocation2 + $0xd8] sm:$0xff] %vm562_vm1, %v634_v63  ;;  %v684_v26 = vld [vmem:[#allocation2 + $0x48] sm:$0xff] }
  0xc8   : > { %3072 = vmatmul.msk.f32.gmra.mxu1 %vm731_vm2, %v680_v61  ;;  %3089 = vmatmul.msk.f32.gmra.mxu3 %vm731_vm2, %v697_v62  ;;  %573 = vst.msk [vmem:[#allocation2 + $0x50] sm:$0xff] %vm562_vm1, %v535_v0  ;;  %v689_v42 = vld [vmem:[#allocation2 + $0x70] sm:$0xff] }
  0xce   : > { %v636_v7 = vpop.permute.xlu0 %635  ;;  %v539_v9 = vpop.permute.xlu1 %538  ;;  %v702_v33 = vld [vmem:[#allocation2 + $0xd8] sm:$0xff] }
  0xcf   : > { %3041 = vmatmul.msk.f32.gmra.mxu0 %vm731_vm2, %v681_v4  ;;  %3058 = vmatmul.msk.f32.gmra.mxu2 %vm731_vm2, %v698_v5  ;;  %671 = vst.msk [vmem:[#allocation2 + $0xe0] sm:$0xff] %vm562_vm1, %v636_v7  ;;  %v685_v32 = vld [vmem:[#allocation2 + $0x50] sm:$0xff] }
  0xd0   : > { %3073 = vmatmul.msk.f32.gmra.mxu1 %vm731_vm2, %v681_v4  ;;  %3090 = vmatmul.msk.f32.gmra.mxu3 %vm731_vm2, %v698_v5  ;;  %575 = vst.msk [vmem:[#allocation2 + $0x60] sm:$0xff] %vm562_vm1, %v539_v9  ;;  %v2333_v5 = vld [vmem:[%s3984_s1 + $0x78] sm:$0xff]  ;;  %s3629_s1 = scalar_lea.hbm %s3628_s24, 128 }
  0xd1   : > { %2428 = vrot.lane.b32.xlu0 %v2333_v5, %s3678_s21  ;;  %p3630_p11 = scmp.ne.s32.totalorder %s3628_s24, %s3629_s1  ;;  %p3635_p1 = scmp.lt.s32.totalorder %s3633_s22, %s3629_s1 }
  0xd3   : > { %p3631_p12 = pnand %p3630_p11, %p3763_p5  ;;  %p3636_p2 = por %p3635_p1, %p3634_p0 }
  0xd5   : > { %p3632_p13 = pneg %p3631_p12 }
  0xd6   : > { %v640_v16 = vpop.permute.xlu1 %639  ;;  %v541_v19 = vpop.permute.xlu0 %540  ;;  %v703_v36 = vld [vmem:[#allocation2 + $0xe0] sm:$0xff] }
  0xd7   : > { %3042 = vmatmul.msk.f32.gmra.mxu0 %vm731_vm2, %v682_v12  ;;  %3059 = vmatmul.msk.f32.gmra.mxu2 %vm731_vm2, %v699_v13  ;;  %673 = vst.msk [vmem:[#allocation2 + $0xf0] sm:$0xff] %vm562_vm1, %v640_v16  ;;  %v687_v37 = vld [vmem:[#allocation2 + $0x60] sm:$0xff]  ;;  %p3637_p3 = pnand %p3636_p2, %p3632_p13 }
  0xd8   : > { %3074 = vmatmul.msk.f32.gmra.mxu1 %vm731_vm2, %v682_v12  ;;  %3091 = vmatmul.msk.f32.gmra.mxu3 %vm731_vm2, %v699_v13  ;;  %576 = vst.msk [vmem:[#allocation2 + $0x68] sm:$0xff] %vm562_vm1, %v541_v19 }
  0xde   : > { %v642_v28 = vpop.permute.xlu0 %641  ;;  %v545_v31 = vpop.permute.xlu1 %544  ;;  %v705_v41 = vld [vmem:[#allocation2 + $0xf0] sm:$0xff] }
  0xdf   : > { %3043 = vmatmul.msk.f32.gmra.mxu0 %vm731_vm2, %v683_v20  ;;  %3060 = vmatmul.msk.f32.gmra.mxu2 %vm731_vm2, %v700_v21  ;;  %674 = vst.msk [vmem:[#allocation2 + $0xf8] sm:$0xff] %vm562_vm1, %v642_v28  ;;  %v688_v40 = vld [vmem:[#allocation2 + $0x68] sm:$0xff] }
  0xe0   : > { %3075 = vmatmul.msk.f32.gmra.mxu1 %vm731_vm2, %v683_v20  ;;  %3092 = vmatmul.msk.f32.gmra.mxu3 %vm731_vm2, %v700_v21  ;;  %578 = vst.msk [vmem:[#allocation2 + $0x78] sm:$0xff] %vm562_vm1, %v545_v31 }
  0xe6   : > { %v706_v43 = vld [vmem:[#allocation2 + $0xf8] sm:$0xff] }
  0xe7   : > { %3044 = vmatmul.msk.f32.gmra.mxu0 %vm731_vm2, %v684_v26  ;;  %3061 = vmatmul.msk.f32.gmra.mxu2 %vm731_vm2, %v701_v27  ;;  %v690_v46 = vld [vmem:[#allocation2 + $0x78] sm:$0xff] }
  0xe8   : > { %3076 = vmatmul.msk.f32.gmra.mxu1 %vm731_vm2, %v684_v26  ;;  %3093 = vmatmul.msk.f32.gmra.mxu3 %vm731_vm2, %v701_v27 }
  0xef   : > { %3045 = vmatmul.msk.f32.gmra.mxu0 %vm731_vm2, %v685_v32  ;;  %3062 = vmatmul.msk.f32.gmra.mxu2 %vm731_vm2, %v702_v33 }
  0xf0   : > { %3077 = vmatmul.msk.f32.gmra.mxu1 %vm731_vm2, %v685_v32  ;;  %3094 = vmatmul.msk.f32.gmra.mxu3 %vm731_vm2, %v702_v33 }
  0xf7   : > { %3046 = vmatmul.msk.f32.gmra.mxu0 %vm731_vm2, %v686_v35  ;;  %3063 = vmatmul.msk.f32.gmra.mxu2 %vm731_vm2, %v703_v36 }
  0xf8   : > { %3078 = vmatmul.msk.f32.gmra.mxu1 %vm731_vm2, %v686_v35  ;;  %3095 = vmatmul.msk.f32.gmra.mxu3 %vm731_vm2, %v703_v36 }
  0xff   : > { %3047 = vmatmul.msk.f32.gmra.mxu0 %vm731_vm2, %v687_v37  ;;  %3064 = vmatmul.msk.f32.gmra.mxu2 %vm731_vm2, %v704_v38 }
 0x100   : > { %3079 = vmatmul.msk.f32.gmra.mxu1 %vm731_vm2, %v687_v37  ;;  %3096 = vmatmul.msk.f32.gmra.mxu3 %vm731_vm2, %v704_v38 }
 0x107   : > { %3048 = vmatmul.msk.f32.gmra.mxu0 %vm731_vm2, %v688_v40  ;;  %3065 = vmatmul.msk.f32.gmra.mxu2 %vm731_vm2, %v705_v41 }
 0x108   : > { %3080 = vmatmul.msk.f32.gmra.mxu1 %vm731_vm2, %v688_v40  ;;  %3097 = vmatmul.msk.f32.gmra.mxu3 %vm731_vm2, %v705_v41 }
 0x10f   : > { %3049 = vmatmul.msk.f32.gmra.mxu0 %vm731_vm2, %v689_v42  ;;  %3066 = vmatmul.msk.f32.gmra.mxu2 %vm731_vm2, %v706_v43 }
 0x110   : > { %3081 = vmatmul.msk.f32.gmra.mxu1 %vm731_vm2, %v689_v42  ;;  %3098 = vmatmul.msk.f32.gmra.mxu3 %vm731_vm2, %v706_v43 }
 0x117   : > { %3050 = vmatmul.msk.f32.gmra.mxu0 %vm731_vm2, %v690_v46 }
 0x118   : > { %3082 = vmatmul.msk.f32.gmra.mxu1 %vm731_vm2, %v690_v46 }
 0x11a   : > { %v893_v51 = vpop.f32.mrf.mxu2  ;;  %v1006_v52 = vpop.f32.mrf.mxu3 }
 0x11b   : > { %v894_v54 = vadd.f32 %v893_v51, %v4152_v49  ;;  %v1007_v55 = vadd.f32 %v1006_v52, %v4154_v50 }
 0x11c   : > { %v845_v56 = vpop.f32.mrf.mxu0 }
 0x11d   : > { %v3115_v57 = vmul.f32 -1.442695, %v894_v54  ;;  %v3147_v58 = vmul.f32 -1.442695, %v1007_v55  ;;  %v846_v59 = vadd.f32 %v845_v56, %v4152_v49  ;;  %v958_v60 = vpop.f32.mrf.mxu1 }
 0x11e   : > { %v959_v61 = vadd.f32 %v958_v60, %v4154_v50 }
 0x11f   : > { %3229 = vpow2.f32 %v3115_v57  ;;  %v3099_v62 = vmul.f32 -1.442695, %v846_v59 }
 0x120   : > { %3231 = vpow2.f32 %v3147_v58  ;;  %v3131_v63 = vmul.f32 -1.442695, %v959_v61 }
 0x121   : > { %3233 = vpow2.f32 %v3099_v62 }
 0x122   : > { %v896_v0 = vpop.f32.mrf.mxu2  ;;  %3235 = vpow2.f32 %v3131_v63 }
 0x123   : > { %v897_v1 = vadd.f32 %v896_v0, %v4152_v49  ;;  %v1009_v2 = vpop.f32.mrf.mxu3  ;;  %3237 = vtanh.f32 %v1007_v55 }
 0x124   : > { %v1010_v3 = vadd.f32 %v1009_v2, %v4154_v50  ;;  %v848_v4 = vpop.f32.mrf.mxu0  ;;  %3239 = vtanh.f32 %v959_v61 }
 0x125   : > { %v3230_v6 = vpop.eup %3229  ;;  %v3116_v7 = vmul.f32 -1.442695, %v897_v1  ;;  %v849_v8 = vadd.f32 %v848_v4, %v4152_v49  ;;  %v961_v9 = vpop.f32.mrf.mxu1 }
 0x126   : > { %v3232_v10 = vpop.eup %3231  ;;  %v4168_v11 = vadd.f32 1.0, %v3230_v6  ;;  %3241 = vtanh.f32 %v1010_v3  ;;  %v3148_v14 = vmul.f32 -1.442695, %v1010_v3  ;;  %v962_v15 = vadd.f32 %v961_v9, %v4154_v50 }
 0x127   : > { %v3234_v12 = vpop.eup %3233  ;;  %v4170_v13 = vadd.f32 1.0, %v3232_v10  ;;  %3243 = vpow2.f32 %v3116_v7  ;;  %v3100_v18 = vmul.f32 -1.442695, %v849_v8 }
 0x128   : > { %3245 = vrcp.f32 %v4168_v11  ;;  %v4174_v16 = vadd.f32 1.0, %v3234_v12  ;;  %v3236_v17 = vpop.eup %3235  ;;  %v3132_v23 = vmul.f32 -1.442695, %v962_v15  ;;  %v1431_v35 = vand.u32 2147483647, %v4168_v11 }
 0x129   : > { %6218 = vst [vmem:[#allocation6_spill] sm:$0xff] %v4170_v13  ;;  %3247 = vrcp.f32 %v4170_v13  ;;  %v4177_v19 = vpop.eup %3237  ;;  %v4180_v20 = vadd.f32 1.0, %v3236_v17  ;;  %v1433_v36 = vand.u32 2147483648, %v4168_v11  ;;  %vm1427_vm3 = vweird.f32 %v4168_v11 }
 0x12a   : > { %3249 = vrcp.f32 %v4174_v16  ;;  %v899_v21 = vpop.f32.mrf.mxu2  ;;  %v4182_v22 = vpop.eup %3239  ;;  %v1191_v42 = vand.u32 2147483647, %v4174_v16  ;;  %vm1187_vm4 = vweird.f32 %v4174_v16  ;;  %vm4210_vm5 = vcmp.eq.f32.partialorder %v1431_v35, 8.507059e+37 }
 0x12b   : > { %6219 = vst [vmem:[#allocation7_spill] sm:$0xff] %v4180_v20  ;;  %3251 = vpow2.f32 %v3148_v14  ;;  %v900_v24 = vadd.f32 %v899_v21, %v4152_v49  ;;  %v1012_v25 = vpop.f32.mrf.mxu3  ;;  %v1434_v53 = vor.u32 1.1754944e-38, %v1433_v36  ;;  %v1193_v62 = vand.u32 2147483648, %v4174_v16  ;;  %v4235_v14 = vpop.permute.xlu2 %2366 }
 0x12c   : > { %v4185_v26 = vpop.eup %3241  ;;  %3253 = vrcp.f32 %v4180_v20  ;;  %v1013_v27 = vadd.f32 %v1012_v25, %v4154_v50  ;;  %v851_v28 = vpop.f32.mrf.mxu0  ;;  %6225 = vst [vmem:[#allocation11_spill] sm:$0xff] %v4235_v14  ;;  %vm4244_vm9 = vcmp.eq.f32.partialorder %v1191_v42, 8.507059e+37 }
 0x12d   : > { %v3244_v29 = vpop.eup %3243  ;;  %3255 = vpow2.f32 %v3100_v18  ;;  %v3117_v30 = vmul.f32 -1.442695, %v900_v24  ;;  %v852_v31 = vadd.f32 %v851_v28, %v4152_v49  ;;  %v964_v32 = vpop.f32.mrf.mxu1  ;;  %v1194_v24 = vor.u32 1.1754944e-38, %v1193_v62 }
 0x12e   : > { %v3246_v33 = vpop.eup %3245  ;;  %v4190_v34 = vadd.f32 1.0, %v3244_v29  ;;  %3257 = vtanh.f32 %v962_v15  ;;  %v3149_v38 = vmul.f32 -1.442695, %v1013_v27  ;;  %v965_v41 = vadd.f32 %v964_v32, %v4154_v50 }
 0x12f   : > { %v4194_v37 = vpop.eup %3247  ;;  %3259 = vpow2.f32 %v3132_v23  ;;  %v1423_v39 = vmul.f32 %v3246_v33, %v4168_v11  ;;  %v3101_v45 = vmul.f32 -1.442695, %v852_v31  ;;  %vm1428_vm6 = vweird.f32 %v3246_v33 }
 0x130   : > { %6220 = vst [vmem:[#allocation8_spill] sm:$0xff] %v4194_v37  ;;  %v4197_v40 = vpop.eup %3249  ;;  %3261 = vrcp.f32 %v4190_v34  ;;  %v3133_v0 = vmul.f32 -1.442695, %v965_v41  ;;  %vm1429_vm8 = vmor %vm1427_vm3, %vm1428_vm6  ;;  %v1448_v62 = vand.u32 2147483648, %v4190_v34  ;;  %vm1442_vm12 = vweird.f32 %v4190_v34 }
 0x131   : > { %v3252_v43 = vpop.eup %3251  ;;  %v1183_v44 = vmul.f32 %v4197_v40, %v4174_v16  ;;  %3263 = vpow2.f32 %v3117_v30  ;;  %v1424_v46 = vsub.f32 1.0, %v1423_v39  ;;  %vm1188_vm7 = vweird.f32 %v4197_v40 }
 0x132   : > { %v4206_v47 = vpop.eup %3253  ;;  %v4208_v48 = vadd.f32 1.0, %v3252_v43  ;;  %3265 = vtanh.f32 %v1013_v27  ;;  %v902_v51 = vpop.f32.mrf.mxu2  ;;  %vm1189_vm10 = vmor %vm1187_vm4, %vm1188_vm7 }
 0x133   : > { %v3256_v54 = vpop.eup %3255  ;;  %3267 = vpow2.f32 %v3149_v38  ;;  %v903_v55 = vadd.f32 %v902_v51, %v4152_v49  ;;  %v1015_v56 = vpop.f32.mrf.mxu3  ;;  %v1425_v57 = vmul.f32 %v3246_v33, %v1424_v46  ;;  %v1184_v61 = vsub.f32 1.0, %v1183_v44 }
 0x134   : > { %6221 = vst [vmem:[#allocation9_spill] sm:$0xff] %v4208_v48  ;;  %v4215_v58 = vpop.eup %3257  ;;  %3269 = vrcp.f32 %v4208_v48  ;;  %v4218_v59 = vadd.f32 1.0, %v3256_v54  ;;  %v854_v60 = vpop.f32.mrf.mxu0  ;;  %v1016_v6 = vadd.f32 %v1015_v56, %v4154_v50  ;;  %v1446_v46 = vand.u32 2147483647, %v4190_v34 }
 0x135   : > { %v3260_v63 = vpop.eup %3259  ;;  %3271 = vpow2.f32 %v3101_v45  ;;  %v967_v1 = vpop.f32.mrf.mxu1  ;;  %v1426_v2 = vadd.f32 %v3246_v33, %v1425_v57  ;;  %v3118_v5 = vmul.f32 -1.442695, %v903_v55  ;;  %v855_v8 = vadd.f32 %v854_v60, %v4152_v49 }
 0x136   : > { %v4222_v3 = vpop.eup %3261  ;;  %3273 = vrcp.f32 %v4218_v59  ;;  %v4225_v4 = vadd.f32 1.0, %v3260_v63  ;;  %v1185_v10 = vmul.f32 %v4197_v40, %v1184_v61  ;;  %v3150_v28 = vmul.f32 -1.442695, %v1016_v6 }
 0x137   : > { %v3264_v7 = vpop.eup %3263  ;;  %3275 = vtanh.f32 %v965_v41  ;;  %v1430_v9 = vsel %vm1429_vm8, %v3246_v33, %v1426_v2  ;;  %v968_v29 = vadd.f32 %v967_v1, %v4154_v50  ;;  %v1438_v35 = vmul.f32 %v4222_v3, %v4190_v34  ;;  %v4297_v1 = vpop.permute.xlu2 %2372 }
 0x138   : > { %6224 = vst [vmem:[#allocation10_spill] sm:$0xff] %v4225_v4  ;;  %v4233_v12 = vpop.eup %3265  ;;  %3277 = vrcp.f32 %v4225_v4  ;;  %v4238_v15 = vadd.f32 1.0, %v3264_v7  ;;  %v4242_v17 = vsel %vm4210_vm5, %v1434_v53, %v1430_v9  ;;  %v1186_v23 = vadd.f32 %v4197_v40, %v1185_v10 }
 0x139   : > { %v3268_v18 = vpop.eup %3267  ;;  %3279 = vpow2.f32 %v3133_v0  ;;  %v2510_v21 = vmul.f32 %v4177_v19, %v4242_v17  ;;  %v3102_v19 = vmul.f32 -1.442695, %v855_v8  ;;  %v3134_v44 = vmul.f32 -1.442695, %v968_v29  ;;  %6234 = vst [vmem:[#allocation18_spill] sm:$0xff] %v4297_v1 }
 0x13a   : > { %v4251_v25 = vpop.eup %3269  ;;  %3281 = vrcp.f32 %v4238_v15  ;;  %v4254_v27 = vadd.f32 1.0, %v3268_v18  ;;  %v905_v30 = vpop.f32.mrf.mxu2  ;;  %v1190_v33 = vsel %vm1189_vm10, %v4197_v40, %v1186_v23  ;;  %v1439_v54 = vsub.f32 1.0, %v1438_v35 }
 0x13b   : > { %6228 = vst [vmem:[#allocation12_spill] sm:$0xff] %v4251_v25  ;;  %v3272_v31 = vpop.eup %3271  ;;  %3283 = vpow2.f32 %v3118_v5  ;;  %v1018_v32 = vpop.f32.mrf.mxu3  ;;  %2590 = vrot.lane.b32.xlu2 %v2510_v21, %s3678_s21  ;;  %v906_v16 = vadd.f32 %v905_v30, %v4152_v49  ;;  %v4273_v41 = vsel %vm4244_vm9, %v1194_v24, %v1190_v33  ;;  %vm1443_vm11 = vweird.f32 %v4222_v3 }
 0x13c   : > { %6229 = vst [vmem:[#allocation13_spill] sm:$0xff] %v4254_v27  ;;  %v4265_v36 = vpop.eup %3273  ;;  %3285 = vrcp.f32 %v4254_v27  ;;  %v4268_v38 = vadd.f32 1.0, %v3272_v31  ;;  %v857_v39 = vpop.f32.mrf.mxu0  ;;  %v2494_v45 = vmul.f32 %v4182_v22, %v4273_v41  ;;  %v1019_v52 = vadd.f32 %v1018_v32, %v4154_v50  ;;  %vm1444_vm13 = vmor %vm1442_vm12, %vm1443_vm11 }
 0x13d   : > { %6230 = vst [vmem:[#allocation14_spill] sm:$0xff] %v4273_v41  ;;  %v4275_v42 = vpop.eup %3275  ;;  %v1198_v40 = vmul.f32 %v4265_v36, %v4218_v59  ;;  %3287 = vtanh.f32 %v1016_v6  ;;  %v970_v53 = vpop.f32.mrf.mxu1  ;;  %v3119_v57 = vmul.f32 -1.442695, %v906_v16  ;;  %v858_v60 = vadd.f32 %v857_v39, %v4152_v49 }
 0x13e   : > { %v4279_v43 = vpop.eup %3277  ;;  %3289 = vrcp.f32 %v4268_v38  ;;  %2558 = vrot.lane.b32.xlu1 %v2494_v45, %s3678_s21  ;;  %v1440_v61 = vmul.f32 %v4222_v3, %v1439_v54  ;;  %v3151_v6 = vmul.f32 -1.442695, %v1019_v52  ;;  %v971_v7 = vadd.f32 %v970_v53, %v4154_v50  ;;  %v4322_v33 = vpop.permute.xlu0 %2368 }
 0x13f   : > { %6231 = vst [vmem:[#allocation15_spill] sm:$0xff] %v4279_v43  ;;  %v3280_v51 = vpop.eup %3279  ;;  %3291 = vpow2.f32 %v3150_v28  ;;  %v1199_v63 = vsub.f32 1.0, %v1198_v40  ;;  %v3103_v11 = vmul.f32 -1.442695, %v858_v60  ;;  %vm1447_vm14 = vcmp.eq.f32.partialorder %v1446_v46, 8.507059e+37 }
 0x140   : > { %v4287_v55 = vpop.eup %3281  ;;  %v4289_v56 = vadd.f32 1.0, %v3280_v51  ;;  %3293 = vpow2.f32 %v3102_v19  ;;  %v1441_v8 = vadd.f32 %v4222_v3, %v1440_v61  ;;  %v1449_v18 = vor.u32 1.1754944e-38, %v1448_v62  ;;  %6236 = vst [vmem:[#allocation20_spill] sm:$0xff] %v4322_v33 }
 0x141   : > { %v3284_v22 = vpop.eup %3283  ;;  %3295 = vtanh.f32 %v968_v29  ;;  %v1200_v24 = vmul.f32 %v4265_v36, %v1199_v63  ;;  %vm1203_vm15 = vweird.f32 %v4265_v36  ;;  %v3135_v40 = vmul.f32 -1.442695, %v971_v7 }
 0x142   : > { %6232 = vst [vmem:[#allocation16_spill] sm:$0xff] %v4289_v56  ;;  %v4295_v0 = vpop.eup %3285  ;;  %3297 = vrcp.f32 %v4289_v56  ;;  %v4300_v2 = vadd.f32 1.0, %v3284_v22  ;;  %v908_v9 = vpop.f32.mrf.mxu2  ;;  %v1445_v23 = vsel %vm1444_vm13, %v4222_v3, %v1441_v8  ;;  %vm1202_vm0 = vweird.f32 %v4218_v59 }
 0x143   : > { %6233 = vst [vmem:[#allocation17_spill] sm:$0xff] %v4295_v0  ;;  %v4303_v5 = vpop.eup %3287  ;;  %3299 = vpow2.f32 %v3134_v44  ;;  %v1021_v34 = vpop.f32.mrf.mxu3  ;;  %v4317_v30 = vsel %vm1447_vm14, %v1449_v18, %v1445_v23  ;;  %v909_v31 = vadd.f32 %v908_v9, %v4152_v49  ;;  %v1201_v51 = vadd.f32 %v4265_v36, %v1200_v24  ;;  %vm4344_vm1 = vmor %vm1202_vm0, %vm1203_vm15 }
 0x144   : > { %v4307_v10 = vpop.eup %3289  ;;  %3301 = vrcp.f32 %v4300_v2  ;;  %v860_v19 = vpop.f32.mrf.mxu0  ;;  %v2511_v3 = vmul.f32 %v4185_v26, %v4317_v30  ;;  %v1022_v16 = vadd.f32 %v1021_v34, %v4154_v50  ;;  %v1206_v26 = vand.u32 2147483647, %v4218_v59 }
 0x145   : > { %v3292_v21 = vpop.eup %3291  ;;  %3303 = vpow2.f32 %v3119_v57  ;;  %v861_v45 = vadd.f32 %v860_v19, %v4152_v49  ;;  %v973_v46 = vpop.f32.mrf.mxu1  ;;  %v3120_v54 = vmul.f32 -1.442695, %v909_v31  ;;  %v1208_v60 = vand.u32 2147483648, %v4218_v59 }
 0x146   : > { %v3294_v28 = vpop.eup %3293  ;;  %v4315_v29 = vadd.f32 1.0, %v3292_v21  ;;  %3305 = vtanh.f32 %v1019_v52  ;;  %2592 = vrot.lane.b32.xlu0 %v2511_v3, %s3678_s21  ;;  %v3152_v61 = vmul.f32 -1.442695, %v1022_v16  ;;  %v1205_v62 = vsel %vm4344_vm1, %v4265_v36, %v1201_v51  ;;  %v4356_v8 = vpop.permute.xlu2 %2378 }
 0x147   : > { %v4320_v32 = vpop.eup %3295  ;;  %v4324_v35 = vadd.f32 1.0, %v3294_v28  ;;  %3307 = vpow2.f32 %v3151_v6  ;;  %v1453_v63 = vmul.f32 %v4287_v55, %v4238_v15  ;;  %6241 = vst [vmem:[#allocation23_spill] sm:$0xff] %v4356_v8  ;;  %v974_v59 = vadd.f32 %v973_v46, %v4154_v50 }
 0x148   : > { %6235 = vst [vmem:[#allocation19_spill] sm:$0xff] %v4315_v29  ;;  %v4329_v39 = vpop.eup %3297  ;;  %3309 = vrcp.f32 %v4315_v29  ;;  %vm1207_vm2 = vcmp.eq.f32.partialorder %v1206_v26, 8.507059e+37  ;;  %vm1458_vm3 = vweird.f32 %v4287_v55  ;;  %v1463_v23 = vand.u32 2147483648, %v4238_v15  ;;  %v4381_v26 = vpop.permute.xlu0 %2374 }
 0x149   : > { %6237 = vst [vmem:[#allocation21_spill] sm:$0xff] %v4329_v39  ;;  %v3300_v44 = vpop.eup %3299  ;;  %3311 = vrcp.f32 %v4324_v35  ;;  %v1454_v18 = vsub.f32 1.0, %v1453_v63  ;;  %v1461_v3 = vand.u32 2147483647, %v4238_v15  ;;  %vm1457_vm4 = vweird.f32 %v4238_v15 }
 0x14a   : > { %v4338_v52 = vpop.eup %3301  ;;  %v4340_v53 = vadd.f32 1.0, %v3300_v44  ;;  %3313 = vpow2.f32 %v3103_v11  ;;  %v1209_v11 = vor.u32 1.1754944e-38, %v1208_v60  ;;  %v911_v24 = vpop.f32.mrf.mxu2  ;;  %v3104_v44 = vmul.f32 -1.442695, %v861_v45  ;;  %6245 = vst [vmem:[#allocation27_spill] sm:$0xff] %v4381_v26  ;;  %vm1459_vm5 = vmor %vm1457_vm4, %vm1458_vm3 }
 0x14b   : > { %v3304_v22 = vpop.eup %3303  ;;  %3315 = vtanh.f32 %v971_v7  ;;  %v1455_v19 = vmul.f32 %v4287_v55, %v1454_v18  ;;  %v1024_v46 = vpop.f32.mrf.mxu3  ;;  %v1213_v15 = vmul.f32 %v4307_v10, %v4268_v38  ;;  %v3136_v45 = vmul.f32 -1.442695, %v974_v59 }
 0x14c   : > { %6238 = vst [vmem:[#allocation22_spill] sm:$0xff] %v4340_v53  ;;  %v4354_v6 = vpop.eup %3305  ;;  %3317 = vrcp.f32 %v4340_v53  ;;  %v4359_v9 = vadd.f32 1.0, %v3304_v22  ;;  %v4368_v21 = vsel %vm1207_vm2, %v1209_v11, %v1205_v62  ;;  %v4390_v22 = vpop.permute.xlu1 %2370  ;;  %v1464_v62 = vor.u32 1.1754944e-38, %v1463_v23 }
 0x14d   : > { %v3308_v7 = vpop.eup %3307  ;;  %3319 = vpow2.f32 %v3135_v40  ;;  %6244 = vst [vmem:[#allocation26_spill] sm:$0xff] %v4368_v21  ;;  %v2495_v31 = vmul.f32 %v4215_v58, %v4368_v21  ;;  %v1456_v58 = vadd.f32 %v4287_v55, %v1455_v19  ;;  %vm1462_vm6 = vcmp.eq.f32.partialorder %v1461_v3, 8.507059e+37  ;;  %v976_v18 = vpop.f32.mrf.mxu1 }
 0x14e   : > { %v4363_v36 = vpop.eup %3309  ;;  %3321 = vrcp.f32 %v4359_v9  ;;  %v4366_v34 = vadd.f32 1.0, %v3308_v7  ;;  %6247 = vst [vmem:[#allocation29_spill] sm:$0xff] %v4390_v22  ;;  %v1025_v7 = vadd.f32 %v1024_v46, %v4154_v50  ;;  %v4410_v3 = vpop.permute.xlu2 %2384  ;;  %vm1218_vm7 = vweird.f32 %v4307_v10 }
 0x14f   : > { %6242 = vst [vmem:[#allocation24_spill] sm:$0xff] %v4363_v36  ;;  %v4371_v28 = vpop.eup %3311  ;;  %3323 = vpow2.f32 %v3120_v54  ;;  %2560 = vrot.lane.b32.xlu2 %v2495_v31, %s3678_s21  ;;  %v912_v54 = vadd.f32 %v911_v24, %v4152_v49  ;;  %v1460_v11 = vsel %vm1459_vm5, %v4287_v55, %v1456_v58  ;;  %v1214_v58 = vsub.f32 1.0, %v1213_v15 }
 0x150   : > { %6243 = vst [vmem:[#allocation25_spill] sm:$0xff] %v4366_v34  ;;  %v3314_v40 = vpop.eup %3313  ;;  %3325 = vrcp.f32 %v4366_v34  ;;  %vm1217_vm8 = vweird.f32 %v4268_v38  ;;  %v4438_v22 = vpop.permute.xlu0 %2380  ;;  %vm1472_vm11 = vweird.f32 %v4300_v2  ;;  %vm1473_vm12 = vweird.f32 %v4338_v52 }
 0x151   : > { %v4379_v51 = vpop.eup %3315  ;;  %v4383_v57 = vadd.f32 1.0, %v3314_v40  ;;  %3327 = vtanh.f32 %v1022_v16  ;;  %v863_v16 = vpop.f32.mrf.mxu0  ;;  %v3121_v40 = vmul.f32 -1.442695, %v912_v54  ;;  %6250 = vst [vmem:[#allocation32_spill] sm:$0xff] %v4410_v3  ;;  %vm1219_vm9 = vmor %vm1217_vm8, %vm1218_vm7  ;;  %vm1233_vm15 = vweird.f32 %v4371_v28 }
 0x152   : > { %v4388_v60 = vpop.eup %3317  ;;  %3329 = vpow2.f32 %v3152_v61  ;;  %v4403_v61 = vsel %vm1462_vm6, %v1464_v62, %v1460_v11  ;;  %v864_v8 = vadd.f32 %v863_v16, %v4152_v49  ;;  %v1215_v16 = vmul.f32 %v4307_v10, %v1214_v58  ;;  %6252 = vst [vmem:[#allocation34_spill] sm:$0xff] %v4438_v22  ;;  %vm4475_vm13 = vmor %vm1472_vm11, %vm1473_vm12 }
 0x153   : > { %6246 = vst [vmem:[#allocation28_spill] sm:$0xff] %v4388_v60  ;;  %v3320_v63 = vpop.eup %3319  ;;  %3331 = vrcp.f32 %v4383_v57  ;;  %v2512_v23 = vmul.f32 %v4233_v12, %v4403_v61  ;;  %v3153_v12 = vmul.f32 -1.442695, %v1025_v7  ;;  %v1223_v11 = vand.u32 2147483648, %v4268_v38 }
 0x154   : > { %v4399_v24 = vpop.eup %3321  ;;  %v4401_v31 = vadd.f32 1.0, %v3320_v63  ;;  %3333 = vpow2.f32 %v3104_v44  ;;  %v977_v44 = vadd.f32 %v976_v18, %v4154_v50  ;;  %v1221_v63 = vand.u32 2147483647, %v4268_v38  ;;  %v4446_v14 = vpop.permute.xlu1 %2376 }
 0x155   : > { %v3324_v19 = vpop.eup %3323  ;;  %3335 = vtanh.f32 %v974_v59  ;;  %v4420_v59 = vmul.f32 %v4371_v28, %v4324_v35  ;;  %2594 = vrot.lane.b32.xlu1 %v2512_v23, %s3678_s21  ;;  %v1216_v58 = vadd.f32 %v4307_v10, %v1215_v16  ;;  %6254 = vst [vmem:[#allocation36_spill] sm:$0xff] %v4446_v14  ;;  %v914_v38 = vpop.f32.mrf.mxu2  ;;  %vm1232_vm0 = vweird.f32 %v4324_v35 }
 0x156   : > { %6248 = vst [vmem:[#allocation30_spill] sm:$0xff] %v4401_v31  ;;  %v4408_v55 = vpop.eup %3325  ;;  %3337 = vrcp.f32 %v4401_v31  ;;  %v4413_v46 = vadd.f32 1.0, %v3324_v19  ;;  %v3105_v19 = vmul.f32 -1.442695, %v864_v8  ;;  %v3137_v23 = vmul.f32 -1.442695, %v977_v44  ;;  %v4466_v14 = vpop.permute.xlu2 %2390  ;;  %vm1234_vm1 = vmor %vm1232_vm0, %vm1233_vm15 }
 0x157   : > { %6249 = vst [vmem:[#allocation31_spill] sm:$0xff] %v4408_v55  ;;  %v4416_v62 = vpop.eup %3327  ;;  %3339 = vpow2.f32 %v3136_v45  ;;  %v1468_v45 = vmul.f32 %v4338_v52, %v4300_v2  ;;  %v1224_v8 = vor.u32 1.1754944e-38, %v1223_v11  ;;  %v1220_v16 = vsel %vm1219_vm9, %v4307_v10, %v1216_v58  ;;  %v1027_v11 = vpop.f32.mrf.mxu3 }
 0x158   : > { %v3330_v54 = vpop.eup %3329  ;;  %3341 = vpow2.f32 %v3121_v40  ;;  %vm1222_vm10 = vcmp.eq.f32.partialorder %v1221_v63, 8.507059e+37  ;;  %6257 = vst [vmem:[#allocation39_spill] sm:$0xff] %v4466_v14  ;;  %v979_v14 = vpop.f32.mrf.mxu1  ;;  %vm1487_vm3 = vweird.f32 %v4359_v9  ;;  %vm1488_vm4 = vweird.f32 %v4399_v24 }
 0x159   : > { %v4427_v15 = vpop.eup %3331  ;;  %v4429_v18 = vadd.f32 1.0, %v3330_v54  ;;  %3343 = vrcp.f32 %v4413_v46  ;;  %v1469_v40 = vsub.f32 1.0, %v1468_v45  ;;  %v866_v45 = vpop.f32.mrf.mxu0  ;;  %vm1489_vm5 = vmor %vm1487_vm3, %vm1488_vm4  ;;  %vm1247_vm8 = vweird.f32 %v4383_v57 }
 0x15a   : > { %v3334_v3 = vpop.eup %3333  ;;  %3345 = vtanh.f32 %v1025_v7  ;;  %v4451_v7 = vsel %vm1222_vm10, %v1224_v8, %v1220_v16  ;;  %v1478_v8 = vand.u32 2147483648, %v4300_v2  ;;  %vm1248_vm7 = vweird.f32 %v4427_v15 }
 0x15b   : > { %6251 = vst [vmem:[#allocation33_spill] sm:$0xff] %v4429_v18  ;;  %v4436_v1 = vpop.eup %3335  ;;  %v4440_v26 = vadd.f32 1.0, %v3334_v3  ;;  %3347 = vpow2.f32 %v3153_v12  ;;  %v1470_v3 = vmul.f32 %v4338_v52, %v1469_v40  ;;  %v2496_v10 = vmul.f32 %v4275_v42, %v4451_v7  ;;  %vm4600_vm11 = vmor %vm1247_vm8, %vm1248_vm7 }
 0x15c   : > { %v4444_v54 = vpop.eup %3337  ;;  %3349 = vrcp.f32 %v4429_v18  ;;  %6255 = vst [vmem:[#allocation37_spill] sm:$0xff] %v4451_v7  ;;  %v1476_v12 = vand.u32 2147483647, %v4300_v2  ;;  %v915_v40 = vadd.f32 %v914_v38, %v4152_v49  ;;  %v867_v38 = vadd.f32 %v866_v45, %v4152_v49 }
 0x15d   : > { %6253 = vst [vmem:[#allocation35_spill] sm:$0xff] %v4444_v54  ;;  %v3340_v22 = vpop.eup %3339  ;;  %3351 = vpow2.f32 %v3105_v19  ;;  %v1471_v58 = vadd.f32 %v4338_v52, %v1470_v3  ;;  %2562 = vrot.lane.b32.xlu0 %v2496_v10, %s3678_s21  ;;  %v1028_v19 = vadd.f32 %v1027_v11, %v4154_v50  ;;  %v1479_v10 = vor.u32 1.1754944e-38, %v1478_v8 }
 0x15e   : > { %v4455_v41 = vadd.f32 1.0, %v3340_v22  ;;  %v3342_v63 = vpop.eup %3341  ;;  %3353 = vrcp.f32 %v4440_v26  ;;  %vm1477_vm14 = vcmp.eq.f32.partialorder %v1476_v12, 8.507059e+37  ;;  %v1229_v42 = vsub.f32 1.0, %v4420_v59 }
 0x15f   : > { %v4464_v16 = vpop.eup %3343  ;;  %v4468_v22 = vadd.f32 1.0, %v3342_v63  ;;  %3355 = vtanh.f32 %v977_v44  ;;  %v1475_v44 = vsel %vm4475_vm13, %v4338_v52, %v1471_v58  ;;  %v3122_v63 = vmul.f32 -1.442695, %v915_v40  ;;  %v4499_v40 = vpop.permute.xlu0 %2386 }
 0x160   : > { %6256 = vst [vmem:[#allocation38_spill] sm:$0xff] %v4455_v41  ;;  %v4481_v3 = vpop.eup %3345  ;;  %3357 = vpow2.f32 %v3137_v23  ;;  %v3154_v2 = vmul.f32 -1.442695, %v1028_v19  ;;  %v4491_v45 = vsel %vm1477_vm14, %v1479_v10, %v1475_v44  ;;  %v980_v58 = vadd.f32 %v979_v14, %v4154_v50  ;;  %v4506_v10 = vpop.permute.xlu1 %2382 }
 0x161   : > { %v3348_v7 = vpop.eup %3347  ;;  %3359 = vrcp.f32 %v4455_v41  ;;  %6262 = vst [vmem:[#allocation42_spill] sm:$0xff] %v4491_v45  ;;  %v2513_v52 = vmul.f32 %v4303_v5, %v4491_v45  ;;  %v1236_v5 = vand.u32 2147483647, %v4324_v35  ;;  %vm1502_vm10 = vweird.f32 %v4413_v46 }
 0x162   : > { %v4487_v33 = vpop.eup %3349  ;;  %v4489_v11 = vadd.f32 1.0, %v3348_v7  ;;  %3361 = vpow2.f32 %v3122_v63  ;;  %6263 = vst [vmem:[#allocation43_spill] sm:$0xff] %v4499_v40  ;;  %v3106_v7 = vmul.f32 -1.442695, %v867_v38  ;;  %v1230_v63 = vmul.f32 %v4371_v28, %v1229_v42 }
 0x163   : > { %6260 = vst [vmem:[#allocation40_spill] sm:$0xff] %v4487_v33  ;;  %v3352_v23 = vpop.eup %3351  ;;  %3363 = vrcp.f32 %v4468_v22  ;;  %2596 = vrot.lane.b32.xlu2 %v2513_v52, %s3678_s21  ;;  %v3138_v59 = vmul.f32 -1.442695, %v980_v58  ;;  %vm1237_vm2 = vcmp.eq.f32.partialorder %v1236_v5, 8.507059e+37  ;;  %v1491_v5 = vand.u32 2147483647, %v4359_v9 }
 0x164   : > { %6261 = vst [vmem:[#allocation41_spill] sm:$0xff] %v4489_v11  ;;  %v4497_v8 = vpop.eup %3353  ;;  %v4501_v12 = vadd.f32 1.0, %v3352_v23  ;;  %3365 = vtanh.f32 %v1028_v19  ;;  %v1238_v19 = vand.u32 2147483648, %v4324_v35  ;;  %v1231_v40 = vadd.f32 %v4371_v28, %v1230_v63  ;;  %v917_v35 = vpop.f32.mrf.mxu2 }
 0x165   : > { %v4504_v44 = vpop.eup %3355  ;;  %6264 = vst [vmem:[#allocation44_spill] sm:$0xff] %v4506_v10  ;;  %3367 = vpow2.f32 %v3154_v2  ;;  %v1483_v2 = vmul.f32 %v4399_v24, %v4359_v9  ;;  %v4525_v10 = vpop.permute.xlu2 %2396  ;;  %vm1492_vm6 = vcmp.eq.f32.partialorder %v1491_v5, 8.507059e+37  ;;  %vm1503_vm12 = vweird.f32 %v4464_v16 }
 0x166   : > { %v3358_v14 = vpop.eup %3357  ;;  %3369 = vrcp.f32 %v4489_v11  ;;  %6267 = vst [vmem:[#allocation47_spill] sm:$0xff] %v4525_v10  ;;  %v1239_v21 = vor.u32 1.1754944e-38, %v1238_v19  ;;  %v1030_v63 = vpop.f32.mrf.mxu3  ;;  %vm1504_vm13 = vmor %vm1502_vm10, %vm1503_vm12  ;;  %vm1263_vm15 = vweird.f32 %v4497_v8  ;;  %vm1262_vm0 = vweird.f32 %v4440_v26 }
 0x167   : > { %v4514_v38 = vpop.eup %3359  ;;  %3371 = vrcp.f32 %v4501_v12  ;;  %v4519_v52 = vadd.f32 1.0, %v3358_v14  ;;  %v1484_v11 = vsub.f32 1.0, %v1483_v2  ;;  %v1235_v14 = vsel %vm1234_vm1, %v4371_v28, %v1231_v40  ;;  %v869_v19 = vpop.f32.mrf.mxu0  ;;  %vm1264_vm1 = vmor %vm1262_vm0, %vm1263_vm15 }
 0x168   : > { %6265 = vst [vmem:[#allocation45_spill] sm:$0xff] %v4514_v38  ;;  %v3362_v23 = vpop.eup %3361  ;;  %3373 = vpow2.f32 %v3106_v7  ;;  %v1493_v7 = vand.u32 2147483648, %v4359_v9  ;;  %v4534_v33 = vsel %vm1237_vm2, %v1239_v21, %v1235_v14  ;;  %v1031_v14 = vadd.f32 %v1030_v63, %v4154_v50  ;;  %v4551_v18 = vpop.permute.xlu0 %2392 }
 0x169   : > { %6266 = vst [vmem:[#allocation46_spill] sm:$0xff] %v4519_v52  ;;  %v4523_v42 = vpop.eup %3363  ;;  %3375 = vtanh.f32 %v980_v58  ;;  %v4529_v41 = vadd.f32 1.0, %v3362_v23  ;;  %v1485_v58 = vmul.f32 %v4399_v24, %v1484_v11  ;;  %v2497_v28 = vmul.f32 %v4320_v32, %v4534_v33 }
 0x16a   : > { %v4527_v38 = vpop.eup %3365  ;;  %6268 = vst [vmem:[#allocation48_spill] sm:$0xff] %v4534_v33  ;;  %3377 = vpow2.f32 %v3138_v59  ;;  %v918_v11 = vadd.f32 %v917_v35, %v4152_v49  ;;  %v1494_v32 = vor.u32 1.1754944e-38, %v1493_v7  ;;  %v870_v59 = vadd.f32 %v869_v19, %v4152_v49  ;;  %v982_v35 = vpop.f32.mrf.mxu1 }
 0x16b   : > { %v3368_v45 = vpop.eup %3367  ;;  %3379 = vrcp.f32 %v4519_v52  ;;  %v1486_v21 = vadd.f32 %v4399_v24, %v1485_v58  ;;  %6271 = vst [vmem:[#allocation51_spill] sm:$0xff] %v4551_v18  ;;  %2564 = vrot.lane.b32.xlu1 %v2497_v28, %s3678_s21  ;;  %v4564_v58 = vpop.permute.xlu1 %2388  ;;  %v3155_v52 = vmul.f32 -1.442695, %v1031_v14  ;;  %v983_v19 = vadd.f32 %v982_v35, %v4154_v50 }
 0x16c   : > { %v4539_v2 = vpop.eup %3369  ;;  %v4541_v23 = vadd.f32 1.0, %v3368_v45  ;;  %v1243_v45 = vmul.f32 %v4427_v15, %v4383_v57  ;;  %3381 = vrcp.f32 %v4529_v41  ;;  %6272 = vst [vmem:[#allocation52_spill] sm:$0xff] %v4564_v58  ;;  %v3123_v33 = vmul.f32 -1.442695, %v918_v11 }
 0x16d   : > { %6269 = vst [vmem:[#allocation49_spill] sm:$0xff] %v4539_v2  ;;  %v4545_v40 = vpop.eup %3371  ;;  %v1490_v18 = vsel %vm1489_vm5, %v4399_v24, %v1486_v21  ;;  %v3107_v2 = vmul.f32 -1.442695, %v870_v59  ;;  %v4577_v5 = vpop.permute.xlu2 %2402  ;;  %vm1517_vm3 = vweird.f32 %v4468_v22  ;;  %vm1518_vm4 = vweird.f32 %v4523_v42 }
 0x16e   : > { %6270 = vst [vmem:[#allocation50_spill] sm:$0xff] %v4541_v23  ;;  %v3374_v10 = vpop.eup %3373  ;;  %3383 = vrcp.f32 %v4541_v23  ;;  %v4568_v28 = vsel %vm1492_vm6, %v1494_v32, %v1490_v18  ;;  %v1244_v58 = vsub.f32 1.0, %v1243_v45  ;;  %v1251_v18 = vand.u32 2147483647, %v4383_v57  ;;  %v1033_v35 = vpop.f32.mrf.mxu3  ;;  %vm1519_vm5 = vmor %vm1517_vm3, %vm1518_vm4 }
 0x16f   : > { %v4562_v63 = vpop.eup %3375  ;;  %6273 = vst [vmem:[#allocation53_spill] sm:$0xff] %v4568_v28  ;;  %v4570_v9 = vadd.f32 1.0, %v3374_v10  ;;  %v2514_v7 = vmul.f32 %v4354_v6, %v4568_v28  ;;  %3385 = vpow2.f32 %v3123_v33  ;;  %v1253_v10 = vand.u32 2147483648, %v4383_v57 }
 0x170   : > { %v3378_v54 = vpop.eup %3377  ;;  %3387 = vpow2.f32 %v3155_v52  ;;  %6275 = vst [vmem:[#allocation55_spill] sm:$0xff] %v4577_v5  ;;  %v1245_v33 = vmul.f32 %v4427_v15, %v1244_v58  ;;  %v1498_v6 = vmul.f32 %v4464_v16, %v4413_v46  ;;  %v920_v52 = vpop.f32.mrf.mxu2  ;;  %vm4595_vm9 = vcmp.eq.f32.partialorder %v1251_v18, 8.507059e+37 }
 0x171   : > { %v4575_v24 = vpop.eup %3379  ;;  %3389 = vtanh.f32 %v1031_v14  ;;  %2598 = vrot.lane.b32.xlu0 %v2514_v7, %s3678_s21  ;;  %v4589_v11 = vadd.f32 1.0, %v3378_v54  ;;  %v3139_v14 = vmul.f32 -1.442695, %v983_v19  ;;  %v1254_v54 = vor.u32 1.1754944e-38, %v1253_v10  ;;  %v4607_v28 = vpop.permute.xlu0 %2398 }
 0x172   : > { %6274 = vst [vmem:[#allocation54_spill] sm:$0xff] %v4575_v24  ;;  %v4582_v21 = vpop.eup %3381  ;;  %3391 = vpow2.f32 %v3107_v2  ;;  %v1246_v32 = vadd.f32 %v4427_v15, %v1245_v33  ;;  %v1499_v59 = vsub.f32 1.0, %v1498_v6  ;;  %v1508_v57 = vand.u32 2147483648, %v4413_v46  ;;  %v872_v7 = vpop.f32.mrf.mxu0 }
 0x173   : > { %3393 = vrcp.f32 %v4570_v9  ;;  %6276 = vst [vmem:[#allocation56_spill] sm:$0xff] %v4589_v11  ;;  %v921_v33 = vadd.f32 %v920_v52, %v4152_v49  ;;  %v1506_v24 = vand.u32 2147483647, %v4413_v46  ;;  %v4618_v31 = vpop.permute.xlu1 %2394  ;;  %v1258_v52 = vmul.f32 %v4497_v8, %v4440_v26 }
 0x174   : > { %v4592_v45 = vpop.eup %3383  ;;  %v1250_v6 = vsel %vm4600_vm11, %v4427_v15, %v1246_v32  ;;  %v1500_v23 = vmul.f32 %v4464_v16, %v1499_v59  ;;  %6283 = vst [vmem:[#allocation59_spill] sm:$0xff] %v4618_v31  ;;  %3395 = vpow2.f32 %v3139_v14  ;;  %v1034_v5 = vadd.f32 %v1033_v35, %v4154_v50 }
 0x175   : > { %6277 = vst [vmem:[#allocation57_spill] sm:$0xff] %v4592_v45  ;;  %v3386_v58 = vpop.eup %3385  ;;  %3397 = vrcp.f32 %v4589_v11  ;;  %v2409_v14 = vpop.permute.xlu2 %2408  ;;  %v1509_v2 = vor.u32 1.1754944e-38, %v1508_v57  ;;  %v3124_v35 = vmul.f32 -1.442695, %v921_v33  ;;  %vm1507_vm14 = vcmp.eq.f32.partialorder %v1506_v24, 8.507059e+37 }
 0x176   : > { %v3388_v18 = vpop.eup %3387  ;;  %v4609_v45 = vadd.f32 1.0, %v3386_v58  ;;  %v4624_v58 = vsel %vm4595_vm9, %v1254_v54, %v1250_v6  ;;  %v1501_v59 = vadd.f32 %v4464_v16, %v1500_v23  ;;  %3399 = vtanh.f32 %v983_v19  ;;  %v985_v54 = vpop.f32.mrf.mxu1 }
 0x177   : > { %v4616_v10 = vpop.eup %3389  ;;  %6284 = vst [vmem:[#allocation60_spill] sm:$0xff] %v4624_v58  ;;  %v2498_v32 = vmul.f32 %v4379_v51, %v4624_v58  ;;  %v873_v23 = vadd.f32 %v872_v7, %v4152_v49  ;;  %v3156_v6 = vmul.f32 -1.442695, %v1034_v5  ;;  %v1259_v58 = vsub.f32 1.0, %v1258_v52 }
 0x178   : > { %6282 = vst [vmem:[#allocation58_spill] sm:$0xff] %v4616_v10  ;;  %v3392_v15 = vpop.eup %3391  ;;  %v4633_v10 = vadd.f32 1.0, %v3388_v18  ;;  %3401 = vrcp.f32 %v4609_v45  ;;  %v1505_v51 = vsel %vm1504_vm13, %v4464_v16, %v1501_v59  ;;  %v986_v57 = vadd.f32 %v985_v54, %v4154_v50 }
 0x179   : > { %v4631_v31 = vpop.eup %3393  ;;  %2566 = vrot.lane.b32.xlu2 %v2498_v32, %s3678_s21  ;;  %v4643_v18 = vadd.f32 1.0, %v3392_v15  ;;  %v1510_v19 = vsel %vm1507_vm14, %v1509_v2, %v1505_v51  ;;  %3403 = vpow2.f32 %v3124_v35  ;;  %v4651_v32 = vmul.f32 %v4545_v40, %v4501_v12  ;;  %v4657_v52 = vpop.permute.xlu0 %2404 }
 0x17a   : > { %6285 = vst [vmem:[#allocation61_spill] sm:$0xff] %v4633_v10  ;;  %v4645_v11 = vmul.f32 %v2409_v14, %v1510_v19  ;;  %v2515_v46 = vmul.f32 %v4416_v62, %v1510_v19  ;;  %v3396_v33 = vpop.eup %3395  ;;  %3405 = vrcp.f32 %v4633_v10  ;;  %v3108_v16 = vmul.f32 -1.442695, %v873_v23  ;;  %v923_v51 = vpop.f32.mrf.mxu2 }
 0x17b   : > { %v1260_v24 = vmul.f32 %v4497_v8, %v1259_v58  ;;  %v4655_v7 = vpop.eup %3397  ;;  %3407 = vtanh.f32 %v1034_v5  ;;  %v1266_v62 = vand.u32 2147483647, %v4440_v26  ;;  %v1268_v15 = vand.u32 2147483648, %v4440_v26  ;;  %v4674_v23 = vpop.permute.xlu1 %2400 }
 0x17c   : > { %6286 = vst [vmem:[#allocation62_spill] sm:$0xff] %v4645_v11  ;;  %2600 = vrot.lane.b32.xlu1 %v2515_v46, %s3678_s21  ;;  %v4663_v59 = vpop.eup %3399  ;;  %3409 = vrcp.f32 %v4643_v18  ;;  %v1513_v58 = vmul.f32 %v4523_v42, %v4468_v22  ;;  %v4672_v2 = vadd.f32 1.0, %v3396_v33  ;;  %v3140_v35 = vmul.f32 -1.442695, %v986_v57  ;;  %v1036_v26 = vpop.f32.mrf.mxu3 }
 0x17d   : > { %v1261_v14 = vadd.f32 %v4497_v8, %v1260_v24  ;;  %3411 = vpow2.f32 %v3156_v6  ;;  %v1269_v54 = vor.u32 1.1754944e-38, %v1268_v15  ;;  %vm1267_vm2 = vcmp.eq.f32.partialorder %v1266_v62, 8.507059e+37 }
 0x17e   : > { %v4670_v5 = vpop.eup %3401  ;;  %3413 = vpow2.f32 %v3108_v16  ;;  %v1514_v46 = vsub.f32 1.0, %v1513_v58  ;;  %v1523_v6 = vand.u32 2147483648, %v4468_v22  ;;  %v924_v62 = vadd.f32 %v923_v51, %v4152_v49 }
 0x17f   : > { %v1265_v19 = vsel %vm1264_vm1, %v4497_v8, %v1261_v14  ;;  %v3404_v24 = vpop.eup %3403  ;;  %v1521_v8 = vand.u32 2147483647, %v4468_v22  ;;  %v875_v14 = vpop.f32.mrf.mxu0  ;;  %3415 = vpow2.f32 %v3140_v35  ;;  %vm1278_vm7 = vweird.f32 %v4545_v40 }
 0x180   : > { %v4677_v11 = vsel %vm1267_vm2, %v1269_v54, %v1265_v19  ;;  %v4682_v33 = vpop.eup %3405  ;;  %v1515_v16 = vmul.f32 %v4523_v42, %v1514_v46  ;;  %v4691_v54 = vadd.f32 1.0, %v3404_v24  ;;  %v1037_v19 = vadd.f32 %v1036_v26, %v4154_v50  ;;  %v988_v46 = vpop.f32.mrf.mxu1 }
 0x181   : > { %6287 = vst [vmem:[#allocation63_spill] sm:$0xff] %v4677_v11  ;;  %v2499_v15 = vmul.f32 %v4436_v1, %v4677_v11  ;;  %v4689_v58 = vpop.eup %3407  ;;  %v4702_v1 = vmul.f32 %v4206_v47, %v4180_v20  ;;  %3417 = vrcp.f32 %v4672_v2  ;;  %v2411_v26 = vpop.permute.xlu0 %2410  ;;  %v1524_v24 = vor.u32 1.1754944e-38, %v1523_v6 }
 0x182   : > { %6288 = vst [vmem:[#allocation64_spill] sm:$0xff] %v4682_v33  ;;  %v4694_v10 = vpop.eup %3409  ;;  %v4698_v33 = vmul.f32 %v4194_v37, %v4170_v13  ;;  %v1516_v51 = vadd.f32 %v4523_v42, %v1515_v16  ;;  %3419 = vtanh.f32 %v986_v57  ;;  %v3125_v11 = vmul.f32 -1.442695, %v924_v62 }
 0x183   : > { %2568 = vrot.lane.b32.xlu0 %v2499_v15, %s3678_s21  ;;  %v3412_v35 = vpop.eup %3411  ;;  %v876_v37 = vadd.f32 %v875_v14, %v4152_v49  ;;  %vm1522_vm6 = vcmp.eq.f32.partialorder %v1521_v8, 8.507059e+37  ;;  %v3157_v15 = vmul.f32 -1.442695, %v1037_v19  ;;  %v1274_v16 = vsub.f32 1.0, %v4651_v32  ;;  %v4722_v6 = vpop.permute.xlu1 %2406 }
 0x184   : > { %6289 = vst [vmem:[#allocation65_spill] sm:$0xff] %v4698_v33  ;;  %v3414_v13 = vpop.eup %3413  ;;  %v1520_v33 = vsel %vm1519_vm5, %v4523_v42, %v1516_v51  ;;  %v4716_v57 = vmul.f32 %v4607_v28, %v4242_v17  ;;  %3421 = vrcp.f32 %v4691_v54  ;;  %v4720_v22 = vadd.f32 %v988_v46, %v4154_v50 }
 0x185   : > { %v1525_v20 = vsel %vm1522_vm6, %v1524_v24, %v1520_v33  ;;  %v4724_v62 = vadd.f32 1.0, %v3412_v35  ;;  %v3109_v8 = vmul.f32 -1.442695, %v876_v37  ;;  %v3416_v32 = vpop.eup %3415  ;;  %v4729_v51 = vadd.f32 1.0, %v3414_v13  ;;  %v926_v24 = vpop.f32.mrf.mxu2 }
 0x186   : > { %v4726_v14 = vmul.f32 %v2411_v26, %v1525_v20  ;;  %v2516_v42 = vmul.f32 %v4481_v3, %v1525_v20  ;;  %3423 = vpow2.f32 %v3125_v11  ;;  %v1275_v17 = vmul.f32 %v4545_v40, %v1274_v16 }
 0x187   : > { %6290 = vst [vmem:[#allocation66_spill] sm:$0xff] %v4724_v62  ;;  %v4733_v28 = vpop.eup %3417  ;;  %3425 = vpow2.f32 %v3157_v15  ;;  %v1281_v33 = vand.u32 2147483647, %v4501_v12  ;;  %v1283_v46 = vand.u32 2147483648, %v4501_v12  ;;  %v1528_v20 = vmul.f32 %v4582_v21, %v4529_v41 }
 0x188   : > { %6291 = vst [vmem:[#allocation67_spill] sm:$0xff] %v4726_v14  ;;  %2602 = vrot.lane.b32.xlu2 %v2516_v42, %s3678_s21  ;;  %v4740_v37 = vpop.eup %3419  ;;  %3427 = vtanh.f32 %v1037_v19  ;;  %v3141_v13 = vmul.f32 -1.442695, %v4720_v22  ;;  %v1276_v3 = vadd.f32 %v4545_v40, %v1275_v17  ;;  %vm1277_vm8 = vweird.f32 %v4501_v12 }
 0x189   : > { %v4745_v11 = vadd.f32 1.0, %v3416_v32  ;;  %3429 = vpow2.f32 %v3109_v8  ;;  %vm1279_vm9 = vmor %vm1277_vm8, %vm1278_vm7  ;;  %v1284_v35 = vor.u32 1.1754944e-38, %v1283_v46  ;;  %v1529_v26 = vsub.f32 1.0, %v1528_v20  ;;  %v1039_v32 = vpop.f32.mrf.mxu3 }
 0x18a   : > { %v4747_v15 = vpop.eup %3421  ;;  %v1280_v16 = vsel %vm1279_vm9, %v4545_v40, %v1276_v3  ;;  %vm1282_vm10 = vcmp.eq.f32.partialorder %v1281_v33, 8.507059e+37  ;;  %vm1532_vm11 = vweird.f32 %v4529_v41  ;;  %vm1533_vm12 = vweird.f32 %v4582_v21 }
 0x18b   : > { %v4752_v19 = vsel %vm1282_vm10, %v1284_v35, %v1280_v16  ;;  %v1530_v12 = vmul.f32 %v4582_v21, %v1529_v26  ;;  %v1536_v42 = vand.u32 2147483647, %v4529_v41  ;;  %v1538_v8 = vand.u32 2147483648, %v4529_v41  ;;  %v2413_v26 = vpop.permute.xlu1 %2412  ;;  %vm1534_vm13 = vmor %vm1532_vm11, %vm1533_vm12 }
 0x18c   : > { %6292 = vst [vmem:[#allocation68_spill] sm:$0xff] %v4752_v19  ;;  %v3424_v17 = vpop.eup %3423  ;;  %v4759_v46 = vmul.f32 %v4251_v25, %v4208_v48  ;;  %3431 = vpow2.f32 %v3141_v13  ;;  %v2500_v40 = vmul.f32 %v4504_v44, %v4752_v19  ;;  %v927_v33 = vadd.f32 %v926_v24, %v4152_v49  ;;  %v878_v19 = vpop.f32.mrf.mxu0 }
 0x18d   : > { %v3426_v20 = vpop.eup %3425  ;;  %v4766_v3 = vmul.f32 %v4279_v43, %v4225_v4  ;;  %v1288_v35 = vmul.f32 %v4631_v31, %v4570_v9  ;;  %3433 = vrcp.f32 %v4724_v62  ;;  %v1531_v16 = vadd.f32 %v4582_v21, %v1530_v12  ;;  %v991_v48 = vpop.f32.mrf.mxu1 }
 0x18e   : > { %6293 = vst [vmem:[#allocation69_spill] sm:$0xff] %v4759_v46  ;;  %v4772_v25 = vpop.eup %3427  ;;  %3435 = vrcp.f32 %v4729_v51  ;;  %2570 = vrot.lane.b32.xlu1 %v2500_v40, %s3678_s21  ;;  %v1539_v44 = vor.u32 1.1754944e-38, %v1538_v8  ;;  %v3126_v13 = vmul.f32 -1.442695, %v927_v33  ;;  %v1040_v24 = vadd.f32 %v1039_v32, %v4154_v50 }
 0x18f   : > { %6294 = vst [vmem:[#allocation70_spill] sm:$0xff] %v4766_v3  ;;  %v3430_v46 = vpop.eup %3429  ;;  %3437 = vrcp.f32 %v4745_v11  ;;  %v4782_v12 = vadd.f32 1.0, %v3424_v17  ;;  %v1535_v43 = vsel %vm1534_vm13, %v4582_v21, %v1531_v16  ;;  %vm1537_vm14 = vcmp.eq.f32.partialorder %v1536_v42, 8.507059e+37 }
 0x190   : > { %v4787_v40 = vmul.f32 %v4295_v0, %v4254_v27  ;;  %v4789_v41 = vadd.f32 1.0, %v3426_v20  ;;  %3439 = vtanh.f32 %v4720_v22  ;;  %v1540_v8 = vsel %vm1537_vm14, %v1539_v44, %v1535_v43 }
 0x191   : > { %v4792_v32 = vmul.f32 %v2413_v26, %v1540_v8  ;;  %v2517_v33 = vmul.f32 %v4527_v38, %v1540_v8  ;;  %v879_v4 = vadd.f32 %v878_v19, %v4152_v49  ;;  %v4797_v17 = vadd.f32 %v991_v48, %v4154_v50 }
 0x192   : > { %6295 = vst [vmem:[#allocation71_spill] sm:$0xff] %v4787_v40  ;;  %v3432_v21 = vpop.eup %3431  ;;  %v4801_v42 = vmul.f32 %v4674_v23, %v4317_v30  ;;  %3441 = vpow2.f32 %v3126_v13  ;;  %v3158_v20 = vmul.f32 -1.442695, %v1040_v24  ;;  %v1289_v16 = vsub.f32 1.0, %v1288_v35 }
 0x193   : > { %6296 = vst [vmem:[#allocation72_spill] sm:$0xff] %v4789_v41  ;;  %v4803_v27 = vpop.eup %3433  ;;  %3443 = vrcp.f32 %v4782_v12  ;;  %v4806_v43 = vadd.f32 1.0, %v3430_v46  ;;  %2604 = vrot.lane.b32.xlu0 %v2517_v33, %s3678_s21  ;;  %v1296_v38 = vand.u32 2147483647, %v4570_v9  ;;  %v1298_v48 = vand.u32 2147483648, %v4570_v9 }
 0x194   : > { %6297 = vst [vmem:[#allocation73_spill] sm:$0xff] %v4792_v32  ;;  %v4811_v22 = vpop.eup %3435  ;;  %3445 = vtanh.f32 %v1040_v24  ;;  %v1290_v30 = vmul.f32 %v4631_v31, %v1289_v16  ;;  %vm1293_vm15 = vweird.f32 %v4631_v31  ;;  %v1543_v23 = vmul.f32 %v4670_v5, %v4609_v45 }
 0x195   : > { %6298 = vst [vmem:[#allocation74_spill] sm:$0xff] %v4803_v27  ;;  %v4817_v19 = vpop.eup %3437  ;;  %3447 = vrcp.f32 %v4789_v41  ;;  %v4820_v46 = vadd.f32 1.0, %v3432_v21  ;;  %v3110_v35 = vmul.f32 -1.442695, %v879_v4  ;;  %v3142_v26 = vmul.f32 -1.442695, %v4797_v17  ;;  %v929_v21 = vpop.f32.mrf.mxu2 }
 0x196   : > { %v4823_v44 = vpop.eup %3439  ;;  %3449 = vpow2.f32 %v3158_v20  ;;  %v1291_v13 = vadd.f32 %v4631_v31, %v1290_v30  ;;  %vm1292_vm0 = vweird.f32 %v4570_v9  ;;  %v1544_v24 = vsub.f32 1.0, %v1543_v23 }
 0x197   : > { %6299 = vst [vmem:[#allocation75_spill] sm:$0xff] %v4820_v46  ;;  %vm4827_vm1 = vmor %vm1292_vm0, %vm1293_vm15  ;;  %vm1297_vm2 = vcmp.eq.f32.partialorder %v1296_v38, 8.507059e+37  ;;  %v1299_v33 = vor.u32 1.1754944e-38, %v1298_v48  ;;  %vm1547_vm3 = vweird.f32 %v4609_v45  ;;  %v1553_v4 = vand.u32 2147483648, %v4609_v45 }
 0x198   : > { %v3442_v16 = vpop.eup %3441  ;;  %v1295_v20 = vsel %vm4827_vm1, %v4631_v31, %v1291_v13  ;;  %v1545_v30 = vmul.f32 %v4670_v5, %v1544_v24  ;;  %vm1548_vm4 = vweird.f32 %v4670_v5  ;;  %v1551_v9 = vand.u32 2147483647, %v4609_v45  ;;  %v6308_v45 = vld [vmem:[#allocation55_spill] sm:$0xff] }
 0x199   : > { %v4839_v23 = vpop.eup %3443  ;;  %v4843_v38 = vmul.f32 %v4329_v39, %v4289_v56  ;;  %v4847_v48 = vmul.f32 %v4363_v36, %v4315_v29  ;;  %3451 = vpow2.f32 %v3110_v35  ;;  %v4849_v32 = vsel %vm1297_vm2, %v1299_v33, %v1295_v20  ;;  %v2415_v33 = vpop.permute.xlu2 %2414  ;;  %vm1549_vm5 = vmor %vm1547_vm3, %vm1548_vm4 }
 0x19a   : > { %6304 = vst [vmem:[#allocation78_spill] sm:$0xff] %v4849_v32  ;;  %v4851_v31 = vpop.eup %3445  ;;  %3453 = vrcp.f32 %v4806_v43  ;;  %v2501_v13 = vmul.f32 %v4562_v63, %v4849_v32  ;;  %v1546_v24 = vadd.f32 %v4670_v5, %v1545_v30  ;;  %v930_v8 = vadd.f32 %v929_v21, %v4152_v49  ;;  %v1042_v20 = vpop.f32.mrf.mxu3 }
 0x19b   : > { %6302 = vst [vmem:[#allocation76_spill] sm:$0xff] %v4843_v38  ;;  %v4858_v0 = vpop.eup %3447  ;;  %v1303_v36 = vmul.f32 %v4694_v10, %v4643_v18  ;;  %3455 = vrcp.f32 %v4820_v46  ;;  %v4863_v35 = vadd.f32 1.0, %v3442_v16  ;;  %v1554_v63 = vor.u32 1.1754944e-38, %v1553_v4  ;;  %v881_v32 = vpop.f32.mrf.mxu0 }
 0x19c   : > { %6303 = vst [vmem:[#allocation77_spill] sm:$0xff] %v4847_v48  ;;  %v3450_v30 = vpop.eup %3449  ;;  %v4871_v21 = vmul.f32 %v4388_v60, %v4340_v53  ;;  %3457 = vpow2.f32 %v3142_v26  ;;  %2572 = vrot.lane.b32.xlu2 %v2501_v13, %s3678_s21  ;;  %v1550_v29 = vsel %vm1549_vm5, %v4670_v5, %v1546_v24  ;;  %vm1552_vm6 = vcmp.eq.f32.partialorder %v1551_v9, 8.507059e+37  ;;  %v6310_v26 = vld [vmem:[#allocation58_spill] sm:$0xff]  ;;  %v994_v9 = vpop.f32.mrf.mxu1 }
 0x19d   : > { %6305 = vst [vmem:[#allocation79_spill] sm:$0xff] %v4858_v0  ;;  %v4877_v16 = vmul.f32 %v4408_v55, %v4366_v34  ;;  %v4881_v48 = vmul.f32 %v6308_v45, %v4403_v61  ;;  %3459 = vtanh.f32 %v4797_v17  ;;  %v1555_v4 = vsel %vm1552_vm6, %v1554_v63, %v1550_v29  ;;  %v6312_v34 = vld [vmem:[#allocation35_spill] sm:$0xff]  ;;  %v6315_v61 = vld [vmem:[#allocation40_spill] sm:$0xff] }
 0x19e   : > { %6306 = vst [vmem:[#allocation80_spill] sm:$0xff] %v4871_v21  ;;  %v4884_v53 = vmul.f32 %v2415_v33, %v1555_v4  ;;  %v2518_v60 = vmul.f32 %v6310_v26, %v1555_v4  ;;  %v3127_v13 = vmul.f32 -1.442695, %v930_v8  ;;  %v1043_v5 = vadd.f32 %v1042_v20, %v4154_v50  ;;  %v6311_v21 = vld [vmem:[#allocation30_spill] sm:$0xff] }
 0x19f   : > { %6307 = vst [vmem:[#allocation81_spill] sm:$0xff] %v4877_v16  ;;  %v3452_v24 = vpop.eup %3451  ;;  %v4890_v55 = vmul.f32 %v6312_v34, %v6311_v21  ;;  %v6314_v16 = vld [vmem:[#allocation33_spill] sm:$0xff]  ;;  %3461 = vrcp.f32 %v4863_v35  ;;  %v1304_v29 = vsub.f32 1.0, %v1303_v36  ;;  %v4899_v33 = vadd.f32 1.0, %v3450_v30 }
 0x1a0   : > { %6309 = vst [vmem:[#allocation55_spill] sm:$0xff] %v4884_v53  ;;  %v4894_v45 = vmul.f32 %v6315_v61, %v6314_v16  ;;  %v4897_v17 = vpop.eup %3453  ;;  %2606 = vrot.lane.b32.xlu1 %v2518_v60, %s3678_s21  ;;  %v882_v8 = vadd.f32 %v881_v32, %v4152_v49  ;;  %v1313_v63 = vand.u32 2147483648, %v4643_v18  ;;  %v1558_v20 = vmul.f32 %v4747_v15, %v4691_v54 }
 0x1a1   : > { %6313 = vst [vmem:[#allocation58_spill] sm:$0xff] %v4890_v55  ;;  %v4906_v4 = vpop.eup %3455  ;;  %v995_v26 = vadd.f32 %v994_v9, %v4154_v50  ;;  %v1305_v53 = vmul.f32 %v4694_v10, %v1304_v29  ;;  %vm1308_vm7 = vweird.f32 %v4694_v10  ;;  %v1311_v36 = vand.u32 2147483647, %v4643_v18  ;;  %v6321_v55 = vld [vmem:[#allocation42_spill] sm:$0xff]  ;;  %v2421_v38 = vpop.permute.xlu2 %2420 }
 0x1a2   : > { %6316 = vst [vmem:[#allocation82_spill] sm:$0xff] %v4894_v45  ;;  %v3458_v30 = vpop.eup %3457  ;;  %v4912_v61 = vadd.f32 1.0, %v3452_v24  ;;  %3463 = vpow2.f32 %v3127_v13  ;;  %v3159_v60 = vmul.f32 -1.442695, %v1043_v5  ;;  %v1559_v32 = vsub.f32 1.0, %v1558_v20 }
 0x1a3   : > { %6317 = vst [vmem:[#allocation83_spill] sm:$0xff] %v4899_v33  ;;  %v4914_v16 = vpop.eup %3459  ;;  %v1306_v45 = vadd.f32 %v4694_v10, %v1305_v53  ;;  %vm1307_vm8 = vweird.f32 %v4643_v18  ;;  %vm1562_vm9 = vweird.f32 %v4691_v54  ;;  %vm1563_vm10 = vweird.f32 %v4747_v15 }
 0x1a4   : > { %6318 = vst [vmem:[#allocation84_spill] sm:$0xff] %v4906_v4  ;;  %vm1309_vm11 = vmor %vm1307_vm8, %vm1308_vm7  ;;  %v1314_v9 = vor.u32 1.1754944e-38, %v1313_v63  ;;  %v1560_v29 = vmul.f32 %v4747_v15, %v1559_v32  ;;  %v1566_v24 = vand.u32 2147483647, %v4691_v54  ;;  %v1568_v13 = vand.u32 2147483648, %v4691_v54  ;;  %v2417_v63 = vpop.permute.xlu0 %2416  ;;  %v997_v39 = vpop.f32.mrf.mxu1 }
 0x1a5   : > { %v4923_v21 = vpop.eup %3461  ;;  %3465 = vrcp.f32 %v4899_v33  ;;  %v4926_v20 = vadd.f32 1.0, %v3458_v30  ;;  %v1310_v53 = vsel %vm1309_vm11, %v4694_v10, %v1306_v45  ;;  %vm1312_vm12 = vcmp.eq.f32.partialorder %v1311_v36, 8.507059e+37  ;;  %vm1564_vm13 = vmor %vm1562_vm9, %vm1563_vm10  ;;  %v932_v45 = vpop.f32.mrf.mxu2 }
 0x1a6   : > { %3467 = vrcp.f32 %v4912_v61  ;;  %v3111_v18 = vmul.f32 -1.442695, %v882_v8  ;;  %v4930_v34 = vsel %vm1312_vm12, %v1314_v9, %v1310_v53  ;;  %v1561_v32 = vadd.f32 %v4747_v15, %v1560_v29  ;;  %v884_v8 = vpop.f32.mrf.mxu0  ;;  %v1045_v53 = vpop.f32.mrf.mxu3 }
 0x1a7   : > { %6319 = vst [vmem:[#allocation85_spill] sm:$0xff] %v4926_v20  ;;  %v4935_v40 = vmul.f32 %v4657_v52, %v6321_v55  ;;  %3469 = vpow2.f32 %v3159_v60  ;;  %v2502_v30 = vmul.f32 %v4663_v59, %v4930_v34  ;;  %v1569_v10 = vor.u32 1.1754944e-38, %v1568_v13  ;;  %v6322_v55 = vld [vmem:[#allocation38_spill] sm:$0xff]  ;;  %v6323_v52 = vld [vmem:[#allocation45_spill] sm:$0xff] }
 0x1a8   : > { %6320 = vst [vmem:[#allocation86_spill] sm:$0xff] %v4930_v34  ;;  %v3464_v36 = vpop.eup %3463  ;;  %3471 = vtanh.f32 %v1043_v5  ;;  %v3143_v9 = vmul.f32 -1.442695, %v995_v26  ;;  %v1565_v29 = vsel %vm1564_vm13, %v4747_v15, %v1561_v32  ;;  %vm1567_vm14 = vcmp.eq.f32.partialorder %v1566_v24, 8.507059e+37  ;;  %v6327_v32 = vld [vmem:[#allocation41_spill] sm:$0xff] }
 0x1a9   : > { %v4946_v60 = vmul.f32 %v6323_v52, %v6322_v55  ;;  %v1318_v59 = vmul.f32 %v4811_v22, %v4729_v51  ;;  %3473 = vrcp.f32 %v4926_v20  ;;  %2574 = vrot.lane.b32.xlu0 %v2502_v30, %s3678_s21  ;;  %v1570_v54 = vsel %vm1567_vm14, %v1569_v10, %v1565_v29  ;;  %v6328_v34 = vld [vmem:[#allocation49_spill] sm:$0xff]  ;;  %v6330_v52 = vld [vmem:[#allocation46_spill] sm:$0xff] }
 0x1aa   : > { %3475 = vpow2.f32 %v3111_v18  ;;  %v4952_v13 = vmul.f32 %v2417_v63, %v1570_v54  ;;  %v2519_v5 = vmul.f32 %v4689_v58, %v1570_v54  ;;  %v885_v15 = vadd.f32 %v884_v8, %v4152_v49  ;;  %v6333_v58 = vld [vmem:[#allocation50_spill] sm:$0xff]  ;;  %v6334_v30 = vld [vmem:[#allocation57_spill] sm:$0xff] }
 0x1ab   : > { %6324 = vst [vmem:[#allocation42_spill] sm:$0xff] %v4946_v60  ;;  %v4956_v24 = vpop.eup %3465  ;;  %v4960_v55 = vmul.f32 %v6328_v34, %v6327_v32  ;;  %v6331_v60 = vld [vmem:[#allocation54_spill] sm:$0xff]  ;;  %3477 = vtanh.f32 %v995_v26  ;;  %v1588_v18 = vmul.f32 %v4923_v21, %v4863_v35  ;;  %v4972_v10 = vmul.f32 %v6334_v30, %v6333_v58  ;;  %v6336_v8 = vld [vmem:[#allocation53_spill] sm:$0xff] }
 0x1ac   : > { %6325 = vst [vmem:[#allocation87_spill] sm:$0xff] %v4952_v13  ;;  %v4964_v56 = vmul.f32 %v6331_v60, %v6330_v52  ;;  %v4968_v63 = vpop.eup %3467  ;;  %v4976_v29 = vmul.f32 %v4722_v6, %v6336_v8  ;;  %v4978_v54 = vadd.f32 1.0, %v3464_v36  ;;  %3479 = vpow2.f32 %v3143_v9  ;;  %2608 = vrot.lane.b32.xlu2 %v2519_v5, %s3678_s21 }
 0x1ad   : > { %6326 = vst [vmem:[#allocation88_spill] sm:$0xff] %v4956_v24  ;;  %v3470_v34 = vpop.eup %3469  ;;  %v933_v26 = vadd.f32 %v932_v45, %v4152_v49  ;;  %v4983_v32 = vadd.f32 %v1045_v53, %v4154_v50  ;;  %v1319_v52 = vsub.f32 1.0, %v1318_v59  ;;  %v3112_v30 = vmul.f32 -1.442695, %v885_v15 }
 0x1ae   : > { %6329 = vst [vmem:[#allocation89_spill] sm:$0xff] %v4960_v55  ;;  %v1589_v55 = vsub.f32 1.0, %v1588_v18  ;;  %v4985_v60 = vpop.eup %3471  ;;  %vm1592_vm15 = vweird.f32 %v4863_v35  ;;  %vm1593_vm0 = vweird.f32 %v4923_v21  ;;  %v1598_v6 = vand.u32 2147483648, %v4863_v35 }
 0x1af   : > { %6332 = vst [vmem:[#allocation90_spill] sm:$0xff] %v4964_v56  ;;  %v4990_v36 = vpop.eup %3473  ;;  %v1596_v45 = vand.u32 2147483647, %v4863_v35  ;;  %v1320_v5 = vmul.f32 %v4811_v22, %v1319_v52  ;;  %vm1323_vm1 = vweird.f32 %v4811_v22  ;;  %v4996_v53 = vadd.f32 1.0, %v3470_v34  ;;  %vm5009_vm2 = vmor %vm1592_vm15, %vm1593_vm0  ;;  %v935_v56 = vpop.f32.mrf.mxu2  ;;  %v6346_v52 = vld [vmem:[#allocation61_spill] sm:$0xff] }
 0x1b0   : > { %6335 = vst [vmem:[#allocation91_spill] sm:$0xff] %v4972_v10  ;;  %v1590_v9 = vmul.f32 %v4923_v21, %v1589_v55  ;;  %v3476_v59 = vpop.eup %3475  ;;  %v1326_v15 = vand.u32 2147483647, %v4729_v51  ;;  %v1328_v18 = vand.u32 2147483648, %v4729_v51  ;;  %v1573_v8 = vmul.f32 %v4839_v23, %v4782_v12 }
 0x1b1   : > { %6337 = vst [vmem:[#allocation53_spill] sm:$0xff] %v4976_v29  ;;  %v5002_v58 = vpop.eup %3477  ;;  %v3128_v10 = vmul.f32 -1.442695, %v933_v26  ;;  %v1321_v34 = vadd.f32 %v4811_v22, %v1320_v5  ;;  %vm1322_vm3 = vweird.f32 %v4729_v51  ;;  %3481 = vpow2.f32 %v3112_v30  ;;  %v887_v51 = vpop.f32.mrf.mxu0 }
 0x1b2   : > { %6338 = vst [vmem:[#allocation92_spill] sm:$0xff] %v4990_v36  ;;  %v1591_v55 = vadd.f32 %v4923_v21, %v1590_v9  ;;  %v3480_v13 = vpop.eup %3479  ;;  %v1599_v26 = vor.u32 1.1754944e-38, %v1598_v6  ;;  %vm1324_vm4 = vmor %vm1322_vm3, %vm1323_vm1  ;;  %v1329_v9 = vor.u32 1.1754944e-38, %v1328_v18  ;;  %v1574_v29 = vsub.f32 1.0, %v1573_v8 }
 0x1b3   : > { %6339 = vst [vmem:[#allocation93_spill] sm:$0xff] %v4996_v53  ;;  %vm1597_vm5 = vcmp.eq.f32.partialorder %v1596_v45, 8.507059e+37  ;;  %v1325_v5 = vsel %vm1324_vm4, %v4811_v22, %v1321_v34  ;;  %vm1327_vm6 = vcmp.eq.f32.partialorder %v1326_v15, 8.507059e+37  ;;  %vm1577_vm7 = vweird.f32 %v4782_v12  ;;  %v6347_v34 = vld [vmem:[#allocation64_spill] sm:$0xff] }
 0x1b4   : > { %v1595_v35 = vsel %vm5009_vm2, %v4923_v21, %v1591_v55  ;;  %v5021_v3 = vsel %vm1327_vm6, %v1329_v9, %v1325_v5  ;;  %v1575_v30 = vmul.f32 %v4839_v23, %v1574_v29  ;;  %v1333_v6 = vmul.f32 %v4897_v17, %v4806_v43  ;;  %v6345_v55 = vld [vmem:[#allocation56_spill] sm:$0xff] }
 0x1b5   : > { %v1600_v14 = vsel %vm1597_vm5, %v1599_v26, %v1595_v35  ;;  %3483 = vrcp.f32 %v4978_v54  ;;  %v5028_v18 = vadd.f32 1.0, %v3476_v59  ;;  %v2503_v22 = vmul.f32 %v4740_v37, %v5021_v3 }
 0x1b6   : > { %v5030_v21 = vmul.f32 %v2421_v38, %v1600_v14  ;;  %3485 = vtanh.f32 %v4983_v32  ;;  %v1576_v45 = vadd.f32 %v4839_v23, %v1575_v30  ;;  %vm1578_vm8 = vweird.f32 %v4839_v23 }
 0x1b7   : > { %3487 = vrcp.f32 %v4996_v53  ;;  %vm5038_vm9 = vmor %vm1577_vm7, %vm1578_vm8  ;;  %v1581_v59 = vand.u32 2147483647, %v4782_v12  ;;  %v1583_v38 = vand.u32 2147483648, %v4782_v12  ;;  %v936_v15 = vadd.f32 %v935_v56, %v4152_v49  ;;  %v3482_v8 = vpop.eup %3481  ;;  %2576 = vrot.lane.b32.xlu1 %v2503_v22, %s3678_s21  ;;  %v2419_v12 = vpop.permute.xlu1 %2418 }
 0x1b8   : > { %6342 = vst [vmem:[#allocation94_spill] sm:$0xff] %v5030_v21  ;;  %v5047_v37 = vmul.f32 %v4655_v7, %v6345_v55  ;;  %v5051_v26 = vmul.f32 %v6347_v34, %v6346_v52  ;;  %3489 = vpow2.f32 %v3128_v10  ;;  %v1580_v9 = vsel %vm5038_vm9, %v4839_v23, %v1576_v45 }
 0x1b9   : > { %v5057_v35 = vadd.f32 1.0, %v3480_v13  ;;  %v1584_v56 = vor.u32 1.1754944e-38, %v1583_v38  ;;  %v3129_v5 = vmul.f32 -1.442695, %v936_v15  ;;  %v888_v30 = vadd.f32 %v887_v51, %v4152_v49  ;;  %v938_v13 = vpop.f32.mrf.mxu2 }
 0x1ba   : > { %6348 = vst [vmem:[#allocation56_spill] sm:$0xff] %v5051_v26  ;;  %3491 = vrcp.f32 %v5028_v18  ;;  %v3160_v21 = vmul.f32 -1.442695, %v4983_v32  ;;  %vm1582_vm10 = vcmp.eq.f32.partialorder %v1581_v59, 8.507059e+37  ;;  %v1334_v34 = vsub.f32 1.0, %v1333_v6  ;;  %v1000_v59 = vpop.f32.mrf.mxu1  ;;  %v5073_v6 = vpop.permute.xlu2 %2426 }
 0x1bb   : > { %v5062_v10 = vpop.eup %3483  ;;  %v5064_v22 = vadd.f32 1.0, %v3482_v8  ;;  %v998_v29 = vadd.f32 %v997_v39, %v4154_v50  ;;  %v1585_v23 = vsel %vm1582_vm10, %v1584_v56, %v1580_v9  ;;  %3493 = vpow2.f32 %v3129_v5  ;;  %v890_v9 = vpop.f32.mrf.mxu0 }
 0x1bc   : > { %v5067_v45 = vpop.eup %3485  ;;  %v2521_v38 = vmul.f32 %v4851_v31, %v1600_v14  ;;  %v5070_v51 = vmul.f32 %v2419_v12, %v1585_v23  ;;  %v2520_v15 = vmul.f32 %v4772_v25, %v1585_v23  ;;  %v3113_v32 = vmul.f32 -1.442695, %v888_v30 }
 0x1bd   : > { %v5075_v52 = vpop.eup %3487  ;;  %3495 = vrcp.f32 %v5057_v35  ;;  %v1335_v39 = vmul.f32 %v4897_v17, %v1334_v34  ;;  %vm1338_vm11 = vweird.f32 %v4897_v17  ;;  %v1341_v8 = vand.u32 2147483647, %v4806_v43 }
 0x1be   : > { %6349 = vst [vmem:[#allocation95_spill] sm:$0xff] %v5070_v51  ;;  %v3490_v14 = vpop.eup %3489  ;;  %v1348_v31 = vmul.f32 %v4968_v63, %v4912_v61  ;;  %3497 = vpow2.f32 %v3160_v21  ;;  %2610 = vrot.lane.b32.xlu0 %v2520_v15, %s3678_s21  ;;  %v1343_v25 = vand.u32 2147483648, %v4806_v43  ;;  %v939_v12 = vadd.f32 %v938_v13, %v4152_v49  ;;  %v1048_v51 = vpop.f32.mrf.mxu3 }
 0x1bf   : > { %6350 = vst [vmem:[#allocation96_spill] sm:$0xff] %v5075_v52  ;;  %3499 = vrcp.f32 %v5064_v22  ;;  %v3144_v56 = vmul.f32 -1.442695, %v998_v29  ;;  %v1336_v34 = vadd.f32 %v4897_v17, %v1335_v39  ;;  %vm1337_vm12 = vweird.f32 %v4806_v43  ;;  %2612 = vrot.lane.b32.xlu1 %v2521_v38, %s3678_s21 }
 0x1c0   : > { %v5089_v5 = vpop.eup %3491  ;;  %3501 = vpow2.f32 %v3113_v32  ;;  %vm1339_vm13 = vmor %vm1337_vm12, %vm1338_vm11  ;;  %v1344_v21 = vor.u32 1.1754944e-38, %v1343_v25  ;;  %v3130_v30 = vmul.f32 -1.442695, %v939_v12  ;;  %v891_v23 = vadd.f32 %v890_v9, %v4152_v49 }
 0x1c1   : > { %v3494_v13 = vpop.eup %3493  ;;  %v5095_v15 = vadd.f32 1.0, %v3490_v14  ;;  %3503 = vtanh.f32 %v998_v29  ;;  %v1340_v39 = vsel %vm1339_vm13, %v4897_v17, %v1336_v34  ;;  %vm1342_vm14 = vcmp.eq.f32.partialorder %v1341_v8, 8.507059e+37 }
 0x1c2   : > { %v5098_v43 = vadd.f32 1.0, %v3494_v13  ;;  %v5100_v32 = vsel %vm1342_vm14, %v1344_v21, %v1340_v39  ;;  %3505 = vpow2.f32 %v3130_v30  ;;  %v3114_v26 = vmul.f32 -1.442695, %v891_v23  ;;  %v1003_v23 = vpop.f32.mrf.mxu1  ;;  %v2591_v13 = vpop.permute.xlu2 %2590 }
 0x1c3   : > { %v5102_v25 = vpop.eup %3495  ;;  %v5106_v38 = vmul.f32 %v4733_v28, %v4672_v2  ;;  %3507 = vpow2.f32 %v3144_v56  ;;  %v2504_v49 = vmul.f32 %v4823_v44, %v5100_v32  ;;  %v1349_v29 = vsub.f32 1.0, %v1348_v31 }
 0x1c4   : > { %v5110_v17 = vpop.eup %3497  ;;  %v5114_v8 = vmul.f32 %v4803_v27, %v4724_v62  ;;  %v5118_v9 = vmul.f32 %v4817_v19, %v4745_v11  ;;  %v5122_v14 = vmul.f32 %v4858_v0, %v4789_v41  ;;  %3509 = vrcp.f32 %v5098_v43 }
 0x1c5   : > { %6351 = vst [vmem:[#allocation97_spill] sm:$0xff] %v5110_v17  ;;  %v5125_v12 = vpop.eup %3499  ;;  %v5129_v44 = vmul.f32 %v4906_v4, %v4820_v46  ;;  %v5132_v31 = vadd.f32 %v1048_v51, %v4154_v50  ;;  %2578 = vrot.lane.b32.xlu2 %v2504_v49, %s3678_s21  ;;  %3511 = vpow2.f32 %v3114_v26  ;;  %v1350_v56 = vmul.f32 %v4968_v63, %v1349_v29 }
 0x1c6   : > { %6352 = vst [vmem:[#allocation98_spill] sm:$0xff] %v5122_v14  ;;  %v3502_v34 = vpop.eup %3501  ;;  %v5138_v21 = vmul.f32 %v4956_v24, %v4899_v33  ;;  %v1363_v30 = vmul.f32 %v5089_v5, %v5028_v18  ;;  %3513 = vrcp.f32 %v5095_v15  ;;  %vm1353_vm15 = vweird.f32 %v4968_v63 }
 0x1c7   : > { %6353 = vst [vmem:[#allocation99_spill] sm:$0xff] %v5129_v44  ;;  %v5144_v51 = vpop.eup %3503  ;;  %3515 = vtanh.f32 %v5132_v31  ;;  %v5148_v26 = vadd.f32 %v1000_v59, %v4154_v50  ;;  %v1351_v39 = vadd.f32 %v4968_v63, %v1350_v56  ;;  %vm1352_vm0 = vweird.f32 %v4912_v61 }
 0x1c8   : > { %6354 = vst [vmem:[#allocation100_spill] sm:$0xff] %v5138_v21  ;;  %v3506_v49 = vpop.eup %3505  ;;  %v5154_v29 = vmul.f32 %v5125_v12, %v5064_v22  ;;  %vm5156_vm1 = vmor %vm1352_vm0, %vm1353_vm15  ;;  %v1356_v24 = vand.u32 2147483647, %v4912_v61  ;;  %v1358_v21 = vand.u32 2147483648, %v4912_v61  ;;  %v1603_v59 = vmul.f32 %v5062_v10, %v4978_v54 }
 0x1c9   : > { %v5164_v17 = vpop.eup %3507  ;;  %v5166_v56 = vadd.f32 1.0, %v3502_v34  ;;  %v5169_v0 = vadd.f32 %v1003_v23, %v4154_v50  ;;  %v5172_v41 = vadd.f32 %v2591_v13, %v4716_v57  ;;  %v1355_v14 = vsel %vm5156_vm1, %v4968_v63, %v1351_v39 }
 0x1ca   : > { %6357 = vst [vmem:[#allocation101_spill] sm:$0xff] %v5164_v17  ;;  %v3510_v4 = vpop.eup %3509  ;;  %v1643_v61 = vand.u32 2147483648, %v5098_v43  ;;  %v5178_v46 = vadd.f32 1.0, %v3506_v49  ;;  %v1359_v44 = vor.u32 1.1754944e-38, %v1358_v21  ;;  %v1604_v62 = vsub.f32 1.0, %v1603_v59 }
 0x1cb   : > { %v3512_v17 = vpop.eup %3511  ;;  %v1633_v34 = vmul.f32 %v3510_v4, %v5098_v43  ;;  %vm1357_vm2 = vcmp.eq.f32.partialorder %v1356_v24, 8.507059e+37  ;;  %vm1607_vm3 = vweird.f32 %v4978_v54  ;;  %vm1608_vm4 = vweird.f32 %v5062_v10 }
 0x1cc   : > { %v5183_v57 = vpop.eup %3513  ;;  %v5185_v23 = vadd.f32 1.0, %v3512_v17  ;;  %v5187_v33 = vsel %vm1357_vm2, %v1359_v44, %v1355_v14  ;;  %v1605_v63 = vmul.f32 %v5062_v10, %v1604_v62  ;;  %v1611_v13 = vand.u32 2147483647, %v4978_v54  ;;  %v2423_v14 = vpop.permute.xlu0 %2422  ;;  %vm1609_vm7 = vmor %vm1607_vm3, %vm1608_vm4 }
 0x1cd   : > { %6358 = vst [vmem:[#allocation102_spill] sm:$0xff] %v5187_v33  ;;  %v5191_v21 = vpop.eup %3515  ;;  %v1634_v39 = vsub.f32 1.0, %v1633_v34  ;;  %vm1637_vm5 = vweird.f32 %v5098_v43  ;;  %v2505_v24 = vmul.f32 %v4914_v16, %v5187_v33  ;;  %v1613_v49 = vand.u32 2147483648, %v4978_v54 }
 0x1ce   : > { %3517 = vrcp.f32 %v5166_v56  ;;  %vm1638_vm6 = vweird.f32 %v3510_v4  ;;  %v1641_v17 = vand.u32 2147483647, %v5098_v43  ;;  %v1606_v62 = vadd.f32 %v5062_v10, %v1605_v63 }
 0x1cf   : > { %v1635_v44 = vmul.f32 %v3510_v4, %v1634_v39  ;;  %3519 = vrcp.f32 %v5185_v23  ;;  %2580 = vrot.lane.b32.xlu0 %v2505_v24, %s3678_s21  ;;  %v1614_v16 = vor.u32 1.1754944e-38, %v1613_v49  ;;  %v1364_v59 = vsub.f32 1.0, %v1363_v30  ;;  %vm1639_vm10 = vmor %vm1637_vm5, %vm1638_vm6  ;;  %v1051_v49 = vpop.f32.mrf.mxu3 }
 0x1d0   : > { %v1644_v34 = vor.u32 1.1754944e-38, %v1643_v61  ;;  %3521 = vrcp.f32 %v5178_v46  ;;  %v1610_v33 = vsel %vm1609_vm7, %v5062_v10, %v1606_v62  ;;  %vm1612_vm8 = vcmp.eq.f32.partialorder %v1611_v13, 8.507059e+37 }
 0x1d1   : > { %v1636_v27 = vadd.f32 %v3510_v4, %v1635_v44  ;;  %v1615_v63 = vsel %vm1612_vm8, %v1614_v16, %v1610_v33  ;;  %v1365_v39 = vmul.f32 %v5089_v5, %v1364_v59  ;;  %vm1368_vm9 = vweird.f32 %v5089_v5  ;;  %v2425_v59 = vpop.permute.xlu1 %2424 }
 0x1d2   : > { %v5213_v54 = vmul.f32 %v2423_v14, %v1615_v63  ;;  %v2522_v30 = vmul.f32 %v4985_v60, %v1615_v63  ;;  %v1371_v61 = vand.u32 2147483647, %v5028_v18  ;;  %v1373_v24 = vand.u32 2147483648, %v5028_v18 }
 0x1d3   : > { %v1640_v10 = vsel %vm1639_vm10, %v3510_v4, %v1636_v27  ;;  %vm1642_vm11 = vcmp.eq.f32.partialorder %v1641_v17, 8.507059e+37  ;;  %v1366_v33 = vadd.f32 %v5089_v5, %v1365_v39  ;;  %vm1367_vm12 = vweird.f32 %v5028_v18  ;;  %v2561_v17 = vpop.permute.xlu2 %2560 }
 0x1d4   : > { %6359 = vst [vmem:[#allocation103_spill] sm:$0xff] %v5213_v54  ;;  %v5220_v13 = vpop.eup %3517  ;;  %3523 = vtanh.f32 %v5148_v26  ;;  %v5223_v43 = vsel %vm1642_vm11, %v1644_v34, %v1640_v10  ;;  %2614 = vrot.lane.b32.xlu2 %v2522_v30, %s3678_s21  ;;  %vm1369_vm13 = vmor %vm1367_vm12, %vm1368_vm9  ;;  %v1374_v60 = vor.u32 1.1754944e-38, %v1373_v24  ;;  %v1618_v14 = vmul.f32 %v5183_v57, %v5095_v15  ;;  %v5249_v34 = vpop.permute.xlu0 %2428  ;;  %v6363_v24 = vld [vmem:[#allocation26_spill] sm:$0xff]  ;;  %v6364_v10 = vld [vmem:[#allocation20_spill] sm:$0xff] }
 0x1d5   : > { %v5228_v27 = vpop.eup %3519  ;;  %v5232_v4 = vmul.f32 %v5073_v6, %v5223_v43  ;;  %3525 = vtanh.f32 %v5169_v0  ;;  %v1370_v18 = vsel %vm1369_vm13, %v5089_v5, %v1366_v33  ;;  %vm1372_vm14 = vcmp.eq.f32.partialorder %v1371_v61, 8.507059e+37 }
 0x1d6   : > { %v5236_v62 = vpop.eup %3521  ;;  %v5240_v44 = vmul.f32 %v4990_v36, %v4926_v20  ;;  %v5244_v16 = vmul.f32 %v5075_v52, %v4996_v53  ;;  %3527 = vtanh.f32 %v5172_v41  ;;  %v5247_v6 = vsel %vm1372_vm14, %v1374_v60, %v1370_v18 }
 0x1d7   : > { %6360 = vst [vmem:[#allocation104_spill] sm:$0xff] %v5232_v4  ;;  %v1393_v5 = vmul.f32 %v5220_v13, %v5166_v56  ;;  %v2506_v63 = vmul.f32 %v5002_v58, %v5247_v6  ;;  %v5256_v39 = vadd.f32 %v1051_v49, %v4154_v50  ;;  %v1619_v30 = vsub.f32 1.0, %v1618_v14 }
 0x1d8   : > { %6361 = vst [vmem:[#allocation105_spill] sm:$0xff] %v5244_v16  ;;  %v5260_v61 = vmul.f32 %v5228_v27, %v5185_v23  ;;  %v2463_v33 = vmul.f32 %v6364_v10, %v6363_v24  ;;  %v1626_v60 = vand.u32 2147483647, %v5095_v15  ;;  %v1628_v18 = vand.u32 2147483648, %v5095_v15 }
 0x1d9   : > { %6362 = vst [vmem:[#allocation106_spill] sm:$0xff] %v5247_v6  ;;  %2582 = vrot.lane.b32.xlu1 %v2506_v63, %s3678_s21  ;;  %v1620_v4 = vmul.f32 %v5183_v57, %v1619_v30  ;;  %vm1622_vm15 = vweird.f32 %v5095_v15  ;;  %vm1623_vm0 = vweird.f32 %v5183_v57  ;;  %v1379_v50 = vsub.f32 1.0, %v5154_v29  ;;  %v2559_v36 = vpop.permute.xlu1 %2558 }
 0x1da   : > { %v5271_v58 = vpop.eup %3523  ;;  %3529 = vtanh.f32 %v5256_v39  ;;  %vm1382_vm1 = vweird.f32 %v5064_v22  ;;  %vm1383_vm2 = vweird.f32 %v5125_v12  ;;  %v1386_v49 = vand.u32 2147483647, %v5064_v22  ;;  %vm1624_vm3 = vmor %vm1622_vm15, %vm1623_vm0 }
 0x1db   : > { %v5277_v14 = vpop.eup %3525  ;;  %v1621_v63 = vadd.f32 %v5183_v57, %v1620_v4  ;;  %v1380_v15 = vmul.f32 %v5125_v12, %v1379_v50  ;;  %v1388_v30 = vand.u32 2147483648, %v5064_v22  ;;  %v1648_v29 = vmul.f32 %v5236_v62, %v5178_v46  ;;  %vm1384_vm7 = vmor %vm1382_vm1, %vm1383_vm2  ;;  %v2597_v20 = vpop.permute.xlu2 %2596 }
 0x1dc   : > { %v5284_v24 = vpop.eup %3527  ;;  %vm1627_vm4 = vcmp.eq.f32.partialorder %v1626_v60, 8.507059e+37  ;;  %v1629_v10 = vor.u32 1.1754944e-38, %v1628_v18  ;;  %vm1652_vm5 = vweird.f32 %v5178_v46  ;;  %v1656_v6 = vand.u32 2147483647, %v5178_v46 }
 0x1dd   : > { %v1625_v53 = vsel %vm1624_vm3, %v5183_v57, %v1621_v63  ;;  %v1381_v4 = vadd.f32 %v5125_v12, %v1380_v15  ;;  %v1649_v52 = vsub.f32 1.0, %v1648_v29  ;;  %vm1653_vm6 = vweird.f32 %v5236_v62 }
 0x1de   : > { %v5291_v50 = vsel %vm1627_vm4, %v1629_v10, %v1625_v53  ;;  %v1389_v60 = vor.u32 1.1754944e-38, %v1388_v30  ;;  %v1658_v18 = vand.u32 2147483648, %v5178_v46  ;;  %v1394_v16 = vsub.f32 1.0, %v1393_v5  ;;  %v2593_v30 = vpop.permute.xlu0 %2592  ;;  %vm5316_vm10 = vmor %vm1652_vm5, %vm1653_vm6  ;;  %v6372_v10 = vld [vmem:[#allocation11_spill] sm:$0xff] }
 0x1df   : > { %v2655_v54 = vadd.f32 %v2561_v17, %v2463_v33  ;;  %v5299_v57 = vmul.f32 %v2425_v59, %v5291_v50  ;;  %v1385_v63 = vsel %vm1384_vm7, %v5125_v12, %v1381_v4  ;;  %vm1387_vm8 = vcmp.eq.f32.partialorder %v1386_v49, 8.507059e+37  ;;  %v6371_v49 = vld [vmem:[#allocation14_spill] sm:$0xff] }
 0x1e0   : > { %v3530_v53 = vpop.eup %3529  ;;  %v5302_v15 = vsel %vm1387_vm8, %v1389_v60, %v1385_v63  ;;  %v1650_v29 = vmul.f32 %v5236_v62, %v1649_v52  ;;  %vm5305_vm9 = vcmp.eq.f32.partialorder %v1656_v6, 8.507059e+37  ;;  %v1395_v5 = vmul.f32 %v5220_v13, %v1394_v16 }
 0x1e1   : > { %v2507_v17 = vmul.f32 %v5144_v51, %v5302_v15  ;;  %v1659_v59 = vor.u32 1.1754944e-38, %v1658_v18  ;;  %vm1397_vm11 = vweird.f32 %v5166_v56  ;;  %vm1398_vm12 = vweird.f32 %v5220_v13 }
 0x1e2   : > { %v1651_v52 = vadd.f32 %v5236_v62, %v1650_v29  ;;  %v1396_v16 = vadd.f32 %v5220_v13, %v1395_v5  ;;  %v1401_v6 = vand.u32 2147483647, %v5166_v56  ;;  %v1403_v51 = vand.u32 2147483648, %v5166_v56  ;;  %vm5327_vm13 = vmor %vm1397_vm11, %vm1398_vm12 }
 0x1e3   : > { %2584 = vrot.lane.b32.xlu2 %v2507_v17, %s3678_s21  ;;  %v5332_v33 = vadd.f32 %v2597_v20, %v4935_v40  ;;  %v2462_v4 = vmul.f32 %v6372_v10, %v6371_v49  ;;  %v2671_v60 = vadd.f32 %v2593_v30, %v4801_v42  ;;  %v1409_v18 = vsub.f32 1.0, %v5260_v61  ;;  %v2595_v30 = vpop.permute.xlu1 %2594 }
 0x1e4   : > { %3531 = vtanh.f32 %v2655_v54  ;;  %v1655_v56 = vsel %vm5316_vm10, %v5236_v62, %v1651_v52  ;;  %v1400_v63 = vsel %vm5327_vm13, %v5220_v13, %v1396_v16  ;;  %v1404_v29 = vor.u32 1.1754944e-38, %v1403_v51  ;;  %v2567_v13 = vpop.permute.xlu2 %2566 }
 0x1e5   : > { %v1660_v40 = vsel %vm5305_vm9, %v1659_v59, %v1655_v56  ;;  %vm1402_vm14 = vcmp.eq.f32.partialorder %v1401_v6, 8.507059e+37  ;;  %v2654_v20 = vadd.f32 %v2559_v36, %v2462_v4  ;;  %v5346_v5 = vadd.f32 %v2671_v60, %v2655_v54  ;;  %v6373_v59 = vld [vmem:[#allocation60_spill] sm:$0xff]  ;;  %v6377_v4 = vld [vmem:[#allocation7_spill] sm:$0xff] }
 0x1e6   : > { %v5350_v42 = vmul.f32 %v5102_v25, %v5057_v35  ;;  %v5353_v61 = vmul.f32 %v5249_v34, %v1660_v40  ;;  %v5355_v62 = vsel %vm1402_vm14, %v1404_v29, %v1400_v63  ;;  %3533 = vtanh.f32 %v5332_v33 }
 0x1e7   : > { %v2525_v17 = vmul.f32 %v3530_v53, %v1660_v40  ;;  %v2508_v22 = vmul.f32 %v5271_v58, %v5355_v62  ;;  %v5361_v36 = vadd.f32 %v5172_v41, %v2654_v20  ;;  %v1410_v54 = vmul.f32 %v5228_v27, %v1409_v18  ;;  %v6374_v58 = vld [vmem:[#allocation27_spill] sm:$0xff]  ;;  %v6378_v18 = vld [vmem:[#allocation65_spill] sm:$0xff] }
 0x1e8   : > { %3535 = vtanh.f32 %v2671_v60  ;;  %vm1412_vm15 = vweird.f32 %v5185_v23  ;;  %vm1413_vm0 = vweird.f32 %v5228_v27  ;;  %v1416_v34 = vand.u32 2147483647, %v5185_v23 }
 0x1e9   : > { %2586 = vrot.lane.b32.xlu0 %v2508_v22, %s3678_s21  ;;  %v1411_v12 = vadd.f32 %v5228_v27, %v1410_v54  ;;  %v1418_v53 = vand.u32 2147483648, %v5185_v23  ;;  %v2466_v52 = vmul.f32 %v6374_v58, %v6373_v59  ;;  %v2672_v41 = vadd.f32 %v2595_v30, %v4881_v48  ;;  %vm5375_vm1 = vmor %vm1412_vm15, %vm1413_vm0  ;;  %v6379_v30 = vld [vmem:[#allocation6_spill] sm:$0xff]  ;;  %v6382_v59 = vld [vmem:[#allocation29_spill] sm:$0xff] }
 0x1ea   : > { %v5373_v16 = vpop.eup %3531  ;;  %3537 = vtanh.f32 %v2654_v20  ;;  %vm1417_vm2 = vcmp.eq.f32.partialorder %v1416_v34, 8.507059e+37  ;;  %v1824_v51 = vsub.f32 1.0, %v4702_v1  ;;  %vm1828_vm3 = vweird.f32 %v4206_v47 }
 0x1eb   : > { %2620 = vrot.lane.b32.xlu2 %v2525_v17, %s3678_s21  ;;  %v1415_v23 = vsel %vm5375_vm1, %v5228_v27, %v1411_v12  ;;  %v1419_v46 = vor.u32 1.1754944e-38, %v1418_v53  ;;  %v5385_v48 = vadd.f32 %v2567_v13, %v2466_v52  ;;  %3539 = vtanh.f32 %v2672_v41  ;;  %v2563_v27 = vpop.permute.xlu0 %2562  ;;  %v6380_v17 = vld [vmem:[#allocation8_spill] sm:$0xff]  ;;  %v6381_v53 = vld [vmem:[#allocation37_spill] sm:$0xff]  ;;  %v6383_v52 = vld [vmem:[#allocation70_spill] sm:$0xff] }
 0x1ec   : > { %v5387_v49 = vpop.eup %3533  ;;  %v1825_v10 = vmul.f32 %v4206_v47, %v1824_v51  ;;  %v1831_v60 = vand.u32 2147483647, %v6377_v4  ;;  %v1833_v1 = vand.u32 2147483648, %v6377_v4  ;;  %v2064_v56 = vsub.f32 1.0, %v6378_v18  ;;  %v2603_v22 = vpop.permute.xlu2 %2602  ;;  %v6386_v18 = vld [vmem:[#allocation15_spill] sm:$0xff] }
 0x1ed   : > { %v2523_v63 = vmul.f32 %v5067_v45, %v5291_v50  ;;  %v5395_v29 = vsel %vm1417_vm2, %v1419_v46, %v1415_v23  ;;  %3541 = vtanh.f32 %v5385_v48  ;;  %vm1827_vm4 = vweird.f32 %v6377_v4 }
 0x1ee   : > { %v5399_v40 = vpop.eup %3535  ;;  %v2509_v20 = vmul.f32 %v5277_v14, %v5395_v29  ;;  %v1826_v13 = vadd.f32 %v4206_v47, %v1825_v10  ;;  %vm2067_vm5 = vweird.f32 %v6379_v30  ;;  %vm2068_vm6 = vweird.f32 %v6380_v17  ;;  %vm1829_vm7 = vmor %vm1827_vm4, %vm1828_vm3  ;;  %v6384_v10 = vld [vmem:[#allocation67_spill] sm:$0xff] }
 0x1ef   : > { %v1834_v45 = vor.u32 1.1754944e-38, %v1833_v1  ;;  %v2065_v50 = vmul.f32 %v6380_v17, %v2064_v56  ;;  %v2071_v54 = vand.u32 2147483647, %v6379_v30  ;;  %v2073_v34 = vand.u32 2147483648, %v6379_v30  ;;  %v6385_v1 = vld [vmem:[#allocation10_spill] sm:$0xff]  ;;  %vm2069_vm10 = vmor %vm2067_vm5, %vm2068_vm6 }
 0x1f0   : > { %v3538_v12 = vpop.eup %3537  ;;  %2588 = vrot.lane.b32.xlu1 %v2509_v20, %s3678_s21  ;;  %v1830_v14 = vsel %vm1829_vm7, %v4206_v47, %v1826_v13  ;;  %vm1832_vm8 = vcmp.eq.f32.partialorder %v1831_v60, 8.507059e+37  ;;  %v2464_v58 = vmul.f32 %v6382_v59, %v6381_v53  ;;  %v1839_v6 = vsub.f32 1.0, %v6383_v52 }
 0x1f1   : > { %v5416_v51 = vpop.eup %3539  ;;  %2616 = vrot.lane.b32.xlu0 %v2523_v63, %s3678_s21  ;;  %v1835_v23 = vsel %vm1832_vm8, %v1834_v45, %v1830_v14  ;;  %v2066_v46 = vadd.f32 %v6380_v17, %v2065_v50  ;;  %v5421_v4 = vadd.f32 %v2603_v22, %v6384_v10  ;;  %vm1842_vm9 = vweird.f32 %v6385_v1  ;;  %v6393_v10 = vld [vmem:[#allocation18_spill] sm:$0xff] }
 0x1f2   : > { %vm2072_vm11 = vcmp.eq.f32.partialorder %v2071_v54, 8.507059e+37  ;;  %v2074_v47 = vor.u32 1.1754944e-38, %v2073_v34  ;;  %v2656_v60 = vadd.f32 %v2563_v27, %v2464_v58  ;;  %v1840_v56 = vmul.f32 %v6386_v18, %v1839_v6  ;;  %v6391_v58 = vld [vmem:[#allocation12_spill] sm:$0xff] }
 0x1f3   : > { %v5429_v20 = vpop.eup %3541  ;;  %v2070_v63 = vsel %vm2069_vm10, %v6380_v17, %v2066_v46  ;;  %v2718_v13 = vmul.f32 %v3538_v12, %v1835_v23  ;;  %vm1843_vm12 = vweird.f32 %v6386_v18  ;;  %v1848_v22 = vand.u32 2147483648, %v6385_v1  ;;  %v6389_v12 = vld [vmem:[#allocation69_spill] sm:$0xff]  ;;  %v2599_v14 = vpop.permute.xlu0 %2598  ;;  %v6392_v46 = vld [vmem:[#allocation48_spill] sm:$0xff] }
 0x1f4   : > { %v2075_v45 = vsel %vm2072_vm11, %v2074_v47, %v2070_v63  ;;  %v5434_v50 = vadd.f32 %v2672_v41, %v2656_v60  ;;  %v1841_v30 = vadd.f32 %v6386_v18, %v1840_v56  ;;  %v1846_v54 = vand.u32 2147483647, %v6385_v1  ;;  %vm5444_vm13 = vmor %vm1842_vm9, %vm1843_vm12  ;;  %v2565_v23 = vpop.permute.xlu1 %2564  ;;  %v6394_v47 = vld [vmem:[#allocation53_spill] sm:$0xff]  ;;  %v6395_v63 = vld [vmem:[#allocation76_spill] sm:$0xff] }
 0x1f5   : > { %v2524_v27 = vmul.f32 %v5191_v21, %v5223_v43  ;;  %v2734_v34 = vmul.f32 %v5284_v24, %v2075_v45  ;;  %3543 = vtanh.f32 %v5421_v4  ;;  %v2079_v41 = vsub.f32 1.0, %v6389_v12  ;;  %v6390_v21 = vld [vmem:[#allocation9_spill] sm:$0xff] }
 0x1f6   : > { %3545 = vtanh.f32 %v2656_v60  ;;  %v1845_v53 = vsel %vm5444_vm13, %v6386_v18, %v1841_v30  ;;  %v1849_v59 = vor.u32 1.1754944e-38, %v1848_v22  ;;  %v2086_v43 = vand.u32 2147483647, %v6390_v21  ;;  %v6396_v17 = vld [vmem:[#allocation21_spill] sm:$0xff] }
 0x1f7   : > { %v2750_v24 = vadd.f32 %v2734_v34, %v2718_v13  ;;  %v2080_v52 = vmul.f32 %v6391_v58, %v2079_v41  ;;  %vm2083_vm14 = vweird.f32 %v6391_v58  ;;  %v2088_v6 = vand.u32 2147483648, %v6390_v21  ;;  %v6397_v41 = vld [vmem:[#allocation16_spill] sm:$0xff] }
 0x1f8   : > { %2618 = vrot.lane.b32.xlu1 %v2524_v27, %s3678_s21  ;;  %vm1847_vm15 = vcmp.eq.f32.partialorder %v1846_v54, 8.507059e+37  ;;  %vm2082_vm0 = vweird.f32 %v6390_v21  ;;  %v2465_v1 = vmul.f32 %v6393_v10, %v6392_v46  ;;  %v2674_v60 = vadd.f32 %v2599_v14, %v6394_v47 }
 0x1f9   : > { %2798 = vrot.lane.b32.xlu0 %v2750_v24, %s3678_s21  ;;  %v1850_v18 = vsel %vm1847_vm15, %v1849_v59, %v1845_v53  ;;  %v2081_v56 = vadd.f32 %v6391_v58, %v2080_v52  ;;  %vm2087_vm1 = vcmp.eq.f32.partialorder %v2086_v43, 8.507059e+37  ;;  %v1854_v13 = vsub.f32 1.0, %v6395_v63  ;;  %vm2084_vm2 = vmor %vm2082_vm0, %vm2083_vm14  ;;  %v6398_v43 = vld [vmem:[#allocation71_spill] sm:$0xff]  ;;  %v6403_v63 = vld [vmem:[#allocation78_spill] sm:$0xff] }
 0x1fa   : > { %v2089_v22 = vor.u32 1.1754944e-38, %v2088_v6  ;;  %v2719_v45 = vmul.f32 %v5373_v16, %v1850_v18  ;;  %v2657_v30 = vadd.f32 %v2565_v23, %v2465_v1  ;;  %v5466_v54 = vadd.f32 %v2674_v60, %v5385_v48  ;;  %v6401_v6 = vld [vmem:[#allocation17_spill] sm:$0xff]  ;;  %v6408_v52 = vld [vmem:[#allocation22_spill] sm:$0xff] }
 0x1fb   : > { %v5468_v27 = vpop.eup %3543  ;;  %v2085_v34 = vsel %vm2084_vm2, %v6391_v58, %v2081_v56  ;;  %v1855_v12 = vmul.f32 %v6396_v17, %v1854_v13  ;;  %vm1858_vm3 = vweird.f32 %v6396_v17  ;;  %v1863_v14 = vand.u32 2147483648, %v6397_v41  ;;  %v6404_v13 = vld [vmem:[#allocation34_spill] sm:$0xff] }
 0x1fc   : > { %v3546_v53 = vpop.eup %3545  ;;  %v2090_v59 = vsel %vm2087_vm1, %v2089_v22, %v2085_v34  ;;  %v5475_v21 = vadd.f32 %v5332_v33, %v2657_v30  ;;  %v1861_v16 = vand.u32 2147483647, %v6397_v41  ;;  %v2094_v48 = vsub.f32 1.0, %v6398_v43  ;;  %v6402_v33 = vld [vmem:[#allocation13_spill] sm:$0xff]  ;;  %v2601_v18 = vpop.permute.xlu1 %2600  ;;  %v6405_v34 = vld [vmem:[#allocation80_spill] sm:$0xff] }
 0x1fd   : > { %v2735_v24 = vmul.f32 %v5399_v40, %v2090_v59  ;;  %3547 = vtanh.f32 %v2674_v60  ;;  %v1856_v58 = vadd.f32 %v6396_v17, %v1855_v12  ;;  %vm1857_vm4 = vweird.f32 %v6397_v41  ;;  %v2573_v60 = vpop.permute.xlu2 %2572  ;;  %v6406_v59 = vld [vmem:[#allocation62_spill] sm:$0xff] }
 0x1fe   : > { %3549 = vtanh.f32 %v2657_v30  ;;  %vm5482_vm5 = vmor %vm1857_vm4, %vm1858_vm3  ;;  %v2095_v23 = vmul.f32 %v6401_v6, %v2094_v48  ;;  %vm2098_vm6 = vweird.f32 %v6401_v6  ;;  %v2101_v46 = vand.u32 2147483647, %v6402_v33 }
 0x1ff   : > { %v2751_v10 = vadd.f32 %v2735_v24, %v2719_v45  ;;  %v1860_v40 = vsel %vm5482_vm5, %v6396_v17, %v1856_v58  ;;  %v1864_v1 = vor.u32 1.1754944e-38, %v1863_v14  ;;  %v2103_v47 = vand.u32 2147483648, %v6402_v33  ;;  %v6407_v24 = vld [vmem:[#allocation28_spill] sm:$0xff] }
 0x200   : > { %vm1862_vm7 = vcmp.eq.f32.partialorder %v1861_v16, 8.507059e+37  ;;  %v2096_v56 = vadd.f32 %v6401_v6, %v2095_v23  ;;  %vm2097_vm8 = vweird.f32 %v6402_v33  ;;  %v2469_v22 = vmul.f32 %v6404_v13, %v6403_v63 }
 0x201   : > { %2800 = vrot.lane.b32.xlu1 %v2751_v10, %s3678_s21  ;;  %v1865_v45 = vsel %vm1862_vm7, %v1864_v1, %v1860_v40  ;;  %vm2099_vm9 = vmor %vm2097_vm8, %vm2098_vm6  ;;  %vm2102_vm10 = vcmp.eq.f32.partialorder %v2101_v46, 8.507059e+37  ;;  %v2104_v30 = vor.u32 1.1754944e-38, %v2103_v47  ;;  %v1869_v17 = vsub.f32 1.0, %v6405_v34  ;;  %v6410_v1 = vld [vmem:[#allocation19_spill] sm:$0xff]  ;;  %v6411_v47 = vld [vmem:[#allocation24_spill] sm:$0xff] }
 0x202   : > { %v2100_v12 = vsel %vm2099_vm9, %v6401_v6, %v2096_v56  ;;  %v2720_v41 = vmul.f32 %v3546_v53, %v1865_v45  ;;  %v5500_v14 = vadd.f32 %v2573_v60, %v2469_v22  ;;  %v2675_v16 = vadd.f32 %v2601_v18, %v6406_v59  ;;  %v6409_v6 = vld [vmem:[#allocation77_spill] sm:$0xff]  ;;  %v2569_v18 = vpop.permute.xlu0 %2568  ;;  %v6412_v45 = vld [vmem:[#allocation63_spill] sm:$0xff] }
 0x203   : > { %v5503_v43 = vpop.eup %3547  ;;  %v2105_v48 = vsel %vm2102_vm10, %v2104_v30, %v2100_v12  ;;  %v1870_v58 = vmul.f32 %v6407_v24, %v1869_v17  ;;  %vm1873_vm11 = vweird.f32 %v6407_v24  ;;  %v1876_v23 = vand.u32 2147483647, %v6408_v52  ;;  %v6413_v30 = vld [vmem:[#allocation36_spill] sm:$0xff]  ;;  %v6414_v17 = vld [vmem:[#allocation58_spill] sm:$0xff] }
 0x204   : > { %v3550_v33 = vpop.eup %3549  ;;  %v2736_v46 = vmul.f32 %v5416_v51, %v2105_v48  ;;  %vm1872_vm12 = vweird.f32 %v6408_v52  ;;  %v1878_v53 = vand.u32 2147483648, %v6408_v52  ;;  %v2109_v10 = vsub.f32 1.0, %v6409_v6  ;;  %v6415_v52 = vld [vmem:[#allocation35_spill] sm:$0xff] }
 0x205   : > { %v1871_v40 = vadd.f32 %v6407_v24, %v1870_v58  ;;  %vm2112_vm13 = vweird.f32 %v6410_v1  ;;  %vm2113_vm14 = vweird.f32 %v6411_v47  ;;  %v2116_v60 = vand.u32 2147483647, %v6410_v1  ;;  %vm1874_vm15 = vmor %vm1872_vm12, %vm1873_vm11 }
 0x206   : > { %v2752_v56 = vadd.f32 %v2736_v46, %v2720_v41  ;;  %v1879_v63 = vor.u32 1.1754944e-38, %v1878_v53  ;;  %v2110_v51 = vmul.f32 %v6411_v47, %v2109_v10  ;;  %v2118_v13 = vand.u32 2147483648, %v6410_v1  ;;  %vm2114_vm2 = vmor %vm2112_vm13, %vm2113_vm14  ;;  %v6416_v53 = vld [vmem:[#allocation30_spill] sm:$0xff] }
 0x207   : > { %v1875_v22 = vsel %vm1874_vm15, %v6407_v24, %v1871_v40  ;;  %vm1877_vm0 = vcmp.eq.f32.partialorder %v1876_v23, 8.507059e+37  ;;  %v2467_v34 = vmul.f32 %v6413_v30, %v6412_v45  ;;  %v1884_v12 = vsub.f32 1.0, %v6414_v17  ;;  %v6417_v40 = vld [vmem:[#allocation81_spill] sm:$0xff] }
 0x208   : > { %2802 = vrot.lane.b32.xlu2 %v2752_v56, %s3678_s21  ;;  %v1880_v59 = vsel %vm1877_vm0, %v1879_v63, %v1875_v22  ;;  %v2111_v48 = vadd.f32 %v6411_v47, %v2110_v51  ;;  %vm2117_vm1 = vcmp.eq.f32.partialorder %v2116_v60, 8.507059e+37  ;;  %v2119_v41 = vor.u32 1.1754944e-38, %v2118_v13  ;;  %v6420_v51 = vld [vmem:[#allocation31_spill] sm:$0xff]  ;;  %v2609_v22 = vpop.permute.xlu2 %2608  ;;  %v6421_v30 = vld [vmem:[#allocation25_spill] sm:$0xff] }
 0x209   : > { %v2721_v58 = vmul.f32 %v3550_v33, %v1880_v59  ;;  %v2659_v24 = vadd.f32 %v2569_v18, %v2467_v34  ;;  %v1885_v23 = vmul.f32 %v6415_v52, %v1884_v12  ;;  %vm1888_vm3 = vweird.f32 %v6415_v52  ;;  %v2571_v34 = vpop.permute.xlu1 %2570 }
 0x20a   : > { %v2115_v46 = vsel %vm2114_vm2, %v6411_v47, %v2111_v48  ;;  %v1891_v6 = vand.u32 2147483647, %v6416_v53  ;;  %v1893_v10 = vand.u32 2147483648, %v6416_v53  ;;  %v2124_v60 = vsub.f32 1.0, %v6417_v40 }
 0x20b   : > { %v2120_v56 = vsel %vm2117_vm1, %v2119_v41, %v2115_v46  ;;  %v5534_v63 = vadd.f32 %v2675_v16, %v2659_v24  ;;  %v1886_v1 = vadd.f32 %v6415_v52, %v1885_v23  ;;  %vm1887_vm4 = vweird.f32 %v6416_v53  ;;  %v6422_v41 = vld [vmem:[#allocation87_spill] sm:$0xff] }
 0x20c   : > { %3551 = vtanh.f32 %v2675_v16  ;;  %v2737_v33 = vmul.f32 %v5387_v49, %v2120_v56  ;;  %vm5539_vm5 = vmor %vm1887_vm4, %vm1888_vm3  ;;  %v1894_v47 = vor.u32 1.1754944e-38, %v1893_v10  ;;  %v2125_v13 = vmul.f32 %v6420_v51, %v2124_v60  ;;  %v2605_v49 = vpop.permute.xlu0 %2604  ;;  %v6424_v46 = vld [vmem:[#allocation23_spill] sm:$0xff]  ;;  %v6426_v60 = vld [vmem:[#allocation42_spill] sm:$0xff] }
 0x20d   : > { %v1890_v45 = vsel %vm5539_vm5, %v6415_v52, %v1886_v1  ;;  %vm2127_vm6 = vweird.f32 %v6421_v30  ;;  %vm2128_vm7 = vweird.f32 %v6420_v51  ;;  %v2131_v16 = vand.u32 2147483647, %v6421_v30  ;;  %v6423_v52 = vld [vmem:[#allocation68_spill] sm:$0xff] }
 0x20e   : > { %v2753_v17 = vadd.f32 %v2737_v33, %v2721_v58  ;;  %vm1892_vm8 = vcmp.eq.f32.partialorder %v1891_v6, 8.507059e+37  ;;  %v2126_v12 = vadd.f32 %v6420_v51, %v2125_v13  ;;  %v2133_v59 = vand.u32 2147483648, %v6421_v30  ;;  %vm2129_vm9 = vmor %vm2127_vm6, %vm2128_vm7  ;;  %v6425_v58 = vld [vmem:[#allocation73_spill] sm:$0xff]  ;;  %v6428_v30 = vld [vmem:[#allocation38_spill] sm:$0xff] }
 0x20f   : > { %3553 = vtanh.f32 %v2659_v24  ;;  %v1895_v48 = vsel %vm1892_vm8, %v1894_v47, %v1890_v45  ;;  %v5553_v23 = vadd.f32 %v2609_v22, %v6422_v41  ;;  %v2468_v53 = vmul.f32 %v6424_v46, %v6423_v52  ;;  %v6427_v13 = vld [vmem:[#allocation45_spill] sm:$0xff] }
 0x210   : > { %2804 = vrot.lane.b32.xlu0 %v2753_v17, %s3678_s21  ;;  %v2130_v10 = vsel %vm2129_vm9, %v6420_v51, %v2126_v12  ;;  %v2134_v40 = vor.u32 1.1754944e-38, %v2133_v59  ;;  %v5560_v6 = vadd.f32 %v2605_v49, %v6425_v58  ;;  %v1899_v56 = vsub.f32 1.0, %v6426_v60  ;;  %v6434_v60 = vld [vmem:[#allocation90_spill] sm:$0xff] }
 0x211   : > { %3555 = vtanh.f32 %v5500_v14  ;;  %vm2132_vm10 = vcmp.eq.f32.partialorder %v2131_v16, 8.507059e+37  ;;  %v2722_v24 = vmul.f32 %v5429_v20, %v1895_v48  ;;  %v2660_v1 = vadd.f32 %v2571_v34, %v2468_v53  ;;  %v6429_v34 = vld [vmem:[#allocation82_spill] sm:$0xff] }
 0x212   : > { %v3552_v33 = vpop.eup %3551  ;;  %v2135_v18 = vsel %vm2132_vm10, %v2134_v40, %v2130_v10  ;;  %v5567_v47 = vadd.f32 %v5560_v6, %v5500_v14  ;;  %v1900_v51 = vmul.f32 %v6427_v13, %v1899_v56  ;;  %vm1903_vm11 = vweird.f32 %v6427_v13  ;;  %v2607_v41 = vpop.permute.xlu1 %2606 }
 0x213   : > { %v2738_v22 = vmul.f32 %v5503_v43, %v2135_v18  ;;  %3557 = vtanh.f32 %v5553_v23  ;;  %v5574_v45 = vadd.f32 %v5421_v4, %v2660_v1  ;;  %v1906_v20 = vand.u32 2147483647, %v6428_v30  ;;  %v6432_v43 = vld [vmem:[#allocation33_spill] sm:$0xff]  ;;  %v6433_v4 = vld [vmem:[#allocation40_spill] sm:$0xff] }
 0x214   : > { %v1901_v16 = vadd.f32 %v6427_v13, %v1900_v51  ;;  %vm1902_vm12 = vweird.f32 %v6428_v30  ;;  %v1908_v14 = vand.u32 2147483648, %v6428_v30  ;;  %v2139_v49 = vsub.f32 1.0, %v6429_v34 }
 0x215   : > { %v3554_v17 = vpop.eup %3553  ;;  %v2754_v12 = vadd.f32 %v2738_v22, %v2722_v24  ;;  %vm5581_vm13 = vmor %vm1902_vm12, %vm1903_vm11  ;;  %vm2142_vm14 = vweird.f32 %v6432_v43  ;;  %vm2143_vm15 = vweird.f32 %v6433_v4  ;;  %v2146_v48 = vand.u32 2147483647, %v6432_v43 }
 0x216   : > { %v1905_v52 = vsel %vm5581_vm13, %v6427_v13, %v1901_v16  ;;  %v1909_v46 = vor.u32 1.1754944e-38, %v1908_v14  ;;  %v2140_v53 = vmul.f32 %v6433_v4, %v2139_v49  ;;  %v2148_v10 = vand.u32 2147483648, %v6432_v43  ;;  %v6435_v13 = vld [vmem:[#allocation55_spill] sm:$0xff]  ;;  %vm2144_vm2 = vmor %vm2142_vm14, %vm2143_vm15  ;;  %v6436_v16 = vld [vmem:[#allocation54_spill] sm:$0xff] }
 0x217   : > { %v5593_v40 = vpop.eup %3555  ;;  %v5596_v58 = vmul.f32 -1.442695, %v5132_v31  ;;  %2806 = vrot.lane.b32.xlu1 %v2754_v12, %s3678_s21  ;;  %3559 = vtanh.f32 %v2660_v1  ;;  %vm1907_vm0 = vcmp.eq.f32.partialorder %v1906_v20, 8.507059e+37  ;;  %v1914_v56 = vsub.f32 1.0, %v6434_v60  ;;  %v6437_v14 = vld [vmem:[#allocation46_spill] sm:$0xff]  ;;  %v6438_v12 = vld [vmem:[#allocation89_spill] sm:$0xff] }
 0x218   : > { %v1910_v24 = vsel %vm1907_vm0, %v1909_v46, %v1905_v52  ;;  %v2141_v18 = vadd.f32 %v6433_v4, %v2140_v53  ;;  %vm2147_vm1 = vcmp.eq.f32.partialorder %v2146_v48, 8.507059e+37  ;;  %v2678_v51 = vadd.f32 %v2607_v41, %v6435_v13  ;;  %v6439_v43 = vld [vmem:[#allocation41_spill] sm:$0xff]  ;;  %v6444_v13 = vld [vmem:[#allocation44_spill] sm:$0xff] }
 0x219   : > { %v5602_v22 = vpop.eup %3557  ;;  %v2149_v31 = vor.u32 1.1754944e-38, %v2148_v10  ;;  %v2723_v30 = vmul.f32 %v3554_v17, %v1910_v24  ;;  %v1915_v1 = vmul.f32 %v6436_v16, %v1914_v56  ;;  %vm1918_vm3 = vweird.f32 %v6436_v16 }
 0x21a   : > { %v2145_v20 = vsel %vm2144_vm2, %v6433_v4, %v2141_v18  ;;  %v1921_v34 = vand.u32 2147483647, %v6437_v14  ;;  %v1923_v49 = vand.u32 2147483648, %v6437_v14  ;;  %v2154_v59 = vsub.f32 1.0, %v6438_v12  ;;  %v6442_v4 = vld [vmem:[#allocation49_spill] sm:$0xff] }
 0x21b   : > { %v2150_v48 = vsel %vm2147_vm1, %v2149_v31, %v2145_v20  ;;  %v1916_v41 = vadd.f32 %v6436_v16, %v1915_v1  ;;  %vm1917_vm4 = vweird.f32 %v6437_v14  ;;  %vm2157_vm5 = vweird.f32 %v6439_v43  ;;  %v2575_v10 = vpop.permute.xlu0 %2574 }
 0x21c   : > { %v2739_v17 = vmul.f32 %v3552_v33, %v2150_v48  ;;  %vm5617_vm6 = vmor %vm1917_vm4, %vm1918_vm3  ;;  %v1924_v46 = vor.u32 1.1754944e-38, %v1923_v49  ;;  %v2155_v53 = vmul.f32 %v6442_v4, %v2154_v59  ;;  %vm2158_vm7 = vweird.f32 %v6442_v4  ;;  %v6443_v33 = vld [vmem:[#allocation86_spill] sm:$0xff] }
 0x21d   : > { %v3560_v60 = vpop.eup %3559  ;;  %v1920_v56 = vsel %vm5617_vm6, %v6436_v16, %v1916_v41  ;;  %v2161_v24 = vand.u32 2147483647, %v6439_v43  ;;  %v2163_v18 = vand.u32 2147483648, %v6439_v43  ;;  %v2470_v31 = vmul.f32 %v6444_v13, %v6443_v33  ;;  %vm2159_vm9 = vmor %vm2157_vm5, %vm2158_vm7 }
 0x21e   : > { %v2755_v1 = vadd.f32 %v2739_v17, %v2723_v30  ;;  %vm1922_vm8 = vcmp.eq.f32.partialorder %v1921_v34, 8.507059e+37  ;;  %v2156_v20 = vadd.f32 %v6442_v4, %v2155_v53  ;;  %v1929_v14 = vsub.f32 1.0, %v5047_v37 }
 0x21f   : > { %3561 = vtanh.f32 %v5560_v6  ;;  %v1925_v49 = vsel %vm1922_vm8, %v1924_v46, %v1920_v56  ;;  %v2164_v16 = vor.u32 1.1754944e-38, %v2163_v18  ;;  %v2662_v12 = vadd.f32 %v2575_v10, %v2470_v31  ;;  %v6447_v46 = vld [vmem:[#allocation91_spill] sm:$0xff]  ;;  %v6448_v10 = vld [vmem:[#allocation50_spill] sm:$0xff] }
 0x220   : > { %2808 = vrot.lane.b32.xlu2 %v2755_v1, %s3678_s21  ;;  %v2160_v59 = vsel %vm2159_vm9, %v6442_v4, %v2156_v20  ;;  %vm2162_vm10 = vcmp.eq.f32.partialorder %v2161_v24, 8.507059e+37  ;;  %v2724_v48 = vmul.f32 %v3560_v60, %v1925_v49  ;;  %v1930_v30 = vmul.f32 %v4655_v7, %v1929_v14  ;;  %v6449_v24 = vld [vmem:[#allocation57_spill] sm:$0xff] }
 0x221   : > { %3563 = vtanh.f32 %v2678_v51  ;;  %v2165_v34 = vsel %vm2162_vm10, %v2164_v16, %v2160_v59  ;;  %v5638_v41 = vadd.f32 %v2678_v51, %v2662_v12  ;;  %vm1933_vm11 = vweird.f32 %v4655_v7  ;;  %v6453_v59 = vld [vmem:[#allocation56_spill] sm:$0xff] }
 0x222   : > { %v2740_v37 = vmul.f32 %v5468_v27, %v2165_v34  ;;  %v1931_v6 = vadd.f32 %v4655_v7, %v1930_v30  ;;  %vm1932_vm12 = vweird.f32 %v6345_v55  ;;  %v1936_v43 = vand.u32 2147483647, %v6345_v55 }
 0x223   : > { %v5646_v17 = vmul.f32 -1.442695, %v5256_v39  ;;  %3565 = vtanh.f32 %v2662_v12  ;;  %vm5648_vm13 = vmor %vm1932_vm12, %vm1933_vm11  ;;  %v1938_v51 = vand.u32 2147483648, %v6345_v55  ;;  %v2169_v4 = vsub.f32 1.0, %v6447_v46 }
 0x224   : > { %v2756_v53 = vadd.f32 %v2740_v37, %v2724_v48  ;;  %v1935_v27 = vsel %vm5648_vm13, %v4655_v7, %v1931_v6  ;;  %vm2172_vm14 = vweird.f32 %v6448_v10  ;;  %v2176_v60 = vand.u32 2147483647, %v6448_v10  ;;  %v6452_v7 = vld [vmem:[#allocation32_spill] sm:$0xff]  ;;  %v6454_v37 = vld [vmem:[#allocation61_spill] sm:$0xff] }
 0x225   : > { %v3562_v39 = vpop.eup %3561  ;;  %v1939_v56 = vor.u32 1.1754944e-38, %v1938_v51  ;;  %v2170_v18 = vmul.f32 %v6449_v24, %v2169_v4  ;;  %vm2173_vm15 = vweird.f32 %v6449_v24  ;;  %v2178_v33 = vand.u32 2147483648, %v6448_v10  ;;  %v6455_v51 = vld [vmem:[#allocation64_spill] sm:$0xff]  ;;  %v2579_v10 = vpop.permute.xlu2 %2578 }
 0x226   : > { %2810 = vrot.lane.b32.xlu0 %v2756_v53, %s3678_s21  ;;  %vm1937_vm0 = vcmp.eq.f32.partialorder %v1936_v43, 8.507059e+37  ;;  %vm5663_vm1 = vcmp.eq.f32.partialorder %v2176_v60, 8.507059e+37  ;;  %v2471_v13 = vmul.f32 %v6452_v7, %v5021_v3  ;;  %v1944_v31 = vsub.f32 1.0, %v5106_v38  ;;  %vm2174_vm4 = vmor %vm2172_vm14, %vm2173_vm15 }
 0x227   : > { %v3564_v1 = vpop.eup %3563  ;;  %v1940_v20 = vsel %vm1937_vm0, %v1939_v56, %v1935_v27  ;;  %v2171_v14 = vadd.f32 %v6449_v24, %v2170_v18  ;;  %vm1947_vm2 = vweird.f32 %v4672_v2  ;;  %vm1948_vm3 = vweird.f32 %v4733_v28 }
 0x228   : > { %v2179_v49 = vor.u32 1.1754944e-38, %v2178_v33  ;;  %v1945_v16 = vmul.f32 %v4733_v28, %v1944_v31  ;;  %v1953_v12 = vand.u32 2147483648, %v4672_v2  ;;  %v2184_v3 = vsub.f32 1.0, %v6453_v59  ;;  %vm1949_vm7 = vmor %vm1947_vm2, %vm1948_vm3 }
 0x229   : > { %v3566_v48 = vpop.eup %3565  ;;  %v2175_v38 = vsel %vm2174_vm4, %v6449_v24, %v2171_v14  ;;  %v2725_v30 = vmul.f32 %v5593_v40, %v1940_v20  ;;  %v1951_v34 = vand.u32 2147483647, %v4672_v2  ;;  %vm2187_vm5 = vweird.f32 %v6454_v37  ;;  %v2577_v43 = vpop.permute.xlu1 %2576 }
 0x22a   : > { %v2180_v6 = vsel %vm5663_vm1, %v2179_v49, %v2175_v38  ;;  %v1946_v52 = vadd.f32 %v4733_v28, %v1945_v16  ;;  %v2185_v46 = vmul.f32 %v6455_v51, %v2184_v3  ;;  %vm2188_vm6 = vweird.f32 %v6455_v51  ;;  %v6457_v16 = vld [vmem:[#allocation95_spill] sm:$0xff] }
 0x22b   : > { %v2741_v4 = vmul.f32 %v3562_v39, %v2180_v6  ;;  %v2663_v53 = vadd.f32 %v2577_v43, %v2471_v13  ;;  %v2191_v40 = vand.u32 2147483647, %v6454_v37  ;;  %v2193_v27 = vand.u32 2147483648, %v6454_v37  ;;  %v6456_v39 = vld [vmem:[#allocation43_spill] sm:$0xff]  ;;  %vm2189_vm9 = vmor %vm2187_vm5, %vm2188_vm6 }
 0x22c   : > { %v1950_v60 = vsel %vm1949_vm7, %v4733_v28, %v1946_v52  ;;  %v1954_v56 = vor.u32 1.1754944e-38, %v1953_v12  ;;  %v2186_v24 = vadd.f32 %v6455_v51, %v2185_v46  ;;  %v1959_v18 = vsub.f32 1.0, %v5118_v9 }
 0x22d   : > { %v2472_v33 = vmul.f32 %v6456_v39, %v5100_v32  ;;  %v2757_v55 = vadd.f32 %v2741_v4, %v2725_v30  ;;  %v5699_v7 = vadd.f32 %v5553_v23, %v2663_v53  ;;  %vm1952_vm8 = vcmp.eq.f32.partialorder %v1951_v34, 8.507059e+37  ;;  %v6459_v34 = vld [vmem:[#allocation66_spill] sm:$0xff]  ;;  %v6465_v39 = vld [vmem:[#allocation84_spill] sm:$0xff] }
 0x22e   : > { %3567 = vtanh.f32 %v2663_v53  ;;  %v1955_v2 = vsel %vm1952_vm8, %v1954_v56, %v1950_v60  ;;  %v2190_v28 = vsel %vm2189_vm9, %v6455_v51, %v2186_v24  ;;  %v2194_v13 = vor.u32 1.1754944e-38, %v2193_v27  ;;  %v6462_v4 = vld [vmem:[#allocation94_spill] sm:$0xff]  ;;  %v6463_v27 = vld [vmem:[#allocation99_spill] sm:$0xff] }
 0x22f   : > { %v2664_v31 = vadd.f32 %v2579_v10, %v2472_v33  ;;  %2812 = vrot.lane.b32.xlu1 %v2757_v55, %s3678_s21  ;;  %vm2192_vm10 = vcmp.eq.f32.partialorder %v2191_v40, 8.507059e+37  ;;  %v2726_v32 = vmul.f32 %v3566_v48, %v1955_v2  ;;  %v1960_v9 = vmul.f32 %v4817_v19, %v1959_v18  ;;  %v6458_v48 = vld [vmem:[#allocation74_spill] sm:$0xff]  ;;  %v6464_v24 = vld [vmem:[#allocation75_spill] sm:$0xff] }
 0x230   : > { %v2611_v23 = vpop.permute.xlu0 %2610  ;;  %v2195_v20 = vsel %vm2192_vm10, %v2194_v13, %v2190_v28  ;;  %vm1963_vm11 = vweird.f32 %v4817_v19  ;;  %v1968_v14 = vand.u32 2147483648, %v4745_v11  ;;  %v2199_v49 = vsub.f32 1.0, %v5114_v8  ;;  %v6466_v2 = vld [vmem:[#allocation98_spill] sm:$0xff] }
 0x231   : > { %v2680_v12 = vadd.f32 %v2611_v23, %v6457_v16  ;;  %v2742_v59 = vmul.f32 %v3564_v1, %v2195_v20  ;;  %v1961_v3 = vadd.f32 %v4817_v19, %v1960_v9  ;;  %v1966_v38 = vand.u32 2147483647, %v4745_v11  ;;  %v2613_v8 = vpop.permute.xlu1 %2612  ;;  %v6467_v9 = vld [vmem:[#allocation72_spill] sm:$0xff]  ;;  %v6468_v23 = vld [vmem:[#allocation79_spill] sm:$0xff]  ;;  %v2615_v20 = vpop.permute.xlu2 %2614 }
 0x232   : > { %3569 = vpow2.f32 %v5646_v17  ;;  %vm1962_vm12 = vweird.f32 %v4745_v11  ;;  %v2200_v30 = vmul.f32 %v6458_v48, %v2199_v49  ;;  %vm2202_vm13 = vweird.f32 %v6459_v34 }
 0x233   : > { %3571 = vtanh.f32 %v2664_v31  ;;  %v5718_v37 = vadd.f32 %v2680_v12, %v2664_v31  ;;  %v2758_v6 = vadd.f32 %v2742_v59, %v2726_v32  ;;  %vm1964_vm14 = vmor %vm1962_vm12, %vm1963_vm11  ;;  %v1969_v1 = vor.u32 1.1754944e-38, %v1968_v14 }
 0x234   : > { %v3568_v43 = vpop.eup %3567  ;;  %v1965_v52 = vsel %vm1964_vm14, %v4817_v19, %v1961_v3  ;;  %v2201_v17 = vadd.f32 %v6458_v48, %v2200_v30  ;;  %vm2203_vm15 = vweird.f32 %v6458_v48  ;;  %v2206_v11 = vand.u32 2147483647, %v6459_v34  ;;  %v6469_v3 = vld [vmem:[#allocation97_spill] sm:$0xff] }
 0x235   : > { %v3146_v51 = vmul.f32 -1.442695, %v5169_v0  ;;  %3573 = vtanh.f32 %v2680_v12  ;;  %2814 = vrot.lane.b32.xlu2 %v2758_v6, %s3678_s21  ;;  %vm1967_vm0 = vcmp.eq.f32.partialorder %v1966_v38, 8.507059e+37  ;;  %vm5730_vm1 = vmor %vm2202_vm13, %vm2203_vm15  ;;  %v2208_v19 = vand.u32 2147483648, %v6459_v34 }
 0x236   : > { %v5736_v53 = vadd.f32 %v2613_v8, %v6462_v4  ;;  %v1970_v40 = vsel %vm1967_vm0, %v1969_v1, %v1965_v52  ;;  %v2205_v0 = vsel %vm5730_vm1, %v6458_v48, %v2201_v17  ;;  %v1974_v10 = vsub.f32 1.0, %v6463_v27  ;;  %v6472_v1 = vld [vmem:[#allocation103_spill] sm:$0xff]  ;;  %v6476_v27 = vld [vmem:[#allocation52_spill] sm:$0xff] }
 0x237   : > { %vm2207_vm2 = vcmp.eq.f32.partialorder %v2206_v11, 8.507059e+37  ;;  %v2209_v60 = vor.u32 1.1754944e-38, %v2208_v19  ;;  %v2727_v56 = vmul.f32 %v3568_v43, %v1970_v40  ;;  %vm1977_vm3 = vweird.f32 %v6464_v24  ;;  %v6474_v19 = vld [vmem:[#allocation100_spill] sm:$0xff] }
 0x238   : > { %v3570_v18 = vpop.eup %3569  ;;  %v1975_v33 = vmul.f32 %v6465_v39, %v1974_v10  ;;  %vm1978_vm4 = vweird.f32 %v6465_v39  ;;  %v1981_v55 = vand.u32 2147483647, %v6464_v24  ;;  %v2214_v28 = vsub.f32 1.0, %v6466_v2 }
 0x239   : > { %v3572_v13 = vpop.eup %3571  ;;  %v2210_v31 = vsel %vm2207_vm2, %v2209_v60, %v2205_v0  ;;  %v1983_v32 = vand.u32 2147483648, %v6464_v24  ;;  %vm2217_vm5 = vweird.f32 %v6467_v9  ;;  %vm2218_vm6 = vweird.f32 %v6468_v23  ;;  %vm5762_vm7 = vmor %vm1977_vm3, %vm1978_vm4  ;;  %v6475_v0 = vld [vmem:[#allocation102_spill] sm:$0xff] }
 0x23a   : > { %v2743_v14 = vmul.f32 %v5602_v22, %v2210_v31  ;;  %v1976_v49 = vadd.f32 %v6465_v39, %v1975_v33  ;;  %v2215_v16 = vmul.f32 %v6468_v23, %v2214_v28  ;;  %v2221_v12 = vand.u32 2147483647, %v6467_v9  ;;  %vm2219_vm8 = vmor %vm2217_vm5, %vm2218_vm6 }
 0x23b   : > { %v3574_v59 = vpop.eup %3573  ;;  %v5755_v38 = vadd.f32 1.0, %v6469_v3  ;;  %v3145_v48 = vmul.f32 -1.442695, %v5148_v26  ;;  %v2223_v22 = vand.u32 2147483648, %v6467_v9  ;;  %v1989_v34 = vsub.f32 1.0, %v5240_v44 }
 0x23c   : > { %3575 = vpow2.f32 %v5596_v58  ;;  %v2759_v6 = vadd.f32 %v2743_v14, %v2727_v56  ;;  %v1980_v8 = vsel %vm5762_vm7, %v6465_v39, %v1976_v49  ;;  %v2216_v26 = vadd.f32 %v6468_v23, %v2215_v16  ;;  %v6477_v39 = vld [vmem:[#allocation88_spill] sm:$0xff] }
 0x23d   : > { %3577 = vpow2.f32 %v3146_v51  ;;  %v5774_v43 = vadd.f32 %v2615_v20, %v6472_v1  ;;  %v1984_v52 = vor.u32 1.1754944e-38, %v1983_v32  ;;  %v2224_v44 = vor.u32 1.1754944e-38, %v2223_v22  ;;  %v6473_v51 = vld [vmem:[#allocation92_spill] sm:$0xff]  ;;  %v5801_v49 = vpop.permute.xlu2 %2584 }
 0x23e   : > { %3579 = vtanh.f32 %v5736_v53  ;;  %2816 = vrot.lane.b32.xlu0 %v2759_v6, %s3678_s21  ;;  %vm1982_vm9 = vcmp.eq.f32.partialorder %v1981_v55, 8.507059e+37  ;;  %v2220_v58 = vsel %vm2219_vm8, %v6468_v23, %v2216_v26  ;;  %vm2222_vm10 = vcmp.eq.f32.partialorder %v2221_v12, 8.507059e+37  ;;  %v6478_v55 = vld [vmem:[#allocation83_spill] sm:$0xff]  ;;  %v6479_v23 = vld [vmem:[#allocation85_spill] sm:$0xff] }
 0x23f   : > { %v1985_v17 = vsel %vm1982_vm9, %v1984_v52, %v1980_v8  ;;  %v2225_v11 = vsel %vm2222_vm10, %v2224_v44, %v2220_v58  ;;  %v1990_v46 = vmul.f32 %v6473_v51, %v1989_v34  ;;  %v2229_v4 = vsub.f32 1.0, %v6474_v19  ;;  %v6480_v34 = vld [vmem:[#allocation101_spill] sm:$0xff] }
 0x240   : > { %v5785_v40 = vadd.f32 1.0, %v3570_v18  ;;  %v2473_v10 = vmul.f32 %v6476_v27, %v6475_v0  ;;  %v2728_v60 = vmul.f32 %v3572_v13, %v1985_v17  ;;  %v2744_v56 = vmul.f32 %v3574_v59, %v2225_v11  ;;  %v6483_v26 = vld [vmem:[#allocation105_spill] sm:$0xff]  ;;  %v6484_v17 = vld [vmem:[#allocation96_spill] sm:$0xff] }
 0x241   : > { %3581 = vtanh.f32 %v5774_v43  ;;  %v2581_v24 = vpop.permute.xlu0 %2580  ;;  %v2230_v33 = vmul.f32 %v6477_v39, %v2229_v4  ;;  %vm2232_vm11 = vweird.f32 %v6478_v55  ;;  %vm2233_vm12 = vweird.f32 %v6477_v39 }
 0x242   : > { %v5793_v2 = vpop.eup %3575  ;;  %v2665_v28 = vadd.f32 %v2581_v24, %v2473_v10  ;;  %v2760_v31 = vadd.f32 %v2744_v56, %v2728_v60  ;;  %v2236_v18 = vand.u32 2147483647, %v6478_v55  ;;  %v2238_v32 = vand.u32 2147483648, %v6478_v55  ;;  %vm2234_vm15 = vmor %vm2232_vm11, %vm2233_vm12  ;;  %v6486_v10 = vld [vmem:[#allocation106_spill] sm:$0xff] }
 0x243   : > { %v3578_v9 = vpop.eup %3577  ;;  %v1991_v13 = vadd.f32 %v6473_v51, %v1990_v46  ;;  %vm1992_vm13 = vweird.f32 %v6479_v23  ;;  %vm1993_vm14 = vweird.f32 %v6473_v51  ;;  %v2231_v20 = vadd.f32 %v6477_v39, %v2230_v33  ;;  %v6485_v46 = vld [vmem:[#allocation93_spill] sm:$0xff] }
 0x244   : > { %v3580_v14 = vpop.eup %3579  ;;  %3583 = vtanh.f32 %v2665_v28  ;;  %v5804_v16 = vadd.f32 %v5736_v53, %v2665_v28  ;;  %2818 = vrot.lane.b32.xlu1 %v2760_v31, %s3678_s21  ;;  %v1998_v12 = vand.u32 2147483648, %v6479_v23  ;;  %v2239_v59 = vor.u32 1.1754944e-38, %v2238_v32  ;;  %vm5822_vm1 = vmor %vm1992_vm13, %vm1993_vm14 }
 0x245   : > { %v1996_v3 = vand.u32 2147483647, %v6479_v23  ;;  %v2235_v30 = vsel %vm2234_vm15, %v6477_v39, %v2231_v20  ;;  %vm2237_vm0 = vcmp.eq.f32.partialorder %v2236_v18, 8.507059e+37  ;;  %v2004_v22 = vsub.f32 1.0, %v5350_v42  ;;  %v2621_v31 = vpop.permute.xlu2 %2620 }
 0x246   : > { %v5816_v53 = vadd.f32 1.0, %v6480_v34  ;;  %3585 = vpow2.f32 %v3145_v48  ;;  %v2240_v8 = vsel %vm2237_vm0, %v2239_v59, %v2235_v30  ;;  %v2244_v1 = vsub.f32 1.0, %v6483_v26 }
 0x247   : > { %v3582_v52 = vpop.eup %3581  ;;  %v5827_v44 = vadd.f32 1.0, %v3578_v9  ;;  %3587 = vrcp.f32 %v5785_v40  ;;  %v1995_v42 = vsel %vm5822_vm1, %v6473_v51, %v1991_v13  ;;  %v2745_v48 = vmul.f32 %v3580_v14, %v2240_v8  ;;  %v6487_v51 = vld [vmem:[#allocation39_spill] sm:$0xff] }
 0x248   : > { %v1999_v58 = vor.u32 1.1754944e-38, %v1998_v12  ;;  %v2245_v11 = vmul.f32 %v6484_v17, %v2244_v1  ;;  %vm2247_vm2 = vweird.f32 %v6485_v46  ;;  %vm2248_vm3 = vweird.f32 %v6484_v17 }
 0x249   : > { %vm1997_vm4 = vcmp.eq.f32.partialorder %v1996_v3, 8.507059e+37  ;;  %v2005_v19 = vmul.f32 %v5102_v25, %v2004_v22  ;;  %v2251_v4 = vand.u32 2147483647, %v6485_v46  ;;  %v2253_v0 = vand.u32 2147483648, %v6485_v46  ;;  %vm2249_vm5 = vmor %vm2247_vm2, %vm2248_vm3 }
 0x24a   : > { %v3584_v27 = vpop.eup %3583  ;;  %3589 = vrcp.f32 %v5755_v38  ;;  %v2474_v60 = vmul.f32 %v6487_v51, %v6486_v10  ;;  %v2000_v56 = vsel %vm1997_vm4, %v1999_v58, %v1995_v42  ;;  %v2246_v24 = vadd.f32 %v6484_v17, %v2245_v11 }
 0x24b   : > { %3591 = vrcp.f32 %v5816_v53  ;;  %v2583_v39 = vpop.permute.xlu1 %2582  ;;  %v2729_v33 = vmul.f32 %v3584_v27, %v2000_v56  ;;  %v2254_v55 = vor.u32 1.1754944e-38, %v2253_v0  ;;  %vm2252_vm6 = vcmp.eq.f32.partialorder %v2251_v4, 8.507059e+37  ;;  %v6490_v0 = vld [vmem:[#allocation51_spill] sm:$0xff] }
 0x24c   : > { %v3586_v28 = vpop.eup %3585  ;;  %3593 = vrcp.f32 %v5827_v44  ;;  %v2666_v18 = vadd.f32 %v2583_v39, %v2474_v60  ;;  %v2250_v32 = vsel %vm2249_vm5, %v6484_v17, %v2246_v24  ;;  %v2006_v23 = vadd.f32 %v5102_v25, %v2005_v19 }
 0x24d   : > { %v3588_v9 = vpop.eup %3587  ;;  %v2761_v13 = vadd.f32 %v2745_v48, %v2729_v33  ;;  %vm2008_vm7 = vweird.f32 %v5102_v25  ;;  %v2255_v20 = vsel %vm2252_vm6, %v2254_v55, %v2250_v32  ;;  %v2013_v12 = vand.u32 2147483648, %v5057_v35 }
 0x24e   : > { %3595 = vtanh.f32 %v2666_v18  ;;  %v5849_v14 = vadd.f32 %v5774_v43, %v2666_v18  ;;  %v2746_v59 = vmul.f32 %v3582_v52, %v2255_v20  ;;  %v5853_v3 = vadd.f32 %v2621_v31, %v5353_v61 }
 0x24f   : > { %2820 = vrot.lane.b32.xlu2 %v2761_v13, %s3678_s21  ;;  %vm2007_vm8 = vweird.f32 %v5057_v35  ;;  %v2011_v30 = vand.u32 2147483647, %v5057_v35  ;;  %v5861_v34 = vadd.f32 1.0, %v5793_v2  ;;  %v2288_v43 = vmul.f32 %v3588_v9, %v5785_v40 }
 0x250   : > { %v5858_v22 = vpop.eup %3589  ;;  %vm2009_vm9 = vmor %vm2007_vm8, %vm2008_vm7  ;;  %v5866_v8 = vadd.f32 1.0, %v3586_v28  ;;  %v2014_v1 = vor.u32 1.1754944e-38, %v2013_v12  ;;  %3597 = vtanh.f32 %v5853_v3  ;;  %vm2292_vm11 = vweird.f32 %v5785_v40 }
 0x251   : > { %v5864_v6 = vpop.eup %3591  ;;  %v2010_v61 = vsel %vm2009_vm9, %v5102_v25, %v2006_v23  ;;  %vm2012_vm10 = vcmp.eq.f32.partialorder %v2011_v30, 8.507059e+37  ;;  %3599 = vrcp.f32 %v5861_v34  ;;  %v2289_v52 = vsub.f32 1.0, %v2288_v43 }
 0x252   : > { %v5869_v26 = vpop.eup %3593  ;;  %v2015_v2 = vsel %vm2012_vm10, %v2014_v1, %v2010_v61  ;;  %v2018_v42 = vmul.f32 %v5864_v6, %v5816_v53  ;;  %3601 = vrcp.f32 %v5866_v8  ;;  %v2258_v25 = vmul.f32 %v5858_v22, %v5755_v38 }
 0x253   : > { %v2290_v58 = vmul.f32 %v3588_v9, %v2289_v52  ;;  %vm2293_vm12 = vweird.f32 %v3588_v9  ;;  %v2048_v17 = vmul.f32 %v5869_v26, %v5827_v44  ;;  %v2296_v19 = vand.u32 2147483647, %v5785_v40 }
 0x254   : > { %v3596_v35 = vpop.eup %3595  ;;  %vm5881_vm13 = vmor %vm2292_vm11, %vm2293_vm12  ;;  %v2298_v4 = vand.u32 2147483648, %v5785_v40  ;;  %v2475_v27 = vmul.f32 %v6490_v0, %v5302_v15  ;;  %v2019_v60 = vsub.f32 1.0, %v2018_v42  ;;  %v2259_v15 = vsub.f32 1.0, %v2258_v25 }
 0x255   : > { %v2730_v48 = vmul.f32 %v3596_v35, %v2015_v2  ;;  %v2291_v10 = vadd.f32 %v3588_v9, %v2290_v58  ;;  %vm2297_vm14 = vcmp.eq.f32.partialorder %v2296_v19, 8.507059e+37  ;;  %v2049_v28 = vsub.f32 1.0, %v2048_v17 }
 0x256   : > { %v3598_v51 = vpop.eup %3597  ;;  %v2299_v56 = vor.u32 1.1754944e-38, %v2298_v4  ;;  %v2667_v39 = vadd.f32 %v5801_v49, %v2475_v27  ;;  %v2020_v32 = vmul.f32 %v5864_v6, %v2019_v60  ;;  %vm2846_vm15 = vcmask 523264  }
 0x257   : > { %v2762_v11 = vadd.f32 %v2746_v59, %v2730_v48  ;;  %v5890_v24 = vpop.eup %3599  ;;  %v2295_v33 = vsel %vm5881_vm13, %v3588_v9, %v2291_v10  ;;  %v6491_v9 = vld [vmem:[#allocation59_spill] sm:$0xff]  ;;  %v2260_v20 = vmul.f32 %v5858_v22, %v2259_v15  ;;  %v2050_v12 = vmul.f32 %v5869_v26, %v2049_v28 }
 0x258   : > { %v5896_v40 = vpop.eup %3601  ;;  %v2300_v31 = vsel %vm2297_vm14, %v2299_v56, %v2295_v33  ;;  %v2273_v13 = vmul.f32 %v5890_v24, %v5861_v34  ;;  %3603 = vtanh.f32 %v2667_v39  ;;  %v2476_v23 = vmul.f32 %v6491_v9, %v5355_v62  ;;  %v6492_v59 = vld [vmem:[#allocation47_spill] sm:$0xff] }
 0x259   : > { %2822 = vrot.lane.b32.xlu0 %v2762_v11, %s3678_s21  ;;  %v5898_v18 = vmul.f32 %v3598_v51, %v2300_v31  ;;  %v2033_v49 = vmul.f32 %v5896_v40, %v5866_v8  ;;  %vm2863_vm0 = vcmask 1048064   ;;  %v2477_v30 = vmul.f32 %v6492_v59, %v5395_v29 }
 0x25a   : > { %vm2022_vm1 = vweird.f32 %v5816_v53  ;;  %vm2023_vm2 = vweird.f32 %v5864_v6  ;;  %v2021_v43 = vadd.f32 %v5864_v6, %v2020_v32  ;;  %v2026_v61 = vand.u32 2147483647, %v5816_v53 }
 0x25b   : > { %v2587_v55 = vpop.permute.xlu0 %2586  ;;  %v2028_v1 = vand.u32 2147483648, %v5816_v53  ;;  %vm2262_vm3 = vweird.f32 %v5755_v38  ;;  %vm2263_vm4 = vweird.f32 %v5858_v22  ;;  %v2266_v2 = vand.u32 2147483647, %v5755_v38  ;;  %vm5938_vm7 = vmor %vm2022_vm1, %vm2023_vm2 }
 0x25c   : > { %v2268_v29 = vand.u32 2147483648, %v5755_v38  ;;  %vm2052_vm5 = vweird.f32 %v5827_v44  ;;  %v2261_v48 = vadd.f32 %v5858_v22, %v2260_v20  ;;  %v2051_v25 = vadd.f32 %v5869_v26, %v2050_v12  ;;  %vm5953_vm8 = vmor %vm2262_vm3, %vm2263_vm4 }
 0x25d   : > { %vm2053_vm6 = vweird.f32 %v5869_v26  ;;  %v2058_v46 = vand.u32 2147483648, %v5827_v44  ;;  %v2034_v19 = vsub.f32 1.0, %v2033_v49  ;;  %v2274_v4 = vsub.f32 1.0, %v2273_v13 }
 0x25e   : > { %v3604_v58 = vpop.eup %3603  ;;  %v2056_v53 = vand.u32 2147483647, %v5827_v44  ;;  %vm2027_vm9 = vcmp.eq.f32.partialorder %v2026_v61, 8.507059e+37  ;;  %vm2054_vm10 = vmor %vm2052_vm5, %vm2053_vm6  ;;  %v2265_v38 = vsel %vm5953_vm8, %v5858_v22, %v2261_v48  ;;  %v2269_v10 = vor.u32 1.1754944e-38, %v2268_v29 }
 0x25f   : > { %v2055_v51 = vsel %vm2054_vm10, %v5869_v26, %v2051_v25  ;;  %v2059_v56 = vor.u32 1.1754944e-38, %v2058_v46  ;;  %v2275_v33 = vmul.f32 %v5890_v24, %v2274_v4  ;;  %vm2267_vm11 = vcmp.eq.f32.partialorder %v2266_v2, 8.507059e+37  ;;  %v6497_v26 = vld [vmem:[#allocation104_spill] sm:$0xff] }
 0x260   : > { %vm2057_vm12 = vcmp.eq.f32.partialorder %v2056_v53, 8.507059e+37  ;;  %v2270_v28 = vsel %vm2267_vm11, %v2269_v10, %v2265_v38  ;;  %vm2037_vm13 = vweird.f32 %v5866_v8  ;;  %vm2038_vm14 = vweird.f32 %v5896_v40 }
 0x261   : > { %v2043_v13 = vand.u32 2147483648, %v5866_v8  ;;  %vm2277_vm1 = vweird.f32 %v5861_v34  ;;  %v2276_v20 = vadd.f32 %v5890_v24, %v2275_v33  ;;  %vm2278_vm2 = vweird.f32 %v5890_v24  ;;  %vm5989_vm3 = vmor %vm2037_vm13, %vm2038_vm14 }
 0x262   : > { %v2803_v62 = vpop.permute.xlu2 %2802  ;;  %v2589_v35 = vpop.permute.xlu1 %2588  ;;  %vm2279_vm4 = vmor %vm2277_vm1, %vm2278_vm2 }
 0x263   : > { %v2617_v52 = vpop.permute.xlu0 %2616  ;;  %2849 = vst.msk [vmem:[%s5923_s12 + $0x10] sm:$0xff] %vm2846_vm15, %v2803_v62  ;;  %v2669_v42 = vadd.f32 %v2589_v35, %v2477_v30  ;;  %v2283_v30 = vand.u32 2147483648, %v5861_v34  ;;  %v2281_v62 = vand.u32 2147483647, %v5861_v34 }
 0x264   : > { %v2683_v17 = vadd.f32 %v2617_v52, %v5299_v57  ;;  %2866 = vst.msk [vmem:[%s5923_s12 + $0x10] sm:$0xff] %vm2863_vm0, %v5434_v50  ;;  %v2025_v57 = vsel %vm5938_vm7, %v5864_v6, %v2021_v43  ;;  %v2668_v6 = vadd.f32 %v2587_v55, %v2476_v23  ;;  %v2060_v55 = vsel %vm2057_vm12, %v2059_v56, %v2055_v51 }
 0x265   : > { %3605 = vtanh.f32 %v2669_v42  ;;  %v5944_v0 = vadd.f32 %v5853_v3, %v2669_v42  ;;  %v2029_v3 = vor.u32 1.1754944e-38, %v2028_v1  ;;  %v2041_v1 = vand.u32 2147483647, %v5866_v8 }
 0x266   : > { %3607 = vtanh.f32 %v2683_v17  ;;  %v5958_v27 = vadd.f32 %v2683_v17, %v2667_v39  ;;  %v2035_v39 = vmul.f32 %v5896_v40, %v2034_v19  ;;  %v2044_v8 = vor.u32 1.1754944e-38, %v2043_v13 }
 0x267   : > { %v2030_v60 = vsel %vm2027_vm9, %v2029_v3, %v2025_v57  ;;  %3609 = vtanh.f32 %v2668_v6  ;;  %v2284_v29 = vor.u32 1.1754944e-38, %v2283_v30  ;;  %vm2042_vm5 = vcmp.eq.f32.partialorder %v2041_v1, 8.507059e+37 }
 0x268   : > { %v2731_v15 = vmul.f32 %v3604_v58, %v2030_v60  ;;  %v2036_v23 = vadd.f32 %v5896_v40, %v2035_v39  ;;  %vm2282_vm6 = vcmp.eq.f32.partialorder %v2281_v62, 8.507059e+37 }
 0x26a   : > { %v2619_v44 = vpop.permute.xlu1 %2618 }
 0x26b   : > { %v3606_v22 = vpop.eup %3605  ;;  %v2684_v31 = vadd.f32 %v2619_v44, %v6497_v26  ;;  %v2799_v32 = vpop.permute.xlu0 %2798 }
 0x26c   : > { %v3608_v49 = vpop.eup %3607  ;;  %2847 = vst.msk [vmem:[%s5923_s12] sm:$0xff] %vm2846_vm15, %v2799_v32  ;;  %v2733_v9 = vmul.f32 %v3606_v22, %v2060_v55 }
 0x26d   : > { %3611 = vtanh.f32 %v2684_v31  ;;  %v2780_v12 = vadd.f32 %v2684_v31, %v2668_v6  ;;  %2864 = vst.msk [vmem:[%s5923_s12] sm:$0xff] %vm2863_vm0, %v5361_v36  ;;  %v2747_v59 = vmul.f32 %v3608_v49, %v2270_v28  ;;  %v2040_v36 = vsel %vm5989_vm3, %v5896_v40, %v2036_v23  ;;  %v3610_v2 = vpop.eup %3609 }
 0x26e   : > { %v2765_v43 = vadd.f32 %v5898_v18, %v2733_v9  ;;  %v2280_v18 = vsel %vm2279_vm4, %v5890_v24, %v2276_v20  ;;  %v2045_v42 = vsel %vm2042_vm5, %v2044_v8, %v2040_v36 }
 0x26f   : > { %v2763_v35 = vadd.f32 %v2747_v59, %v2731_v15  ;;  %v2285_v48 = vsel %vm2282_vm6, %v2284_v29, %v2280_v18  ;;  %v2732_v24 = vmul.f32 %v3610_v2, %v2045_v42 }
 0x270   : > { %2828 = vrot.lane.b32.xlu0 %v2765_v43, %s3678_s21 }
 0x271   : > { %2824 = vrot.lane.b32.xlu1 %v2763_v35, %s3678_s21 }
 0x273   : > { %v3612_v34 = vpop.eup %3611  ;;  %v2801_v52 = vpop.permute.xlu1 %2800 }
 0x274   : > { %2848 = vst.msk [vmem:[%s5923_s12 + $0x8] sm:$0xff] %vm2846_vm15, %v2801_v52  ;;  %v2748_v40 = vmul.f32 %v3612_v34, %v2285_v48 }
 0x275   : > { %2865 = vst.msk [vmem:[%s5923_s12 + $0x8] sm:$0xff] %vm2863_vm0, %v5346_v5 }
 0x276   : > { %v2764_v25 = vadd.f32 %v2748_v40, %v2732_v24 }
 0x278   : > { %2826 = vrot.lane.b32.xlu2 %v2764_v25, %s3678_s21  ;;  %s2893_s21 = sshll.u32 %s5923_s12, 4  ;;  %s2894_s21 = int_to_ptr.vmem [resolvable:$true] %s2893_s21 }
 0x27a   : > { %v2809_v58 = vpop.permute.xlu2 %2808 }
 0x27b   : > { %2852 = vst.msk [vmem:[%s5923_s12 + $0x28] sm:$0xff] %vm2846_vm15, %v2809_v58 }
 0x27c   : > { %2869 = vst.msk [vmem:[%s5923_s12 + $0x28] sm:$0xff] %vm2863_vm0, %v5534_v63 }
 0x282   : > { %v2805_v17 = vpop.permute.xlu0 %2804 }
 0x283   : > { %2850 = vst.msk [vmem:[%s5923_s12 + $0x18] sm:$0xff] %vm2846_vm15, %v2805_v17 }
 0x284   : > { %2867 = vst.msk [vmem:[%s5923_s12 + $0x18] sm:$0xff] %vm2863_vm0, %v5475_v21 }
 0x289   : > { %v2807_v5 = vpop.permute.xlu1 %2806 }
 0x28a   : > { %2851 = vst.msk [vmem:[%s5923_s12 + $0x20] sm:$0xff] %vm2846_vm15, %v2807_v5 }
 0x28b   : > { %2868 = vst.msk [vmem:[%s5923_s12 + $0x20] sm:$0xff] %vm2863_vm0, %v5466_v54 }
 0x28f   : > { %v2815_v11 = vpop.permute.xlu2 %2814 }
 0x290   : > { %2855 = vst.msk [vmem:[%s5923_s12 + $0x40] sm:$0xff] %vm2846_vm15, %v2815_v11 }
 0x291   : > { %2872 = vst.msk [vmem:[%s5923_s12 + $0x40] sm:$0xff] %vm2863_vm0, %v5638_v41 }
 0x298   : > { %v2811_v63 = vpop.permute.xlu0 %2810 }
 0x299   : > { %2853 = vst.msk [vmem:[%s5923_s12 + $0x30] sm:$0xff] %vm2846_vm15, %v2811_v63 }
 0x29a   : > { %2870 = vst.msk [vmem:[%s5923_s12 + $0x30] sm:$0xff] %vm2863_vm0, %v5574_v45 }
 0x2a1   : > { %v2813_v21 = vpop.permute.xlu1 %2812 }
 0x2a2   : > { %2854 = vst.msk [vmem:[%s5923_s12 + $0x38] sm:$0xff] %vm2846_vm15, %v2813_v21 }
 0x2a3   : > { %2871 = vst.msk [vmem:[%s5923_s12 + $0x38] sm:$0xff] %vm2863_vm0, %v5567_v47 }
 0x2a9   : > { %v2821_v54 = vpop.permute.xlu2 %2820 }
 0x2aa   : > { %2858 = vst.msk [vmem:[%s5923_s12 + $0x58] sm:$0xff] %vm2846_vm15, %v2821_v54 }
 0x2ab   : > { %2875 = vst.msk [vmem:[%s5923_s12 + $0x58] sm:$0xff] %vm2863_vm0, %v5804_v16 }
 0x2b0   : > { %v2817_v41 = vpop.permute.xlu0 %2816 }
 0x2b1   : > { %2856 = vst.msk [vmem:[%s5923_s12 + $0x48] sm:$0xff] %vm2846_vm15, %v2817_v41 }
 0x2b2   : > { %2873 = vst.msk [vmem:[%s5923_s12 + $0x48] sm:$0xff] %vm2863_vm0, %v5699_v7 }
 0x2b6   : > { %v2819_v45 = vpop.permute.xlu1 %2818 }
 0x2b7   : > { %2857 = vst.msk [vmem:[%s5923_s12 + $0x50] sm:$0xff] %vm2846_vm15, %v2819_v45 }
 0x2b8   : > { %2874 = vst.msk [vmem:[%s5923_s12 + $0x50] sm:$0xff] %vm2863_vm0, %v5718_v37 }
 0x2cb   : > { %v2823_v47 = vpop.permute.xlu0 %2822 }
 0x2cc   : > { %2859 = vst.msk [vmem:[%s5923_s12 + $0x60] sm:$0xff] %vm2846_vm15, %v2823_v47 }
 0x2cd   : > { %2876 = vst.msk [vmem:[%s5923_s12 + $0x60] sm:$0xff] %vm2863_vm0, %v5849_v14 }
 0x2d2   : > { %v2827_v16 = vpop.permute.xlu2 %2826 }
 0x2d3   : > { %2861 = vst.msk [vmem:[%s5923_s12 + $0x70] sm:$0xff] %vm2846_vm15, %v2827_v16 }
 0x2d4   : > { %2878 = vst.msk [vmem:[%s5923_s12 + $0x70] sm:$0xff] %vm2863_vm0, %v2780_v12 }
 0x2e2   : > { %v2829_v7 = vpop.permute.xlu0 %2828 }
 0x2e3   : > { %v2825_v37 = vpop.permute.xlu1 %2824  ;;  %2862 = vst.msk [vmem:[%s5923_s12 + $0x78] sm:$0xff] %vm2846_vm15, %v2829_v7 }
 0x2e4   : > { %2860 = vst.msk [vmem:[%s5923_s12 + $0x68] sm:$0xff] %vm2846_vm15, %v2825_v37 }
 0x2e5   : > { %2877 = vst.msk [vmem:[%s5923_s12 + $0x68] sm:$0xff] %vm2863_vm0, %v5958_v27 }
 0x2e6   : > { %2879 = vst.msk [vmem:[%s5923_s12 + $0x78] sm:$0xff] %vm2863_vm0, %v5944_v0 }
 0x2e7   : > { %3640 = shalt.err (!%p3637_p3)
}
 0x2e8   : > { %s3679_s26 = smov 128  }
 0x2e9   : > { %3187 = dma.vmem_to_hbm [thread:$0]  (%p3763_p5), %s2894_s21, 2048, %s2896_s25, %s2881_s9, %s3679_s26, %s3679_s26, %s6217_s10  }
 0x2ea PF: > { %p3193_p4 = scmp.ge.s32.totalorder %s3675_s30, 2  ;;  %s2910_s12 = sand.u32 1, %s3663_s27  }
 0x2eb   : > { %s2911_s20 = scalar_lea.sflag [#allocation4], %s2910_s12 }
 0x2ec   : > { %p3190_p7 = pnand %p3193_p4, %p3767_p6 }
 0x2ee   : > { %p3191_p8 = pneg %p3190_p7 }
 0x2f0   : > { %3658 = dma.done.wait (%p3191_p8), %s2911_s20, 2048  }
 0x2f1   : > { %3660 = vsyncadd (%p3191_p8), %s2911_s20, 4294965248  ;;  %p18_p9 = scmp.ge.s32.totalorder %s3750_s11, 4   ;;  %s6500_s27 = smov %s3667_s28 }
 0x2f2   : > { %s6501_s28 = smov %s3671_s29  ;;  %s6502_s29 = smov %s3761_s14 }
 0x2f3   : > { %s6503_s30 = smov %s3750_s11  ;;  %20 = sbr.rel (!%p18_p9) target bundleno = 5 (0x5), region = 102 }
 0x2f8   :  { %2917 = vsyncpa [#allocation4], 1 }
 0x2f9   :  { %2919 = vsyncpa [#allocation4 + $0x1], 1 }

</bundles_post_ra>
